<compile_context>
chip_gen: v5e
topology: v5e:2x2
jax: 0.10.0
libtpu: 0.0.40
codegen_flags: <defaults>
</compile_context>

<pallas_src>
import numpy as np
import jax
import jax.numpy as jnp
from jax import lax
from jax.experimental import pallas as pl
from jax.experimental.pallas import tpu as pltpu

# ----------------------------------------------------------------------------
# Small synthetic CLIP config (shapes consistent with CLIPLossModel.forward)
# ----------------------------------------------------------------------------
IN_SIZE = 16
SCALE_FACTOR = 4
POOL_SIZE = 8
POOL_K = SCALE_FACTOR * IN_SIZE // POOL_SIZE                # AvgPool2d kernel (= 8)
IMG_RES = (IN_SIZE * SCALE_FACTOR - POOL_K) // POOL_K + 1   # pooled resolution (= 8)

PATCH = 4
N_PATCHES = (IMG_RES // PATCH) ** 2                         # 4
VISION_WIDTH = 32
VISION_LAYERS = 2
VISION_HEADS = 2
EMBED_DIM = 16

CONTEXT_LEN = 8
VOCAB_SIZE = 64
TEXT_WIDTH = 32
TEXT_LAYERS = 2
TEXT_HEADS = 2

LOGIT_SCALE = float(np.exp(np.log(1.0 / 0.07)))             # CLIP's logit_scale.exp()

# Packed weight-slab layout (one (504, 128) f32 slab per encoder).
LANES = 128
_LAYER_ROWS = 8 + 7 * VISION_WIDTH          # misc(8) + Wqkv(D)+Wout(D)+Wfc1(D)+Wfc2(4D) = 232
_V_TAIL = VISION_LAYERS * _LAYER_ROWS       # 464
_T_TAIL = TEXT_LAYERS * _LAYER_ROWS         # 464
_SLAB_ROWS = _V_TAIL + 8 + VISION_WIDTH     # 504  (tail misc 8 rows + proj D rows)


# ----------------------------------------------------------------------------
# Host-side constant: fold Upsample(nearest) + AvgPool2d + ViT patchify into a
# single linear operator (pooling is linear, so the composition is exact).
# ----------------------------------------------------------------------------
def _build_pool_patch_op():
    """op[(n_patches, 3*P*P, 3*H*W)]: flat image -> pooled patch pixels."""
    s, k, H = SCALE_FACTOR, POOL_K, IN_SIZE
    R, P = IMG_RES, PATCH
    g = R // P
    u = np.arange(H * s) // s
    A = np.zeros((R, H), np.float32)
    for i in range(R):
        for uu in u[i * k:(i + 1) * k]:
            A[i, uu] += 1.0 / k
    op = np.zeros((g * g, 3, P, P, 3, H, H), np.float32)
    for gi in range(g):
        for gj in range(g):
            blk = np.einsum('ip,jq->ijpq',
                            A[gi * P:(gi + 1) * P], A[gj * P:(gj + 1) * P])
            for c in range(3):
                op[gi * g + gj, c, :, :, c, :, :] = blk
    return op.reshape(g * g, 3 * P * P, 3 * H * H)


_POOL_PATCH_OP = _build_pool_patch_op()


# ----------------------------------------------------------------------------
# In-kernel helpers (traced inside the single fused kernel)
# ----------------------------------------------------------------------------
def _ln(x, ln):
    """LayerNorm; ln is (2, D): row 0 = gamma, row 1 = beta."""
    g = ln[0:1, :]
    b = ln[1:2, :]
    mean = jnp.mean(x, axis=-1, keepdims=True)
    d = x - mean
    var = jnp.mean(d * d, axis=-1, keepdims=True)
    return d * lax.rsqrt(var + 1e-5) * g + b


def _make_mask(n_blocks, L, causal):
    """Additive mask for block-diagonal (head*batch) attention, no int div/mod."""
    n = n_blocks * L
    r = lax.broadcasted_iota(jnp.int32, (n, n), 0)
    c = lax.broadcasted_iota(jnp.int32, (n, n), 1)
    rb = jnp.zeros_like(r)
    cb = jnp.zeros_like(c)
    for t in range(1, n_blocks):                       # rb = r // L via compares
        rb = rb + (r >= t * L).astype(jnp.int32)
        cb = cb + (c >= t * L).astype(jnp.int32)
    allow = rb == cb
    if causal:
        allow = jnp.logical_and(allow, (r - rb * L) >= (c - cb * L))
    return jnp.where(allow, jnp.float32(0.0), jnp.float32(-1e9))


def _encoder(x, slab, n_layers, n_heads, mask):
    """Pre-LN transformer on stacked (B*L, D) tokens; block-diagonal attention."""
    N, D = x.shape
    dh = D // n_heads
    scale = dh ** -0.5
    for l in range(n_layers):
        base = l * _LAYER_ROWS
        # Per-layer weight loads at point of use (short live ranges).
        ln1 = slab[base + 0:base + 2, 0:D]
        b_qkv = slab[base + 2:base + 3, 0:3 * D]
        b_out = slab[base + 3:base + 4, 0:D]
        ln2 = slab[base + 4:base + 6, 0:D]
        b_fc1 = slab[base + 6:base + 7, 0:4 * D]
        b_fc2 = slab[base + 7:base + 8, 0:D]
        w_qkv = slab[base + 8:base + 8 + D, 0:3 * D]
        w_out = slab[base + 8 + D:base + 8 + 2 * D, 0:D]
        w_fc1 = slab[base + 8 + 2 * D:base + 8 + 3 * D, 0:4 * D]
        w_fc2 = slab[base + 8 + 3 * D:base + 8 + 7 * D, 0:D]

        # ---- attention: all batches + all heads in two MXU passes ----------
        h = _ln(x, ln1)
        qkv = jnp.dot(h, w_qkv, preferred_element_type=jnp.float32) + b_qkv   # (N, 3D)
        q = jnp.concatenate(
            [qkv[:, hd * dh:(hd + 1) * dh] for hd in range(n_heads)], axis=0)
        k = jnp.concatenate(
            [qkv[:, D + hd * dh:D + (hd + 1) * dh] for hd in range(n_heads)], axis=0)
        v = jnp.concatenate(
            [qkv[:, 2 * D + hd * dh:2 * D + (hd + 1) * dh] for hd in range(n_heads)],
            axis=0)                                                           # (nh*N, dh)
        s = lax.dot_general(q, k, (((1,), (1,)), ((), ())),
                            preferred_element_type=jnp.float32) * scale + mask
        s = s - jnp.max(s, axis=-1, keepdims=True)
        p = jnp.exp(s)
        p = p * pl.reciprocal(jnp.sum(p, axis=-1, keepdims=True), approx=True)
        o = jnp.dot(p, v, preferred_element_type=jnp.float32)                # (nh*N, dh)
        a = jnp.concatenate(
            [o[hd * N:(hd + 1) * N, :] for hd in range(n_heads)], axis=1)    # (N, D)
        x = x + jnp.dot(a, w_out, preferred_element_type=jnp.float32) + b_out

        # ---- MLP ------------------------------------------------------------
        h = _ln(x, ln2)
        h = jnp.dot(h, w_fc1, preferred_element_type=jnp.float32) + b_fc1
        h = h * (1.0 / (1.0 + jnp.exp(-1.702 * h)))                          # QuickGELU
        x = x + jnp.dot(h, w_fc2, preferred_element_type=jnp.float32) + b_fc2
    return x


# ----------------------------------------------------------------------------
# The single fused forward kernel
# ----------------------------------------------------------------------------
def _clip_forward_kernel(eot_ref,                 # scalar-prefetch: (B,) int32 rows
                         xvis_ref, xtxt_ref,      # stacked tokens
                         vslab_ref, tslab_ref,    # packed weight slabs
                         o_ref,                   # (B, B) loss
                         txt_scr):                # VMEM scratch for EOT row reads
    B = o_ref.shape[0]
    Dv, Dt, E = VISION_WIDTH, TEXT_WIDTH, EMBED_DIM
    Lv = xvis_ref.shape[0] // B
    Lt = xtxt_ref.shape[0] // B

    # ---- vision encoder -----------------------------------------------------
    xv = xvis_ref[...]                                            # (B*Lv, Dv)
    xv = _ln(xv, vslab_ref[_V_TAIL + 0:_V_TAIL + 2, 0:Dv])        # ln_pre
    mask_v = _make_mask(VISION_HEADS * B, Lv, causal=False)
    xv = _encoder(xv, vslab_ref, VISION_LAYERS, VISION_HEADS, mask_v)
    cls = jnp.concatenate([xv[b * Lv:b * Lv + 1, :] for b in range(B)], axis=0)
    cls = _ln(cls, vslab_ref[_V_TAIL + 2:_V_TAIL + 4, 0:Dv])      # ln_post
    img_f = jnp.dot(cls, vslab_ref[_V_TAIL + 8:_V_TAIL + 8 + Dv, 0:E],
                    preferred_element_type=jnp.float32)           # (B, E)

    # ---- text encoder (causal) ----------------------------------------------
    xt = xtxt_ref[...]                                            # (B*Lt, Dt)
    mask_t = _make_mask(TEXT_HEADS * B, Lt, causal=True)
    xt = _encoder(xt, tslab_ref, TEXT_LAYERS, TEXT_HEADS, mask_t)
    xt = _ln(xt, tslab_ref[_T_TAIL + 2:_T_TAIL + 4, 0:Dt])        # ln_final
    txt_scr[...] = xt
    eot_tok = jnp.concatenate(
        [txt_scr[pl.ds(eot_ref[b], 1), :] for b in range(B)], axis=0)   # (B, Dt)
    txt_f = jnp.dot(eot_tok, tslab_ref[_T_TAIL + 8:_T_TAIL + 8 + Dt, 0:E],
                    preferred_element_type=jnp.float32)           # (B, E)

    # ---- feature normalization + logits + loss ------------------------------
    img_n = img_f * lax.rsqrt(jnp.sum(img_f * img_f, axis=-1, keepdims=True))
    txt_n = txt_f * lax.rsqrt(jnp.sum(txt_f * txt_f, axis=-1, keepdims=True))
    logits = lax.dot_general(img_n, txt_n, (((1,), (1,)), ((), ())),
                             preferred_element_type=jnp.float32)  # (B, B)
    o_ref[...] = 1.0 - (LOGIT_SCALE / 100.0) * logits


# ----------------------------------------------------------------------------
# Weight-slab packing (wrapper-side XLA glue, traced under jit)
# ----------------------------------------------------------------------------
def _pad_lanes(x):
    return jnp.pad(x, ((0, 0), (0, LANES - x.shape[1])))


def _pack_layer(blk, l):
    pieces = [
        blk['ln1'][l],            # 2 rows
        blk['b_qkv'][l],          # 1
        blk['b_out'][l],          # 1
        blk['ln2'][l],            # 2
        blk['b_fc1'][l],          # 1
        blk['b_fc2'][l],          # 1
        blk['w_qkv'][l],          # D
        blk['w_out'][l],          # D
        blk['w_fc1'][l],          # D
        blk['w_fc2'][l],          # 4D
    ]
    return jnp.concatenate([_pad_lanes(p) for p in pieces], axis=0)


def _pack_encoder_slab(blk, n_layers, ln_a, ln_b, proj):
    parts = [_pack_layer(blk, l) for l in range(n_layers)]
    tail_misc = jnp.concatenate(
        [_pad_lanes(ln_a), _pad_lanes(ln_b), jnp.zeros((4, LANES), jnp.float32)],
        axis=0)
    parts += [tail_misc, _pad_lanes(proj)]
    slab = jnp.concatenate(parts, axis=0)
    assert slab.shape == (_SLAB_ROWS, LANES)
    return slab


# ----------------------------------------------------------------------------
# Parameters (deterministic synthetic CLIP, per-layer weights stacked)
# ----------------------------------------------------------------------------
def init_params(key):
    keys = jax.random.split(key, 10)
    s = 0.02

    def ln_pair(d):
        return jnp.stack([jnp.ones((d,)), jnp.zeros((d,))], axis=0)   # (2, d)

    def blocks(bkey, d, n_layers):
        ks = jax.random.split(bkey, 4)
        return dict(
            ln1=jnp.tile(ln_pair(d)[None], (n_layers, 1, 1)),
            w_qkv=jax.random.normal(ks[0], (n_layers, d, 3 * d)) * s,
            b_qkv=jnp.zeros((n_layers, 1, 3 * d)),
            w_out=jax.random.normal(ks[1], (n_layers, d, d)) * s,
            b_out=jnp.zeros((n_layers, 1, d)),
            ln2=jnp.tile(ln_pair(d)[None], (n_layers, 1, 1)),
            w_fc1=jax.random.normal(ks[2], (n_layers, d, 4 * d)) * s,
            b_fc1=jnp.zeros((n_layers, 1, 4 * d)),
            w_fc2=jax.random.normal(ks[3], (n_layers, 4 * d, d)) * s,
            b_fc2=jnp.zeros((n_layers, 1, d)),
        )

    return dict(
        conv_w=jax.random.normal(keys[0], (3 * PATCH * PATCH, VISION_WIDTH)) * s,
        cls=jax.random.normal(keys[1], (1, VISION_WIDTH)) * s,
        v_pos=jax.random.normal(keys[2], (N_PATCHES + 1, VISION_WIDTH)) * s,
        v_ln_pre=ln_pair(VISION_WIDTH),
        v_blocks=blocks(keys[3], VISION_WIDTH, VISION_LAYERS),
        v_ln_post=ln_pair(VISION_WIDTH),
        v_proj=jax.random.normal(keys[4], (VISION_WIDTH, EMBED_DIM)) * s,
        tok_emb=jax.random.normal(keys[5], (VOCAB_SIZE, TEXT_WIDTH)) * s,
        t_pos=jax.random.normal(keys[6], (CONTEXT_LEN, TEXT_WIDTH)) * 0.01,
        t_blocks=blocks(keys[7], TEXT_WIDTH, TEXT_LAYERS),
        t_ln_final=ln_pair(TEXT_WIDTH),
        t_proj=jax.random.normal(keys[8], (TEXT_WIDTH, EMBED_DIM)) * s,
    )


# ----------------------------------------------------------------------------
# Wrapper: small XLA glue + one fused pallas_call
# ----------------------------------------------------------------------------
def clip_loss(image, text, params):
    """loss = 1 - logits_per_image / 100 (entire CLIP transformer in one kernel)."""
    B = image.shape[0]
    Lv = N_PATCHES + 1

    # Upsample(nearest) + AvgPool2d + patchify + patch-embed: tiny XLA GEMMs.
    img_flat = image.reshape(B, 3 * IN_SIZE * IN_SIZE)
    patches = jnp.einsum('bi,nfi->bnf', img_flat, jnp.asarray(_POOL_PATCH_OP))
    pe = jnp.einsum('bnf,fd->bnd', patches, params['conv_w'])           # (B, N, Dv)
    cls_tok = jnp.broadcast_to(params['cls'][None], (B, 1, VISION_WIDTH))
    x_vis = jnp.concatenate([cls_tok, pe], axis=1) + params['v_pos'][None]
    x_vis = x_vis.reshape(B * Lv, VISION_WIDTH)                         # stacked tokens

    # Token embedding lookup (+pos) and EOT row indices (XLA glue; see TODO).
    x_text = jnp.take(params['tok_emb'], text, axis=0) + params['t_pos']
    x_text = x_text.reshape(B * CONTEXT_LEN, TEXT_WIDTH)
    eot_rows = (jnp.arange(B, dtype=jnp.int32) * CONTEXT_LEN
                + jnp.argmax(text, axis=-1).astype(jnp.int32))          # (B,)

    # Pack all encoder weights into one lane-dense slab per encoder.
    v_slab = _pack_encoder_slab(params['v_blocks'], VISION_LAYERS,
                                params['v_ln_pre'], params['v_ln_post'],
                                params['v_proj'])
    t_slab = _pack_encoder_slab(params['t_blocks'], TEXT_LAYERS,
                                jnp.zeros((2, TEXT_WIDTH), jnp.float32),
                                params['t_ln_final'], params['t_proj'])

    inputs = [x_vis, x_text, v_slab, t_slab]
    grid_spec = pltpu.PrefetchScalarGridSpec(
        num_scalar_prefetch=1,
        grid=(1,),
        in_specs=[pl.BlockSpec(x.shape, lambda i, eot: (0, 0)) for x in inputs],
        out_specs=pl.BlockSpec((B, B), lambda i, eot: (0, 0)),
        scratch_shapes=[pltpu.VMEM((B * CONTEXT_LEN, TEXT_WIDTH), jnp.float32)],
    )
    return pl.pallas_call(
        _clip_forward_kernel,
        out_shape=jax.ShapeDtypeStruct((B, B), jnp.float32),
        grid_spec=grid_spec,
        compiler_params=pltpu.CompilerParams(dimension_semantics=("arbitrary",)),
    )(eot_rows, *inputs)


if __name__ == "__main__":
    key = jax.random.PRNGKey(0)
    k_img, k_txt, k_par = jax.random.split(key, 3)
    image = jax.random.normal(k_img, (2, 3, IN_SIZE, IN_SIZE), jnp.float32)
    text = jax.random.randint(k_txt, (2, CONTEXT_LEN), 1, VOCAB_SIZE - 1, jnp.int32)
    text = text.at[:, -1].set(VOCAB_SIZE - 1)       # EOT = highest token id
    params = init_params(k_par)

    loss = jax.jit(clip_loss)(image, text, params)
    loss = jax.block_until_ready(loss)
    assert loss.shape == (2, 2)
    assert bool(jnp.all(jnp.isfinite(loss)))
    print("KERNEL_OK")
</pallas_src>

<mosaic_0001>
module attributes {stable_mosaic.version = 11 : i64} {
  func.func @_clip_forward_kernel(%arg0: i32, %arg1: memref<2xi32, #tpu.memory_space<smem>>, %arg2: memref<10x32xf32, #tpu.memory_space<vmem>>, %arg3: memref<16x32xf32, #tpu.memory_space<vmem>>, %arg4: memref<504x128xf32, #tpu.memory_space<vmem>>, %arg5: memref<504x128xf32, #tpu.memory_space<vmem>>, %arg6: memref<2x2xf32, #tpu.memory_space<vmem>>, %arg7: memref<16x32xf32, #tpu.memory_space<vmem>>) attributes {dimension_semantics = [#tpu.dimension_semantics<arbitrary>], iteration_bounds = array<i64: 1>, scalar_prefetch = 1 : i64, scratch_operands = 1 : i64, tpu.core_type = #tpu.core_type<tc>, window_params = [{pipeline_mode = #tpu.pipeline_mode<synchronous>, transform_indices = @transform_0, window_bounds = array<i64: 10, 32>}, {pipeline_mode = #tpu.pipeline_mode<synchronous>, transform_indices = @transform_1, window_bounds = array<i64: 16, 32>}, {pipeline_mode = #tpu.pipeline_mode<synchronous>, transform_indices = @transform_2, window_bounds = array<i64: 504, 128>}, {pipeline_mode = #tpu.pipeline_mode<synchronous>, transform_indices = @transform_3, window_bounds = array<i64: 504, 128>}, {pipeline_mode = #tpu.pipeline_mode<synchronous>, transform_indices = @transform_4, window_bounds = array<i64: 2, 2>}]} {
    %c0 = arith.constant 0 : index
    %c0_0 = arith.constant 0 : index
    %0 = vector.load %arg2[%c0, %c0_0] : memref<10x32xf32, #tpu.memory_space<vmem>>, vector<10x32xf32>
    %c464 = arith.constant 464 : index
    %c0_1 = arith.constant 0 : index
    %1 = vector.load %arg4[%c464, %c0_1] : memref<504x128xf32, #tpu.memory_space<vmem>>, vector<2x32xf32>
    %2 = vector.extract_strided_slice %1 {offsets = [0, 0], sizes = [1, 32], strides = [1, 1]} : vector<2x32xf32> to vector<1x32xf32>
    %3 = vector.extract_strided_slice %1 {offsets = [1, 0], sizes = [1, 32], strides = [1, 1]} : vector<2x32xf32> to vector<1x32xf32>
    %cst = arith.constant dense<0.000000e+00> : vector<10xf32>
    %4 = vector.multi_reduction <add>, %0, %cst [1] : vector<10x32xf32> to vector<10xf32>
    %5 = vector.shape_cast %4 : vector<10xf32> to vector<10x1xf32>
    %cst_2 = arith.constant 3.200000e+01 : f32
    %6 = vector.broadcast %cst_2 : f32 to vector<10x1xf32>
    %7 = arith.divf %5, %6 : vector<10x1xf32>
    %8 = vector.broadcast %7 : vector<10x1xf32> to vector<10x32xf32>
    %9 = arith.subf %0, %8 : vector<10x32xf32>
    %10 = arith.mulf %9, %9 : vector<10x32xf32>
    %cst_3 = arith.constant dense<0.000000e+00> : vector<10xf32>
    %11 = vector.multi_reduction <add>, %10, %cst_3 [1] : vector<10x32xf32> to vector<10xf32>
    %12 = vector.shape_cast %11 : vector<10xf32> to vector<10x1xf32>
    %cst_4 = arith.constant 3.200000e+01 : f32
    %13 = vector.broadcast %cst_4 : f32 to vector<10x1xf32>
    %14 = arith.divf %12, %13 : vector<10x1xf32>
    %cst_5 = arith.constant 9.99999974E-6 : f32
    %15 = vector.broadcast %cst_5 : f32 to vector<10x1xf32>
    %16 = arith.addf %14, %15 : vector<10x1xf32>
    %17 = math.rsqrt %16 : vector<10x1xf32>
    %18 = vector.broadcast %17 : vector<10x1xf32> to vector<10x32xf32>
    %19 = arith.mulf %9, %18 : vector<10x32xf32>
    %20 = vector.broadcast %2 : vector<1x32xf32> to vector<10x32xf32>
    %21 = arith.mulf %19, %20 : vector<10x32xf32>
    %22 = vector.broadcast %3 : vector<1x32xf32> to vector<10x32xf32>
    %23 = arith.addf %21, %22 : vector<10x32xf32>
    %24 = tpu.iota {dimensions = array<i32: 0>} : vector<20x20xi32>
    %25 = tpu.iota {dimensions = array<i32: 1>} : vector<20x20xi32>
    %c0_i32 = arith.constant 0 : i32
    %26 = vector.broadcast %c0_i32 : i32 to vector<20x20xi32>
    %c0_i32_6 = arith.constant 0 : i32
    %27 = vector.broadcast %c0_i32_6 : i32 to vector<20x20xi32>
    %c5_i32 = arith.constant 5 : i32
    %28 = vector.broadcast %c5_i32 : i32 to vector<20x20xi32>
    %29 = arith.cmpi sge, %24, %28 : vector<20x20xi32>
    %30 = arith.extui %29 : vector<20x20xi1> to vector<20x20xi32>
    %31 = arith.addi %26, %30 : vector<20x20xi32>
    %c5_i32_7 = arith.constant 5 : i32
    %32 = vector.broadcast %c5_i32_7 : i32 to vector<20x20xi32>
    %33 = arith.cmpi sge, %25, %32 : vector<20x20xi32>
    %34 = arith.extui %33 : vector<20x20xi1> to vector<20x20xi32>
    %35 = arith.addi %27, %34 : vector<20x20xi32>
    %c10_i32 = arith.constant 10 : i32
    %36 = vector.broadcast %c10_i32 : i32 to vector<20x20xi32>
    %37 = arith.cmpi sge, %24, %36 : vector<20x20xi32>
    %38 = arith.extui %37 : vector<20x20xi1> to vector<20x20xi32>
    %39 = arith.addi %31, %38 : vector<20x20xi32>
    %c10_i32_8 = arith.constant 10 : i32
    %40 = vector.broadcast %c10_i32_8 : i32 to vector<20x20xi32>
    %41 = arith.cmpi sge, %25, %40 : vector<20x20xi32>
    %42 = arith.extui %41 : vector<20x20xi1> to vector<20x20xi32>
    %43 = arith.addi %35, %42 : vector<20x20xi32>
    %c15_i32 = arith.constant 15 : i32
    %44 = vector.broadcast %c15_i32 : i32 to vector<20x20xi32>
    %45 = arith.cmpi sge, %24, %44 : vector<20x20xi32>
    %46 = arith.extui %45 : vector<20x20xi1> to vector<20x20xi32>
    %47 = arith.addi %39, %46 : vector<20x20xi32>
    %c15_i32_9 = arith.constant 15 : i32
    %48 = vector.broadcast %c15_i32_9 : i32 to vector<20x20xi32>
    %49 = arith.cmpi sge, %25, %48 : vector<20x20xi32>
    %50 = arith.extui %49 : vector<20x20xi1> to vector<20x20xi32>
    %51 = arith.addi %43, %50 : vector<20x20xi32>
    %52 = arith.cmpi eq, %47, %51 : vector<20x20xi32>
    %cst_10 = arith.constant 0.000000e+00 : f32
    %cst_11 = arith.constant -1.000000e+09 : f32
    %53 = vector.broadcast %cst_10 : f32 to vector<20x20xf32>
    %54 = vector.broadcast %cst_11 : f32 to vector<20x20xf32>
    %55 = arith.select %52, %53, %54 : vector<20x20xi1>, vector<20x20xf32>
    %c0_12 = arith.constant 0 : index
    %c0_13 = arith.constant 0 : index
    %56 = vector.load %arg4[%c0_12, %c0_13] : memref<504x128xf32, #tpu.memory_space<vmem>>, vector<2x32xf32>
    %c2 = arith.constant 2 : index
    %c0_14 = arith.constant 0 : index
    %57 = vector.load %arg4[%c2, %c0_14] : memref<504x128xf32, #tpu.memory_space<vmem>>, vector<1x96xf32>
    %c3 = arith.constant 3 : index
    %c0_15 = arith.constant 0 : index
    %58 = vector.load %arg4[%c3, %c0_15] : memref<504x128xf32, #tpu.memory_space<vmem>>, vector<1x32xf32>
    %c4 = arith.constant 4 : index
    %c0_16 = arith.constant 0 : index
    %59 = vector.load %arg4[%c4, %c0_16] : memref<504x128xf32, #tpu.memory_space<vmem>>, vector<2x32xf32>
    %c6 = arith.constant 6 : index
    %c0_17 = arith.constant 0 : index
    %60 = vector.load %arg4[%c6, %c0_17] : memref<504x128xf32, #tpu.memory_space<vmem>>, vector<1x128xf32>
    %c7 = arith.constant 7 : index
    %c0_18 = arith.constant 0 : index
    %61 = vector.load %arg4[%c7, %c0_18] : memref<504x128xf32, #tpu.memory_space<vmem>>, vector<1x32xf32>
    %c8 = arith.constant 8 : index
    %c0_19 = arith.constant 0 : index
    %62 = vector.load %arg4[%c8, %c0_19] : memref<504x128xf32, #tpu.memory_space<vmem>>, vector<32x96xf32>
    %c40 = arith.constant 40 : index
    %c0_20 = arith.constant 0 : index
    %63 = vector.load %arg4[%c40, %c0_20] : memref<504x128xf32, #tpu.memory_space<vmem>>, vector<32x32xf32>
    %c72 = arith.constant 72 : index
    %c0_21 = arith.constant 0 : index
    %64 = vector.load %arg4[%c72, %c0_21] : memref<504x128xf32, #tpu.memory_space<vmem>>, vector<32x128xf32>
    %c104 = arith.constant 104 : index
    %c0_22 = arith.constant 0 : index
    %65 = vector.load %arg4[%c104, %c0_22] : memref<504x128xf32, #tpu.memory_space<vmem>>, vector<128x32xf32>
    %66 = vector.extract_strided_slice %56 {offsets = [0, 0], sizes = [1, 32], strides = [1, 1]} : vector<2x32xf32> to vector<1x32xf32>
    %67 = vector.extract_strided_slice %56 {offsets = [1, 0], sizes = [1, 32], strides = [1, 1]} : vector<2x32xf32> to vector<1x32xf32>
    %cst_23 = arith.constant dense<0.000000e+00> : vector<10xf32>
    %68 = vector.multi_reduction <add>, %23, %cst_23 [1] : vector<10x32xf32> to vector<10xf32>
    %69 = vector.shape_cast %68 : vector<10xf32> to vector<10x1xf32>
    %cst_24 = arith.constant 3.200000e+01 : f32
    %70 = vector.broadcast %cst_24 : f32 to vector<10x1xf32>
    %71 = arith.divf %69, %70 : vector<10x1xf32>
    %72 = vector.broadcast %71 : vector<10x1xf32> to vector<10x32xf32>
    %73 = arith.subf %23, %72 : vector<10x32xf32>
    %74 = arith.mulf %73, %73 : vector<10x32xf32>
    %cst_25 = arith.constant dense<0.000000e+00> : vector<10xf32>
    %75 = vector.multi_reduction <add>, %74, %cst_25 [1] : vector<10x32xf32> to vector<10xf32>
    %76 = vector.shape_cast %75 : vector<10xf32> to vector<10x1xf32>
    %cst_26 = arith.constant 3.200000e+01 : f32
    %77 = vector.broadcast %cst_26 : f32 to vector<10x1xf32>
    %78 = arith.divf %76, %77 : vector<10x1xf32>
    %cst_27 = arith.constant 9.99999974E-6 : f32
    %79 = vector.broadcast %cst_27 : f32 to vector<10x1xf32>
    %80 = arith.addf %78, %79 : vector<10x1xf32>
    %81 = math.rsqrt %80 : vector<10x1xf32>
    %82 = vector.broadcast %81 : vector<10x1xf32> to vector<10x32xf32>
    %83 = arith.mulf %73, %82 : vector<10x32xf32>
    %84 = vector.broadcast %66 : vector<1x32xf32> to vector<10x32xf32>
    %85 = arith.mulf %83, %84 : vector<10x32xf32>
    %86 = vector.broadcast %67 : vector<1x32xf32> to vector<10x32xf32>
    %87 = arith.addf %85, %86 : vector<10x32xf32>
    %cst_28 = arith.constant dense<0.000000e+00> : vector<10x96xf32>
    %88 = tpu.matmul %87, %62, %cst_28 {dimension_numbers = #tpu.dot_dimension_numbers<[1], [0], [0], [1], [0, 0, 1, 1], [], []>} : vector<10x32xf32>, vector<32x96xf32>, vector<10x96xf32> -> vector<10x96xf32>
    %89 = vector.broadcast %57 : vector<1x96xf32> to vector<10x96xf32>
    %90 = arith.addf %88, %89 : vector<10x96xf32>
    %91 = vector.extract_strided_slice %90 {offsets = [0, 0], sizes = [10, 16], strides = [1, 1]} : vector<10x96xf32> to vector<10x16xf32>
    %92 = vector.extract_strided_slice %90 {offsets = [0, 16], sizes = [10, 16], strides = [1, 1]} : vector<10x96xf32> to vector<10x16xf32>
    %93 = tpu.concatenate %91, %92 in 0 : vector<10x16xf32>, vector<10x16xf32> -> vector<20x16xf32>
    %94 = vector.extract_strided_slice %90 {offsets = [0, 32], sizes = [10, 16], strides = [1, 1]} : vector<10x96xf32> to vector<10x16xf32>
    %95 = vector.extract_strided_slice %90 {offsets = [0, 48], sizes = [10, 16], strides = [1, 1]} : vector<10x96xf32> to vector<10x16xf32>
    %96 = tpu.concatenate %94, %95 in 0 : vector<10x16xf32>, vector<10x16xf32> -> vector<20x16xf32>
    %97 = vector.extract_strided_slice %90 {offsets = [0, 64], sizes = [10, 16], strides = [1, 1]} : vector<10x96xf32> to vector<10x16xf32>
    %98 = vector.extract_strided_slice %90 {offsets = [0, 80], sizes = [10, 16], strides = [1, 1]} : vector<10x96xf32> to vector<10x16xf32>
    %99 = tpu.concatenate %97, %98 in 0 : vector<10x16xf32>, vector<10x16xf32> -> vector<20x16xf32>
    %cst_29 = arith.constant dense<0.000000e+00> : vector<20x20xf32>
    %100 = tpu.matmul %93, %96, %cst_29 {dimension_numbers = #tpu.dot_dimension_numbers<[1], [1], [0], [0], [0, 0, 1, 0], [], []>} : vector<20x16xf32>, vector<20x16xf32>, vector<20x20xf32> -> vector<20x20xf32>
    %cst_30 = arith.constant 2.500000e-01 : f32
    %101 = vector.broadcast %cst_30 : f32 to vector<20x20xf32>
    %102 = arith.mulf %100, %101 : vector<20x20xf32>
    %103 = arith.addf %102, %55 : vector<20x20xf32>
    %cst_31 = arith.constant dense<0xFF800000> : vector<20xf32>
    %104 = vector.multi_reduction <maximumf>, %103, %cst_31 [1] : vector<20x20xf32> to vector<20xf32>
    %105 = vector.shape_cast %104 : vector<20xf32> to vector<20x1xf32>
    %106 = vector.broadcast %105 : vector<20x1xf32> to vector<20x20xf32>
    %107 = arith.subf %103, %106 : vector<20x20xf32>
    %108 = math.exp %107 : vector<20x20xf32>
    %cst_32 = arith.constant dense<0.000000e+00> : vector<20xf32>
    %109 = vector.multi_reduction <add>, %108, %cst_32 [1] : vector<20x20xf32> to vector<20xf32>
    %110 = vector.shape_cast %109 : vector<20xf32> to vector<20x1xf32>
    %111 = tpu.reciprocal %110 {approx = true} : vector<20x1xf32> -> vector<20x1xf32>
    %112 = vector.broadcast %111 : vector<20x1xf32> to vector<20x20xf32>
    %113 = arith.mulf %108, %112 : vector<20x20xf32>
    %cst_33 = arith.constant dense<0.000000e+00> : vector<20x16xf32>
    %114 = tpu.matmul %113, %99, %cst_33 {dimension_numbers = #tpu.dot_dimension_numbers<[1], [0], [0], [1], [0, 0, 1, 1], [], []>} : vector<20x20xf32>, vector<20x16xf32>, vector<20x16xf32> -> vector<20x16xf32>
    %115 = vector.extract_strided_slice %114 {offsets = [0, 0], sizes = [10, 16], strides = [1, 1]} : vector<20x16xf32> to vector<10x16xf32>
    %116 = vector.extract_strided_slice %114 {offsets = [10, 0], sizes = [10, 16], strides = [1, 1]} : vector<20x16xf32> to vector<10x16xf32>
    %117 = tpu.concatenate %115, %116 in 1 : vector<10x16xf32>, vector<10x16xf32> -> vector<10x32xf32>
    %cst_34 = arith.constant dense<0.000000e+00> : vector<10x32xf32>
    %118 = tpu.matmul %117, %63, %cst_34 {dimension_numbers = #tpu.dot_dimension_numbers<[1], [0], [0], [1], [0, 0, 1, 1], [], []>} : vector<10x32xf32>, vector<32x32xf32>, vector<10x32xf32> -> vector<10x32xf32>
    %119 = arith.addf %23, %118 : vector<10x32xf32>
    %120 = vector.broadcast %58 : vector<1x32xf32> to vector<10x32xf32>
    %121 = arith.addf %119, %120 : vector<10x32xf32>
    %122 = vector.extract_strided_slice %59 {offsets = [0, 0], sizes = [1, 32], strides = [1, 1]} : vector<2x32xf32> to vector<1x32xf32>
    %123 = vector.extract_strided_slice %59 {offsets = [1, 0], sizes = [1, 32], strides = [1, 1]} : vector<2x32xf32> to vector<1x32xf32>
    %cst_35 = arith.constant dense<0.000000e+00> : vector<10xf32>
    %124 = vector.multi_reduction <add>, %121, %cst_35 [1] : vector<10x32xf32> to vector<10xf32>
    %125 = vector.shape_cast %124 : vector<10xf32> to vector<10x1xf32>
    %cst_36 = arith.constant 3.200000e+01 : f32
    %126 = vector.broadcast %cst_36 : f32 to vector<10x1xf32>
    %127 = arith.divf %125, %126 : vector<10x1xf32>
    %128 = vector.broadcast %127 : vector<10x1xf32> to vector<10x32xf32>
    %129 = arith.subf %121, %128 : vector<10x32xf32>
    %130 = arith.mulf %129, %129 : vector<10x32xf32>
    %cst_37 = arith.constant dense<0.000000e+00> : vector<10xf32>
    %131 = vector.multi_reduction <add>, %130, %cst_37 [1] : vector<10x32xf32> to vector<10xf32>
    %132 = vector.shape_cast %131 : vector<10xf32> to vector<10x1xf32>
    %cst_38 = arith.constant 3.200000e+01 : f32
    %133 = vector.broadcast %cst_38 : f32 to vector<10x1xf32>
    %134 = arith.divf %132, %133 : vector<10x1xf32>
    %cst_39 = arith.constant 9.99999974E-6 : f32
    %135 = vector.broadcast %cst_39 : f32 to vector<10x1xf32>
    %136 = arith.addf %134, %135 : vector<10x1xf32>
    %137 = math.rsqrt %136 : vector<10x1xf32>
    %138 = vector.broadcast %137 : vector<10x1xf32> to vector<10x32xf32>
    %139 = arith.mulf %129, %138 : vector<10x32xf32>
    %140 = vector.broadcast %122 : vector<1x32xf32> to vector<10x32xf32>
    %141 = arith.mulf %139, %140 : vector<10x32xf32>
    %142 = vector.broadcast %123 : vector<1x32xf32> to vector<10x32xf32>
    %143 = arith.addf %141, %142 : vector<10x32xf32>
    %cst_40 = arith.constant dense<0.000000e+00> : vector<10x128xf32>
    %144 = tpu.matmul %143, %64, %cst_40 {dimension_numbers = #tpu.dot_dimension_numbers<[1], [0], [0], [1], [0, 0, 1, 1], [], []>} : vector<10x32xf32>, vector<32x128xf32>, vector<10x128xf32> -> vector<10x128xf32>
    %145 = vector.broadcast %60 : vector<1x128xf32> to vector<10x128xf32>
    %146 = arith.addf %144, %145 : vector<10x128xf32>
    %cst_41 = arith.constant -1.702000e+00 : f32
    %147 = vector.broadcast %cst_41 : f32 to vector<10x128xf32>
    %148 = arith.mulf %147, %146 : vector<10x128xf32>
    %149 = math.exp %148 : vector<10x128xf32>
    %cst_42 = arith.constant 1.000000e+00 : f32
    %150 = vector.broadcast %cst_42 : f32 to vector<10x128xf32>
    %151 = arith.addf %150, %149 : vector<10x128xf32>
    %cst_43 = arith.constant 1.000000e+00 : f32
    %152 = vector.broadcast %cst_43 : f32 to vector<10x128xf32>
    %153 = arith.divf %152, %151 : vector<10x128xf32>
    %154 = arith.mulf %146, %153 : vector<10x128xf32>
    %cst_44 = arith.constant dense<0.000000e+00> : vector<10x32xf32>
    %155 = tpu.matmul %154, %65, %cst_44 {dimension_numbers = #tpu.dot_dimension_numbers<[1], [0], [0], [1], [0, 0, 1, 1], [], []>} : vector<10x128xf32>, vector<128x32xf32>, vector<10x32xf32> -> vector<10x32xf32>
    %156 = arith.addf %121, %155 : vector<10x32xf32>
    %157 = vector.broadcast %61 : vector<1x32xf32> to vector<10x32xf32>
    %158 = arith.addf %156, %157 : vector<10x32xf32>
    %c232 = arith.constant 232 : index
    %c0_45 = arith.constant 0 : index
    %159 = vector.load %arg4[%c232, %c0_45] : memref<504x128xf32, #tpu.memory_space<vmem>>, vector<2x32xf32>
    %c234 = arith.constant 234 : index
    %c0_46 = arith.constant 0 : index
    %160 = vector.load %arg4[%c234, %c0_46] : memref<504x128xf32, #tpu.memory_space<vmem>>, vector<1x96xf32>
    %c235 = arith.constant 235 : index
    %c0_47 = arith.constant 0 : index
    %161 = vector.load %arg4[%c235, %c0_47] : memref<504x128xf32, #tpu.memory_space<vmem>>, vector<1x32xf32>
    %c236 = arith.constant 236 : index
    %c0_48 = arith.constant 0 : index
    %162 = vector.load %arg4[%c236, %c0_48] : memref<504x128xf32, #tpu.memory_space<vmem>>, vector<2x32xf32>
    %c238 = arith.constant 238 : index
    %c0_49 = arith.constant 0 : index
    %163 = vector.load %arg4[%c238, %c0_49] : memref<504x128xf32, #tpu.memory_space<vmem>>, vector<1x128xf32>
    %c239 = arith.constant 239 : index
    %c0_50 = arith.constant 0 : index
    %164 = vector.load %arg4[%c239, %c0_50] : memref<504x128xf32, #tpu.memory_space<vmem>>, vector<1x32xf32>
    %c240 = arith.constant 240 : index
    %c0_51 = arith.constant 0 : index
    %165 = vector.load %arg4[%c240, %c0_51] : memref<504x128xf32, #tpu.memory_space<vmem>>, vector<32x96xf32>
    %c272 = arith.constant 272 : index
    %c0_52 = arith.constant 0 : index
    %166 = vector.load %arg4[%c272, %c0_52] : memref<504x128xf32, #tpu.memory_space<vmem>>, vector<32x32xf32>
    %c304 = arith.constant 304 : index
    %c0_53 = arith.constant 0 : index
    %167 = vector.load %arg4[%c304, %c0_53] : memref<504x128xf32, #tpu.memory_space<vmem>>, vector<32x128xf32>
    %c336 = arith.constant 336 : index
    %c0_54 = arith.constant 0 : index
    %168 = vector.load %arg4[%c336, %c0_54] : memref<504x128xf32, #tpu.memory_space<vmem>>, vector<128x32xf32>
    %169 = vector.extract_strided_slice %159 {offsets = [0, 0], sizes = [1, 32], strides = [1, 1]} : vector<2x32xf32> to vector<1x32xf32>
    %170 = vector.extract_strided_slice %159 {offsets = [1, 0], sizes = [1, 32], strides = [1, 1]} : vector<2x32xf32> to vector<1x32xf32>
    %cst_55 = arith.constant dense<0.000000e+00> : vector<10xf32>
    %171 = vector.multi_reduction <add>, %158, %cst_55 [1] : vector<10x32xf32> to vector<10xf32>
    %172 = vector.shape_cast %171 : vector<10xf32> to vector<10x1xf32>
    %cst_56 = arith.constant 3.200000e+01 : f32
    %173 = vector.broadcast %cst_56 : f32 to vector<10x1xf32>
    %174 = arith.divf %172, %173 : vector<10x1xf32>
    %175 = vector.broadcast %174 : vector<10x1xf32> to vector<10x32xf32>
    %176 = arith.subf %158, %175 : vector<10x32xf32>
    %177 = arith.mulf %176, %176 : vector<10x32xf32>
    %cst_57 = arith.constant dense<0.000000e+00> : vector<10xf32>
    %178 = vector.multi_reduction <add>, %177, %cst_57 [1] : vector<10x32xf32> to vector<10xf32>
    %179 = vector.shape_cast %178 : vector<10xf32> to vector<10x1xf32>
    %cst_58 = arith.constant 3.200000e+01 : f32
    %180 = vector.broadcast %cst_58 : f32 to vector<10x1xf32>
    %181 = arith.divf %179, %180 : vector<10x1xf32>
    %cst_59 = arith.constant 9.99999974E-6 : f32
    %182 = vector.broadcast %cst_59 : f32 to vector<10x1xf32>
    %183 = arith.addf %181, %182 : vector<10x1xf32>
    %184 = math.rsqrt %183 : vector<10x1xf32>
    %185 = vector.broadcast %184 : vector<10x1xf32> to vector<10x32xf32>
    %186 = arith.mulf %176, %185 : vector<10x32xf32>
    %187 = vector.broadcast %169 : vector<1x32xf32> to vector<10x32xf32>
    %188 = arith.mulf %186, %187 : vector<10x32xf32>
    %189 = vector.broadcast %170 : vector<1x32xf32> to vector<10x32xf32>
    %190 = arith.addf %188, %189 : vector<10x32xf32>
    %cst_60 = arith.constant dense<0.000000e+00> : vector<10x96xf32>
    %191 = tpu.matmul %190, %165, %cst_60 {dimension_numbers = #tpu.dot_dimension_numbers<[1], [0], [0], [1], [0, 0, 1, 1], [], []>} : vector<10x32xf32>, vector<32x96xf32>, vector<10x96xf32> -> vector<10x96xf32>
    %192 = vector.broadcast %160 : vector<1x96xf32> to vector<10x96xf32>
    %193 = arith.addf %191, %192 : vector<10x96xf32>
    %194 = vector.extract_strided_slice %193 {offsets = [0, 0], sizes = [10, 16], strides = [1, 1]} : vector<10x96xf32> to vector<10x16xf32>
    %195 = vector.extract_strided_slice %193 {offsets = [0, 16], sizes = [10, 16], strides = [1, 1]} : vector<10x96xf32> to vector<10x16xf32>
    %196 = tpu.concatenate %194, %195 in 0 : vector<10x16xf32>, vector<10x16xf32> -> vector<20x16xf32>
    %197 = vector.extract_strided_slice %193 {offsets = [0, 32], sizes = [10, 16], strides = [1, 1]} : vector<10x96xf32> to vector<10x16xf32>
    %198 = vector.extract_strided_slice %193 {offsets = [0, 48], sizes = [10, 16], strides = [1, 1]} : vector<10x96xf32> to vector<10x16xf32>
    %199 = tpu.concatenate %197, %198 in 0 : vector<10x16xf32>, vector<10x16xf32> -> vector<20x16xf32>
    %200 = vector.extract_strided_slice %193 {offsets = [0, 64], sizes = [10, 16], strides = [1, 1]} : vector<10x96xf32> to vector<10x16xf32>
    %201 = vector.extract_strided_slice %193 {offsets = [0, 80], sizes = [10, 16], strides = [1, 1]} : vector<10x96xf32> to vector<10x16xf32>
    %202 = tpu.concatenate %200, %201 in 0 : vector<10x16xf32>, vector<10x16xf32> -> vector<20x16xf32>
    %cst_61 = arith.constant dense<0.000000e+00> : vector<20x20xf32>
    %203 = tpu.matmul %196, %199, %cst_61 {dimension_numbers = #tpu.dot_dimension_numbers<[1], [1], [0], [0], [0, 0, 1, 0], [], []>} : vector<20x16xf32>, vector<20x16xf32>, vector<20x20xf32> -> vector<20x20xf32>
    %cst_62 = arith.constant 2.500000e-01 : f32
    %204 = vector.broadcast %cst_62 : f32 to vector<20x20xf32>
    %205 = arith.mulf %203, %204 : vector<20x20xf32>
    %206 = arith.addf %205, %55 : vector<20x20xf32>
    %cst_63 = arith.constant dense<0xFF800000> : vector<20xf32>
    %207 = vector.multi_reduction <maximumf>, %206, %cst_63 [1] : vector<20x20xf32> to vector<20xf32>
    %208 = vector.shape_cast %207 : vector<20xf32> to vector<20x1xf32>
    %209 = vector.broadcast %208 : vector<20x1xf32> to vector<20x20xf32>
    %210 = arith.subf %206, %209 : vector<20x20xf32>
    %211 = math.exp %210 : vector<20x20xf32>
    %cst_64 = arith.constant dense<0.000000e+00> : vector<20xf32>
    %212 = vector.multi_reduction <add>, %211, %cst_64 [1] : vector<20x20xf32> to vector<20xf32>
    %213 = vector.shape_cast %212 : vector<20xf32> to vector<20x1xf32>
    %214 = tpu.reciprocal %213 {approx = true} : vector<20x1xf32> -> vector<20x1xf32>
    %215 = vector.broadcast %214 : vector<20x1xf32> to vector<20x20xf32>
    %216 = arith.mulf %211, %215 : vector<20x20xf32>
    %cst_65 = arith.constant dense<0.000000e+00> : vector<20x16xf32>
    %217 = tpu.matmul %216, %202, %cst_65 {dimension_numbers = #tpu.dot_dimension_numbers<[1], [0], [0], [1], [0, 0, 1, 1], [], []>} : vector<20x20xf32>, vector<20x16xf32>, vector<20x16xf32> -> vector<20x16xf32>
    %218 = vector.extract_strided_slice %217 {offsets = [0, 0], sizes = [10, 16], strides = [1, 1]} : vector<20x16xf32> to vector<10x16xf32>
    %219 = vector.extract_strided_slice %217 {offsets = [10, 0], sizes = [10, 16], strides = [1, 1]} : vector<20x16xf32> to vector<10x16xf32>
    %220 = tpu.concatenate %218, %219 in 1 : vector<10x16xf32>, vector<10x16xf32> -> vector<10x32xf32>
    %cst_66 = arith.constant dense<0.000000e+00> : vector<10x32xf32>
    %221 = tpu.matmul %220, %166, %cst_66 {dimension_numbers = #tpu.dot_dimension_numbers<[1], [0], [0], [1], [0, 0, 1, 1], [], []>} : vector<10x32xf32>, vector<32x32xf32>, vector<10x32xf32> -> vector<10x32xf32>
    %222 = arith.addf %158, %221 : vector<10x32xf32>
    %223 = vector.broadcast %161 : vector<1x32xf32> to vector<10x32xf32>
    %224 = arith.addf %222, %223 : vector<10x32xf32>
    %225 = vector.extract_strided_slice %162 {offsets = [0, 0], sizes = [1, 32], strides = [1, 1]} : vector<2x32xf32> to vector<1x32xf32>
    %226 = vector.extract_strided_slice %162 {offsets = [1, 0], sizes = [1, 32], strides = [1, 1]} : vector<2x32xf32> to vector<1x32xf32>
    %cst_67 = arith.constant dense<0.000000e+00> : vector<10xf32>
    %227 = vector.multi_reduction <add>, %224, %cst_67 [1] : vector<10x32xf32> to vector<10xf32>
    %228 = vector.shape_cast %227 : vector<10xf32> to vector<10x1xf32>
    %cst_68 = arith.constant 3.200000e+01 : f32
    %229 = vector.broadcast %cst_68 : f32 to vector<10x1xf32>
    %230 = arith.divf %228, %229 : vector<10x1xf32>
    %231 = vector.broadcast %230 : vector<10x1xf32> to vector<10x32xf32>
    %232 = arith.subf %224, %231 : vector<10x32xf32>
    %233 = arith.mulf %232, %232 : vector<10x32xf32>
    %cst_69 = arith.constant dense<0.000000e+00> : vector<10xf32>
    %234 = vector.multi_reduction <add>, %233, %cst_69 [1] : vector<10x32xf32> to vector<10xf32>
    %235 = vector.shape_cast %234 : vector<10xf32> to vector<10x1xf32>
    %cst_70 = arith.constant 3.200000e+01 : f32
    %236 = vector.broadcast %cst_70 : f32 to vector<10x1xf32>
    %237 = arith.divf %235, %236 : vector<10x1xf32>
    %cst_71 = arith.constant 9.99999974E-6 : f32
    %238 = vector.broadcast %cst_71 : f32 to vector<10x1xf32>
    %239 = arith.addf %237, %238 : vector<10x1xf32>
    %240 = math.rsqrt %239 : vector<10x1xf32>
    %241 = vector.broadcast %240 : vector<10x1xf32> to vector<10x32xf32>
    %242 = arith.mulf %232, %241 : vector<10x32xf32>
    %243 = vector.broadcast %225 : vector<1x32xf32> to vector<10x32xf32>
    %244 = arith.mulf %242, %243 : vector<10x32xf32>
    %245 = vector.broadcast %226 : vector<1x32xf32> to vector<10x32xf32>
    %246 = arith.addf %244, %245 : vector<10x32xf32>
    %cst_72 = arith.constant dense<0.000000e+00> : vector<10x128xf32>
    %247 = tpu.matmul %246, %167, %cst_72 {dimension_numbers = #tpu.dot_dimension_numbers<[1], [0], [0], [1], [0, 0, 1, 1], [], []>} : vector<10x32xf32>, vector<32x128xf32>, vector<10x128xf32> -> vector<10x128xf32>
    %248 = vector.broadcast %163 : vector<1x128xf32> to vector<10x128xf32>
    %249 = arith.addf %247, %248 : vector<10x128xf32>
    %cst_73 = arith.constant -1.702000e+00 : f32
    %250 = vector.broadcast %cst_73 : f32 to vector<10x128xf32>
    %251 = arith.mulf %250, %249 : vector<10x128xf32>
    %252 = math.exp %251 : vector<10x128xf32>
    %cst_74 = arith.constant 1.000000e+00 : f32
    %253 = vector.broadcast %cst_74 : f32 to vector<10x128xf32>
    %254 = arith.addf %253, %252 : vector<10x128xf32>
    %cst_75 = arith.constant 1.000000e+00 : f32
    %255 = vector.broadcast %cst_75 : f32 to vector<10x128xf32>
    %256 = arith.divf %255, %254 : vector<10x128xf32>
    %257 = arith.mulf %249, %256 : vector<10x128xf32>
    %cst_76 = arith.constant dense<0.000000e+00> : vector<10x32xf32>
    %258 = tpu.matmul %257, %168, %cst_76 {dimension_numbers = #tpu.dot_dimension_numbers<[1], [0], [0], [1], [0, 0, 1, 1], [], []>} : vector<10x128xf32>, vector<128x32xf32>, vector<10x32xf32> -> vector<10x32xf32>
    %259 = arith.addf %224, %258 : vector<10x32xf32>
    %260 = vector.broadcast %164 : vector<1x32xf32> to vector<10x32xf32>
    %261 = arith.addf %259, %260 : vector<10x32xf32>
    %262 = vector.extract_strided_slice %261 {offsets = [0, 0], sizes = [1, 32], strides = [1, 1]} : vector<10x32xf32> to vector<1x32xf32>
    %263 = vector.extract_strided_slice %261 {offsets = [5, 0], sizes = [1, 32], strides = [1, 1]} : vector<10x32xf32> to vector<1x32xf32>
    %264 = tpu.concatenate %262, %263 in 0 : vector<1x32xf32>, vector<1x32xf32> -> vector<2x32xf32>
    %c466 = arith.constant 466 : index
    %c0_77 = arith.constant 0 : index
    %265 = vector.load %arg4[%c466, %c0_77] : memref<504x128xf32, #tpu.memory_space<vmem>>, vector<2x32xf32>
    %266 = vector.extract_strided_slice %265 {offsets = [0, 0], sizes = [1, 32], strides = [1, 1]} : vector<2x32xf32> to vector<1x32xf32>
    %267 = vector.extract_strided_slice %265 {offsets = [1, 0], sizes = [1, 32], strides = [1, 1]} : vector<2x32xf32> to vector<1x32xf32>
    %cst_78 = arith.constant dense<0.000000e+00> : vector<2xf32>
    %268 = vector.multi_reduction <add>, %264, %cst_78 [1] : vector<2x32xf32> to vector<2xf32>
    %269 = vector.shape_cast %268 : vector<2xf32> to vector<2x1xf32>
    %cst_79 = arith.constant 3.200000e+01 : f32
    %270 = vector.broadcast %cst_79 : f32 to vector<2x1xf32>
    %271 = arith.divf %269, %270 : vector<2x1xf32>
    %272 = vector.broadcast %271 : vector<2x1xf32> to vector<2x32xf32>
    %273 = arith.subf %264, %272 : vector<2x32xf32>
    %274 = arith.mulf %273, %273 : vector<2x32xf32>
    %cst_80 = arith.constant dense<0.000000e+00> : vector<2xf32>
    %275 = vector.multi_reduction <add>, %274, %cst_80 [1] : vector<2x32xf32> to vector<2xf32>
    %276 = vector.shape_cast %275 : vector<2xf32> to vector<2x1xf32>
    %cst_81 = arith.constant 3.200000e+01 : f32
    %277 = vector.broadcast %cst_81 : f32 to vector<2x1xf32>
    %278 = arith.divf %276, %277 : vector<2x1xf32>
    %cst_82 = arith.constant 9.99999974E-6 : f32
    %279 = vector.broadcast %cst_82 : f32 to vector<2x1xf32>
    %280 = arith.addf %278, %279 : vector<2x1xf32>
    %281 = math.rsqrt %280 : vector<2x1xf32>
    %282 = vector.broadcast %281 : vector<2x1xf32> to vector<2x32xf32>
    %283 = arith.mulf %273, %282 : vector<2x32xf32>
    %284 = vector.broadcast %266 : vector<1x32xf32> to vector<2x32xf32>
    %285 = arith.mulf %283, %284 : vector<2x32xf32>
    %286 = vector.broadcast %267 : vector<1x32xf32> to vector<2x32xf32>
    %287 = arith.addf %285, %286 : vector<2x32xf32>
    %c472 = arith.constant 472 : index
    %c0_83 = arith.constant 0 : index
    %288 = vector.load %arg4[%c472, %c0_83] : memref<504x128xf32, #tpu.memory_space<vmem>>, vector<32x16xf32>
    %cst_84 = arith.constant dense<0.000000e+00> : vector<2x16xf32>
    %289 = tpu.matmul %287, %288, %cst_84 {dimension_numbers = #tpu.dot_dimension_numbers<[1], [0], [0], [1], [0, 0, 1, 1], [], []>} : vector<2x32xf32>, vector<32x16xf32>, vector<2x16xf32> -> vector<2x16xf32>
    %c0_85 = arith.constant 0 : index
    %c0_86 = arith.constant 0 : index
    %290 = vector.load %arg3[%c0_85, %c0_86] : memref<16x32xf32, #tpu.memory_space<vmem>>, vector<16x32xf32>
    %291 = tpu.iota {dimensions = array<i32: 0>} : vector<32x32xi32>
    %292 = tpu.iota {dimensions = array<i32: 1>} : vector<32x32xi32>
    %c0_i32_87 = arith.constant 0 : i32
    %293 = vector.broadcast %c0_i32_87 : i32 to vector<32x32xi32>
    %c0_i32_88 = arith.constant 0 : i32
    %294 = vector.broadcast %c0_i32_88 : i32 to vector<32x32xi32>
    %c8_i32 = arith.constant 8 : i32
    %295 = vector.broadcast %c8_i32 : i32 to vector<32x32xi32>
    %296 = arith.cmpi sge, %291, %295 : vector<32x32xi32>
    %297 = arith.extui %296 : vector<32x32xi1> to vector<32x32xi32>
    %298 = arith.addi %293, %297 : vector<32x32xi32>
    %c8_i32_89 = arith.constant 8 : i32
    %299 = vector.broadcast %c8_i32_89 : i32 to vector<32x32xi32>
    %300 = arith.cmpi sge, %292, %299 : vector<32x32xi32>
    %301 = arith.extui %300 : vector<32x32xi1> to vector<32x32xi32>
    %302 = arith.addi %294, %301 : vector<32x32xi32>
    %c16_i32 = arith.constant 16 : i32
    %303 = vector.broadcast %c16_i32 : i32 to vector<32x32xi32>
    %304 = arith.cmpi sge, %291, %303 : vector<32x32xi32>
    %305 = arith.extui %304 : vector<32x32xi1> to vector<32x32xi32>
    %306 = arith.addi %298, %305 : vector<32x32xi32>
    %c16_i32_90 = arith.constant 16 : i32
    %307 = vector.broadcast %c16_i32_90 : i32 to vector<32x32xi32>
    %308 = arith.cmpi sge, %292, %307 : vector<32x32xi32>
    %309 = arith.extui %308 : vector<32x32xi1> to vector<32x32xi32>
    %310 = arith.addi %302, %309 : vector<32x32xi32>
    %c24_i32 = arith.constant 24 : i32
    %311 = vector.broadcast %c24_i32 : i32 to vector<32x32xi32>
    %312 = arith.cmpi sge, %291, %311 : vector<32x32xi32>
    %313 = arith.extui %312 : vector<32x32xi1> to vector<32x32xi32>
    %314 = arith.addi %306, %313 : vector<32x32xi32>
    %c24_i32_91 = arith.constant 24 : i32
    %315 = vector.broadcast %c24_i32_91 : i32 to vector<32x32xi32>
    %316 = arith.cmpi sge, %292, %315 : vector<32x32xi32>
    %317 = arith.extui %316 : vector<32x32xi1> to vector<32x32xi32>
    %318 = arith.addi %310, %317 : vector<32x32xi32>
    %319 = arith.cmpi eq, %314, %318 : vector<32x32xi32>
    %c8_i32_92 = arith.constant 8 : i32
    %320 = vector.broadcast %c8_i32_92 : i32 to vector<32x32xi32>
    %321 = arith.muli %314, %320 : vector<32x32xi32>
    %322 = arith.subi %291, %321 : vector<32x32xi32>
    %c8_i32_93 = arith.constant 8 : i32
    %323 = vector.broadcast %c8_i32_93 : i32 to vector<32x32xi32>
    %324 = arith.muli %318, %323 : vector<32x32xi32>
    %325 = arith.subi %292, %324 : vector<32x32xi32>
    %326 = arith.cmpi sge, %322, %325 : vector<32x32xi32>
    %327 = arith.andi %319, %326 : vector<32x32xi1>
    %cst_94 = arith.constant 0.000000e+00 : f32
    %cst_95 = arith.constant -1.000000e+09 : f32
    %328 = vector.broadcast %cst_94 : f32 to vector<32x32xf32>
    %329 = vector.broadcast %cst_95 : f32 to vector<32x32xf32>
    %330 = arith.select %327, %328, %329 : vector<32x32xi1>, vector<32x32xf32>
    %c0_96 = arith.constant 0 : index
    %c0_97 = arith.constant 0 : index
    %331 = vector.load %arg5[%c0_96, %c0_97] : memref<504x128xf32, #tpu.memory_space<vmem>>, vector<2x32xf32>
    %c2_98 = arith.constant 2 : index
    %c0_99 = arith.constant 0 : index
    %332 = vector.load %arg5[%c2_98, %c0_99] : memref<504x128xf32, #tpu.memory_space<vmem>>, vector<1x96xf32>
    %c3_100 = arith.constant 3 : index
    %c0_101 = arith.constant 0 : index
    %333 = vector.load %arg5[%c3_100, %c0_101] : memref<504x128xf32, #tpu.memory_space<vmem>>, vector<1x32xf32>
    %c4_102 = arith.constant 4 : index
    %c0_103 = arith.constant 0 : index
    %334 = vector.load %arg5[%c4_102, %c0_103] : memref<504x128xf32, #tpu.memory_space<vmem>>, vector<2x32xf32>
    %c6_104 = arith.constant 6 : index
    %c0_105 = arith.constant 0 : index
    %335 = vector.load %arg5[%c6_104, %c0_105] : memref<504x128xf32, #tpu.memory_space<vmem>>, vector<1x128xf32>
    %c7_106 = arith.constant 7 : index
    %c0_107 = arith.constant 0 : index
    %336 = vector.load %arg5[%c7_106, %c0_107] : memref<504x128xf32, #tpu.memory_space<vmem>>, vector<1x32xf32>
    %c8_108 = arith.constant 8 : index
    %c0_109 = arith.constant 0 : index
    %337 = vector.load %arg5[%c8_108, %c0_109] : memref<504x128xf32, #tpu.memory_space<vmem>>, vector<32x96xf32>
    %c40_110 = arith.constant 40 : index
    %c0_111 = arith.constant 0 : index
    %338 = vector.load %arg5[%c40_110, %c0_111] : memref<504x128xf32, #tpu.memory_space<vmem>>, vector<32x32xf32>
    %c72_112 = arith.constant 72 : index
    %c0_113 = arith.constant 0 : index
    %339 = vector.load %arg5[%c72_112, %c0_113] : memref<504x128xf32, #tpu.memory_space<vmem>>, vector<32x128xf32>
    %c104_114 = arith.constant 104 : index
    %c0_115 = arith.constant 0 : index
    %340 = vector.load %arg5[%c104_114, %c0_115] : memref<504x128xf32, #tpu.memory_space<vmem>>, vector<128x32xf32>
    %341 = vector.extract_strided_slice %331 {offsets = [0, 0], sizes = [1, 32], strides = [1, 1]} : vector<2x32xf32> to vector<1x32xf32>
    %342 = vector.extract_strided_slice %331 {offsets = [1, 0], sizes = [1, 32], strides = [1, 1]} : vector<2x32xf32> to vector<1x32xf32>
    %cst_116 = arith.constant dense<0.000000e+00> : vector<16xf32>
    %343 = vector.multi_reduction <add>, %290, %cst_116 [1] : vector<16x32xf32> to vector<16xf32>
    %344 = vector.shape_cast %343 : vector<16xf32> to vector<16x1xf32>
    %cst_117 = arith.constant 3.200000e+01 : f32
    %345 = vector.broadcast %cst_117 : f32 to vector<16x1xf32>
    %346 = arith.divf %344, %345 : vector<16x1xf32>
    %347 = vector.broadcast %346 : vector<16x1xf32> to vector<16x32xf32>
    %348 = arith.subf %290, %347 : vector<16x32xf32>
    %349 = arith.mulf %348, %348 : vector<16x32xf32>
    %cst_118 = arith.constant dense<0.000000e+00> : vector<16xf32>
    %350 = vector.multi_reduction <add>, %349, %cst_118 [1] : vector<16x32xf32> to vector<16xf32>
    %351 = vector.shape_cast %350 : vector<16xf32> to vector<16x1xf32>
    %cst_119 = arith.constant 3.200000e+01 : f32
    %352 = vector.broadcast %cst_119 : f32 to vector<16x1xf32>
    %353 = arith.divf %351, %352 : vector<16x1xf32>
    %cst_120 = arith.constant 9.99999974E-6 : f32
    %354 = vector.broadcast %cst_120 : f32 to vector<16x1xf32>
    %355 = arith.addf %353, %354 : vector<16x1xf32>
    %356 = math.rsqrt %355 : vector<16x1xf32>
    %357 = vector.broadcast %356 : vector<16x1xf32> to vector<16x32xf32>
    %358 = arith.mulf %348, %357 : vector<16x32xf32>
    %359 = vector.broadcast %341 : vector<1x32xf32> to vector<16x32xf32>
    %360 = arith.mulf %358, %359 : vector<16x32xf32>
    %361 = vector.broadcast %342 : vector<1x32xf32> to vector<16x32xf32>
    %362 = arith.addf %360, %361 : vector<16x32xf32>
    %cst_121 = arith.constant dense<0.000000e+00> : vector<16x96xf32>
    %363 = tpu.matmul %362, %337, %cst_121 {dimension_numbers = #tpu.dot_dimension_numbers<[1], [0], [0], [1], [0, 0, 1, 1], [], []>} : vector<16x32xf32>, vector<32x96xf32>, vector<16x96xf32> -> vector<16x96xf32>
    %364 = vector.broadcast %332 : vector<1x96xf32> to vector<16x96xf32>
    %365 = arith.addf %363, %364 : vector<16x96xf32>
    %366 = vector.extract_strided_slice %365 {offsets = [0, 0], sizes = [16, 16], strides = [1, 1]} : vector<16x96xf32> to vector<16x16xf32>
    %367 = vector.extract_strided_slice %365 {offsets = [0, 16], sizes = [16, 16], strides = [1, 1]} : vector<16x96xf32> to vector<16x16xf32>
    %368 = tpu.concatenate %366, %367 in 0 : vector<16x16xf32>, vector<16x16xf32> -> vector<32x16xf32>
    %369 = vector.extract_strided_slice %365 {offsets = [0, 32], sizes = [16, 16], strides = [1, 1]} : vector<16x96xf32> to vector<16x16xf32>
    %370 = vector.extract_strided_slice %365 {offsets = [0, 48], sizes = [16, 16], strides = [1, 1]} : vector<16x96xf32> to vector<16x16xf32>
    %371 = tpu.concatenate %369, %370 in 0 : vector<16x16xf32>, vector<16x16xf32> -> vector<32x16xf32>
    %372 = vector.extract_strided_slice %365 {offsets = [0, 64], sizes = [16, 16], strides = [1, 1]} : vector<16x96xf32> to vector<16x16xf32>
    %373 = vector.extract_strided_slice %365 {offsets = [0, 80], sizes = [16, 16], strides = [1, 1]} : vector<16x96xf32> to vector<16x16xf32>
    %374 = tpu.concatenate %372, %373 in 0 : vector<16x16xf32>, vector<16x16xf32> -> vector<32x16xf32>
    %cst_122 = arith.constant dense<0.000000e+00> : vector<32x32xf32>
    %375 = tpu.matmul %368, %371, %cst_122 {dimension_numbers = #tpu.dot_dimension_numbers<[1], [1], [0], [0], [0, 0, 1, 0], [], []>} : vector<32x16xf32>, vector<32x16xf32>, vector<32x32xf32> -> vector<32x32xf32>
    %cst_123 = arith.constant 2.500000e-01 : f32
    %376 = vector.broadcast %cst_123 : f32 to vector<32x32xf32>
    %377 = arith.mulf %375, %376 : vector<32x32xf32>
    %378 = arith.addf %377, %330 : vector<32x32xf32>
    %cst_124 = arith.constant dense<0xFF800000> : vector<32xf32>
    %379 = vector.multi_reduction <maximumf>, %378, %cst_124 [1] : vector<32x32xf32> to vector<32xf32>
    %380 = vector.shape_cast %379 : vector<32xf32> to vector<32x1xf32>
    %381 = vector.broadcast %380 : vector<32x1xf32> to vector<32x32xf32>
    %382 = arith.subf %378, %381 : vector<32x32xf32>
    %383 = math.exp %382 : vector<32x32xf32>
    %cst_125 = arith.constant dense<0.000000e+00> : vector<32xf32>
    %384 = vector.multi_reduction <add>, %383, %cst_125 [1] : vector<32x32xf32> to vector<32xf32>
    %385 = vector.shape_cast %384 : vector<32xf32> to vector<32x1xf32>
    %386 = tpu.reciprocal %385 {approx = true} : vector<32x1xf32> -> vector<32x1xf32>
    %387 = vector.broadcast %386 : vector<32x1xf32> to vector<32x32xf32>
    %388 = arith.mulf %383, %387 : vector<32x32xf32>
    %cst_126 = arith.constant dense<0.000000e+00> : vector<32x16xf32>
    %389 = tpu.matmul %388, %374, %cst_126 {dimension_numbers = #tpu.dot_dimension_numbers<[1], [0], [0], [1], [0, 0, 1, 1], [], []>} : vector<32x32xf32>, vector<32x16xf32>, vector<32x16xf32> -> vector<32x16xf32>
    %390 = vector.extract_strided_slice %389 {offsets = [0, 0], sizes = [16, 16], strides = [1, 1]} : vector<32x16xf32> to vector<16x16xf32>
    %391 = vector.extract_strided_slice %389 {offsets = [16, 0], sizes = [16, 16], strides = [1, 1]} : vector<32x16xf32> to vector<16x16xf32>
    %392 = tpu.concatenate %390, %391 in 1 : vector<16x16xf32>, vector<16x16xf32> -> vector<16x32xf32>
    %cst_127 = arith.constant dense<0.000000e+00> : vector<16x32xf32>
    %393 = tpu.matmul %392, %338, %cst_127 {dimension_numbers = #tpu.dot_dimension_numbers<[1], [0], [0], [1], [0, 0, 1, 1], [], []>} : vector<16x32xf32>, vector<32x32xf32>, vector<16x32xf32> -> vector<16x32xf32>
    %394 = arith.addf %290, %393 : vector<16x32xf32>
    %395 = vector.broadcast %333 : vector<1x32xf32> to vector<16x32xf32>
    %396 = arith.addf %394, %395 : vector<16x32xf32>
    %397 = vector.extract_strided_slice %334 {offsets = [0, 0], sizes = [1, 32], strides = [1, 1]} : vector<2x32xf32> to vector<1x32xf32>
    %398 = vector.extract_strided_slice %334 {offsets = [1, 0], sizes = [1, 32], strides = [1, 1]} : vector<2x32xf32> to vector<1x32xf32>
    %cst_128 = arith.constant dense<0.000000e+00> : vector<16xf32>
    %399 = vector.multi_reduction <add>, %396, %cst_128 [1] : vector<16x32xf32> to vector<16xf32>
    %400 = vector.shape_cast %399 : vector<16xf32> to vector<16x1xf32>
    %cst_129 = arith.constant 3.200000e+01 : f32
    %401 = vector.broadcast %cst_129 : f32 to vector<16x1xf32>
    %402 = arith.divf %400, %401 : vector<16x1xf32>
    %403 = vector.broadcast %402 : vector<16x1xf32> to vector<16x32xf32>
    %404 = arith.subf %396, %403 : vector<16x32xf32>
    %405 = arith.mulf %404, %404 : vector<16x32xf32>
    %cst_130 = arith.constant dense<0.000000e+00> : vector<16xf32>
    %406 = vector.multi_reduction <add>, %405, %cst_130 [1] : vector<16x32xf32> to vector<16xf32>
    %407 = vector.shape_cast %406 : vector<16xf32> to vector<16x1xf32>
    %cst_131 = arith.constant 3.200000e+01 : f32
    %408 = vector.broadcast %cst_131 : f32 to vector<16x1xf32>
    %409 = arith.divf %407, %408 : vector<16x1xf32>
    %cst_132 = arith.constant 9.99999974E-6 : f32
    %410 = vector.broadcast %cst_132 : f32 to vector<16x1xf32>
    %411 = arith.addf %409, %410 : vector<16x1xf32>
    %412 = math.rsqrt %411 : vector<16x1xf32>
    %413 = vector.broadcast %412 : vector<16x1xf32> to vector<16x32xf32>
    %414 = arith.mulf %404, %413 : vector<16x32xf32>
    %415 = vector.broadcast %397 : vector<1x32xf32> to vector<16x32xf32>
    %416 = arith.mulf %414, %415 : vector<16x32xf32>
    %417 = vector.broadcast %398 : vector<1x32xf32> to vector<16x32xf32>
    %418 = arith.addf %416, %417 : vector<16x32xf32>
    %cst_133 = arith.constant dense<0.000000e+00> : vector<16x128xf32>
    %419 = tpu.matmul %418, %339, %cst_133 {dimension_numbers = #tpu.dot_dimension_numbers<[1], [0], [0], [1], [0, 0, 1, 1], [], []>} : vector<16x32xf32>, vector<32x128xf32>, vector<16x128xf32> -> vector<16x128xf32>
    %420 = vector.broadcast %335 : vector<1x128xf32> to vector<16x128xf32>
    %421 = arith.addf %419, %420 : vector<16x128xf32>
    %cst_134 = arith.constant -1.702000e+00 : f32
    %422 = vector.broadcast %cst_134 : f32 to vector<16x128xf32>
    %423 = arith.mulf %422, %421 : vector<16x128xf32>
    %424 = math.exp %423 : vector<16x128xf32>
    %cst_135 = arith.constant 1.000000e+00 : f32
    %425 = vector.broadcast %cst_135 : f32 to vector<16x128xf32>
    %426 = arith.addf %425, %424 : vector<16x128xf32>
    %cst_136 = arith.constant 1.000000e+00 : f32
    %427 = vector.broadcast %cst_136 : f32 to vector<16x128xf32>
    %428 = arith.divf %427, %426 : vector<16x128xf32>
    %429 = arith.mulf %421, %428 : vector<16x128xf32>
    %cst_137 = arith.constant dense<0.000000e+00> : vector<16x32xf32>
    %430 = tpu.matmul %429, %340, %cst_137 {dimension_numbers = #tpu.dot_dimension_numbers<[1], [0], [0], [1], [0, 0, 1, 1], [], []>} : vector<16x128xf32>, vector<128x32xf32>, vector<16x32xf32> -> vector<16x32xf32>
    %431 = arith.addf %396, %430 : vector<16x32xf32>
    %432 = vector.broadcast %336 : vector<1x32xf32> to vector<16x32xf32>
    %433 = arith.addf %431, %432 : vector<16x32xf32>
    %c232_138 = arith.constant 232 : index
    %c0_139 = arith.constant 0 : index
    %434 = vector.load %arg5[%c232_138, %c0_139] : memref<504x128xf32, #tpu.memory_space<vmem>>, vector<2x32xf32>
    %c234_140 = arith.constant 234 : index
    %c0_141 = arith.constant 0 : index
    %435 = vector.load %arg5[%c234_140, %c0_141] : memref<504x128xf32, #tpu.memory_space<vmem>>, vector<1x96xf32>
    %c235_142 = arith.constant 235 : index
    %c0_143 = arith.constant 0 : index
    %436 = vector.load %arg5[%c235_142, %c0_143] : memref<504x128xf32, #tpu.memory_space<vmem>>, vector<1x32xf32>
    %c236_144 = arith.constant 236 : index
    %c0_145 = arith.constant 0 : index
    %437 = vector.load %arg5[%c236_144, %c0_145] : memref<504x128xf32, #tpu.memory_space<vmem>>, vector<2x32xf32>
    %c238_146 = arith.constant 238 : index
    %c0_147 = arith.constant 0 : index
    %438 = vector.load %arg5[%c238_146, %c0_147] : memref<504x128xf32, #tpu.memory_space<vmem>>, vector<1x128xf32>
    %c239_148 = arith.constant 239 : index
    %c0_149 = arith.constant 0 : index
    %439 = vector.load %arg5[%c239_148, %c0_149] : memref<504x128xf32, #tpu.memory_space<vmem>>, vector<1x32xf32>
    %c240_150 = arith.constant 240 : index
    %c0_151 = arith.constant 0 : index
    %440 = vector.load %arg5[%c240_150, %c0_151] : memref<504x128xf32, #tpu.memory_space<vmem>>, vector<32x96xf32>
    %c272_152 = arith.constant 272 : index
    %c0_153 = arith.constant 0 : index
    %441 = vector.load %arg5[%c272_152, %c0_153] : memref<504x128xf32, #tpu.memory_space<vmem>>, vector<32x32xf32>
    %c304_154 = arith.constant 304 : index
    %c0_155 = arith.constant 0 : index
    %442 = vector.load %arg5[%c304_154, %c0_155] : memref<504x128xf32, #tpu.memory_space<vmem>>, vector<32x128xf32>
    %c336_156 = arith.constant 336 : index
    %c0_157 = arith.constant 0 : index
    %443 = vector.load %arg5[%c336_156, %c0_157] : memref<504x128xf32, #tpu.memory_space<vmem>>, vector<128x32xf32>
    %444 = vector.extract_strided_slice %434 {offsets = [0, 0], sizes = [1, 32], strides = [1, 1]} : vector<2x32xf32> to vector<1x32xf32>
    %445 = vector.extract_strided_slice %434 {offsets = [1, 0], sizes = [1, 32], strides = [1, 1]} : vector<2x32xf32> to vector<1x32xf32>
    %cst_158 = arith.constant dense<0.000000e+00> : vector<16xf32>
    %446 = vector.multi_reduction <add>, %433, %cst_158 [1] : vector<16x32xf32> to vector<16xf32>
    %447 = vector.shape_cast %446 : vector<16xf32> to vector<16x1xf32>
    %cst_159 = arith.constant 3.200000e+01 : f32
    %448 = vector.broadcast %cst_159 : f32 to vector<16x1xf32>
    %449 = arith.divf %447, %448 : vector<16x1xf32>
    %450 = vector.broadcast %449 : vector<16x1xf32> to vector<16x32xf32>
    %451 = arith.subf %433, %450 : vector<16x32xf32>
    %452 = arith.mulf %451, %451 : vector<16x32xf32>
    %cst_160 = arith.constant dense<0.000000e+00> : vector<16xf32>
    %453 = vector.multi_reduction <add>, %452, %cst_160 [1] : vector<16x32xf32> to vector<16xf32>
    %454 = vector.shape_cast %453 : vector<16xf32> to vector<16x1xf32>
    %cst_161 = arith.constant 3.200000e+01 : f32
    %455 = vector.broadcast %cst_161 : f32 to vector<16x1xf32>
    %456 = arith.divf %454, %455 : vector<16x1xf32>
    %cst_162 = arith.constant 9.99999974E-6 : f32
    %457 = vector.broadcast %cst_162 : f32 to vector<16x1xf32>
    %458 = arith.addf %456, %457 : vector<16x1xf32>
    %459 = math.rsqrt %458 : vector<16x1xf32>
    %460 = vector.broadcast %459 : vector<16x1xf32> to vector<16x32xf32>
    %461 = arith.mulf %451, %460 : vector<16x32xf32>
    %462 = vector.broadcast %444 : vector<1x32xf32> to vector<16x32xf32>
    %463 = arith.mulf %461, %462 : vector<16x32xf32>
    %464 = vector.broadcast %445 : vector<1x32xf32> to vector<16x32xf32>
    %465 = arith.addf %463, %464 : vector<16x32xf32>
    %cst_163 = arith.constant dense<0.000000e+00> : vector<16x96xf32>
    %466 = tpu.matmul %465, %440, %cst_163 {dimension_numbers = #tpu.dot_dimension_numbers<[1], [0], [0], [1], [0, 0, 1, 1], [], []>} : vector<16x32xf32>, vector<32x96xf32>, vector<16x96xf32> -> vector<16x96xf32>
    %467 = vector.broadcast %435 : vector<1x96xf32> to vector<16x96xf32>
    %468 = arith.addf %466, %467 : vector<16x96xf32>
    %469 = vector.extract_strided_slice %468 {offsets = [0, 0], sizes = [16, 16], strides = [1, 1]} : vector<16x96xf32> to vector<16x16xf32>
    %470 = vector.extract_strided_slice %468 {offsets = [0, 16], sizes = [16, 16], strides = [1, 1]} : vector<16x96xf32> to vector<16x16xf32>
    %471 = tpu.concatenate %469, %470 in 0 : vector<16x16xf32>, vector<16x16xf32> -> vector<32x16xf32>
    %472 = vector.extract_strided_slice %468 {offsets = [0, 32], sizes = [16, 16], strides = [1, 1]} : vector<16x96xf32> to vector<16x16xf32>
    %473 = vector.extract_strided_slice %468 {offsets = [0, 48], sizes = [16, 16], strides = [1, 1]} : vector<16x96xf32> to vector<16x16xf32>
    %474 = tpu.concatenate %472, %473 in 0 : vector<16x16xf32>, vector<16x16xf32> -> vector<32x16xf32>
    %475 = vector.extract_strided_slice %468 {offsets = [0, 64], sizes = [16, 16], strides = [1, 1]} : vector<16x96xf32> to vector<16x16xf32>
    %476 = vector.extract_strided_slice %468 {offsets = [0, 80], sizes = [16, 16], strides = [1, 1]} : vector<16x96xf32> to vector<16x16xf32>
    %477 = tpu.concatenate %475, %476 in 0 : vector<16x16xf32>, vector<16x16xf32> -> vector<32x16xf32>
    %cst_164 = arith.constant dense<0.000000e+00> : vector<32x32xf32>
    %478 = tpu.matmul %471, %474, %cst_164 {dimension_numbers = #tpu.dot_dimension_numbers<[1], [1], [0], [0], [0, 0, 1, 0], [], []>} : vector<32x16xf32>, vector<32x16xf32>, vector<32x32xf32> -> vector<32x32xf32>
    %cst_165 = arith.constant 2.500000e-01 : f32
    %479 = vector.broadcast %cst_165 : f32 to vector<32x32xf32>
    %480 = arith.mulf %478, %479 : vector<32x32xf32>
    %481 = arith.addf %480, %330 : vector<32x32xf32>
    %cst_166 = arith.constant dense<0xFF800000> : vector<32xf32>
    %482 = vector.multi_reduction <maximumf>, %481, %cst_166 [1] : vector<32x32xf32> to vector<32xf32>
    %483 = vector.shape_cast %482 : vector<32xf32> to vector<32x1xf32>
    %484 = vector.broadcast %483 : vector<32x1xf32> to vector<32x32xf32>
    %485 = arith.subf %481, %484 : vector<32x32xf32>
    %486 = math.exp %485 : vector<32x32xf32>
    %cst_167 = arith.constant dense<0.000000e+00> : vector<32xf32>
    %487 = vector.multi_reduction <add>, %486, %cst_167 [1] : vector<32x32xf32> to vector<32xf32>
    %488 = vector.shape_cast %487 : vector<32xf32> to vector<32x1xf32>
    %489 = tpu.reciprocal %488 {approx = true} : vector<32x1xf32> -> vector<32x1xf32>
    %490 = vector.broadcast %489 : vector<32x1xf32> to vector<32x32xf32>
    %491 = arith.mulf %486, %490 : vector<32x32xf32>
    %cst_168 = arith.constant dense<0.000000e+00> : vector<32x16xf32>
    %492 = tpu.matmul %491, %477, %cst_168 {dimension_numbers = #tpu.dot_dimension_numbers<[1], [0], [0], [1], [0, 0, 1, 1], [], []>} : vector<32x32xf32>, vector<32x16xf32>, vector<32x16xf32> -> vector<32x16xf32>
    %493 = vector.extract_strided_slice %492 {offsets = [0, 0], sizes = [16, 16], strides = [1, 1]} : vector<32x16xf32> to vector<16x16xf32>
    %494 = vector.extract_strided_slice %492 {offsets = [16, 0], sizes = [16, 16], strides = [1, 1]} : vector<32x16xf32> to vector<16x16xf32>
    %495 = tpu.concatenate %493, %494 in 1 : vector<16x16xf32>, vector<16x16xf32> -> vector<16x32xf32>
    %cst_169 = arith.constant dense<0.000000e+00> : vector<16x32xf32>
    %496 = tpu.matmul %495, %441, %cst_169 {dimension_numbers = #tpu.dot_dimension_numbers<[1], [0], [0], [1], [0, 0, 1, 1], [], []>} : vector<16x32xf32>, vector<32x32xf32>, vector<16x32xf32> -> vector<16x32xf32>
    %497 = arith.addf %433, %496 : vector<16x32xf32>
    %498 = vector.broadcast %436 : vector<1x32xf32> to vector<16x32xf32>
    %499 = arith.addf %497, %498 : vector<16x32xf32>
    %500 = vector.extract_strided_slice %437 {offsets = [0, 0], sizes = [1, 32], strides = [1, 1]} : vector<2x32xf32> to vector<1x32xf32>
    %501 = vector.extract_strided_slice %437 {offsets = [1, 0], sizes = [1, 32], strides = [1, 1]} : vector<2x32xf32> to vector<1x32xf32>
    %cst_170 = arith.constant dense<0.000000e+00> : vector<16xf32>
    %502 = vector.multi_reduction <add>, %499, %cst_170 [1] : vector<16x32xf32> to vector<16xf32>
    %503 = vector.shape_cast %502 : vector<16xf32> to vector<16x1xf32>
    %cst_171 = arith.constant 3.200000e+01 : f32
    %504 = vector.broadcast %cst_171 : f32 to vector<16x1xf32>
    %505 = arith.divf %503, %504 : vector<16x1xf32>
    %506 = vector.broadcast %505 : vector<16x1xf32> to vector<16x32xf32>
    %507 = arith.subf %499, %506 : vector<16x32xf32>
    %508 = arith.mulf %507, %507 : vector<16x32xf32>
    %cst_172 = arith.constant dense<0.000000e+00> : vector<16xf32>
    %509 = vector.multi_reduction <add>, %508, %cst_172 [1] : vector<16x32xf32> to vector<16xf32>
    %510 = vector.shape_cast %509 : vector<16xf32> to vector<16x1xf32>
    %cst_173 = arith.constant 3.200000e+01 : f32
    %511 = vector.broadcast %cst_173 : f32 to vector<16x1xf32>
    %512 = arith.divf %510, %511 : vector<16x1xf32>
    %cst_174 = arith.constant 9.99999974E-6 : f32
    %513 = vector.broadcast %cst_174 : f32 to vector<16x1xf32>
    %514 = arith.addf %512, %513 : vector<16x1xf32>
    %515 = math.rsqrt %514 : vector<16x1xf32>
    %516 = vector.broadcast %515 : vector<16x1xf32> to vector<16x32xf32>
    %517 = arith.mulf %507, %516 : vector<16x32xf32>
    %518 = vector.broadcast %500 : vector<1x32xf32> to vector<16x32xf32>
    %519 = arith.mulf %517, %518 : vector<16x32xf32>
    %520 = vector.broadcast %501 : vector<1x32xf32> to vector<16x32xf32>
    %521 = arith.addf %519, %520 : vector<16x32xf32>
    %cst_175 = arith.constant dense<0.000000e+00> : vector<16x128xf32>
    %522 = tpu.matmul %521, %442, %cst_175 {dimension_numbers = #tpu.dot_dimension_numbers<[1], [0], [0], [1], [0, 0, 1, 1], [], []>} : vector<16x32xf32>, vector<32x128xf32>, vector<16x128xf32> -> vector<16x128xf32>
    %523 = vector.broadcast %438 : vector<1x128xf32> to vector<16x128xf32>
    %524 = arith.addf %522, %523 : vector<16x128xf32>
    %cst_176 = arith.constant -1.702000e+00 : f32
    %525 = vector.broadcast %cst_176 : f32 to vector<16x128xf32>
    %526 = arith.mulf %525, %524 : vector<16x128xf32>
    %527 = math.exp %526 : vector<16x128xf32>
    %cst_177 = arith.constant 1.000000e+00 : f32
    %528 = vector.broadcast %cst_177 : f32 to vector<16x128xf32>
    %529 = arith.addf %528, %527 : vector<16x128xf32>
    %cst_178 = arith.constant 1.000000e+00 : f32
    %530 = vector.broadcast %cst_178 : f32 to vector<16x128xf32>
    %531 = arith.divf %530, %529 : vector<16x128xf32>
    %532 = arith.mulf %524, %531 : vector<16x128xf32>
    %cst_179 = arith.constant dense<0.000000e+00> : vector<16x32xf32>
    %533 = tpu.matmul %532, %443, %cst_179 {dimension_numbers = #tpu.dot_dimension_numbers<[1], [0], [0], [1], [0, 0, 1, 1], [], []>} : vector<16x128xf32>, vector<128x32xf32>, vector<16x32xf32> -> vector<16x32xf32>
    %534 = arith.addf %499, %533 : vector<16x32xf32>
    %535 = vector.broadcast %439 : vector<1x32xf32> to vector<16x32xf32>
    %536 = arith.addf %534, %535 : vector<16x32xf32>
    %c466_180 = arith.constant 466 : index
    %c0_181 = arith.constant 0 : index
    %537 = vector.load %arg5[%c466_180, %c0_181] : memref<504x128xf32, #tpu.memory_space<vmem>>, vector<2x32xf32>
    %538 = vector.extract_strided_slice %537 {offsets = [0, 0], sizes = [1, 32], strides = [1, 1]} : vector<2x32xf32> to vector<1x32xf32>
    %539 = vector.extract_strided_slice %537 {offsets = [1, 0], sizes = [1, 32], strides = [1, 1]} : vector<2x32xf32> to vector<1x32xf32>
    %cst_182 = arith.constant dense<0.000000e+00> : vector<16xf32>
    %540 = vector.multi_reduction <add>, %536, %cst_182 [1] : vector<16x32xf32> to vector<16xf32>
    %541 = vector.shape_cast %540 : vector<16xf32> to vector<16x1xf32>
    %cst_183 = arith.constant 3.200000e+01 : f32
    %542 = vector.broadcast %cst_183 : f32 to vector<16x1xf32>
    %543 = arith.divf %541, %542 : vector<16x1xf32>
    %544 = vector.broadcast %543 : vector<16x1xf32> to vector<16x32xf32>
    %545 = arith.subf %536, %544 : vector<16x32xf32>
    %546 = arith.mulf %545, %545 : vector<16x32xf32>
    %cst_184 = arith.constant dense<0.000000e+00> : vector<16xf32>
    %547 = vector.multi_reduction <add>, %546, %cst_184 [1] : vector<16x32xf32> to vector<16xf32>
    %548 = vector.shape_cast %547 : vector<16xf32> to vector<16x1xf32>
    %cst_185 = arith.constant 3.200000e+01 : f32
    %549 = vector.broadcast %cst_185 : f32 to vector<16x1xf32>
    %550 = arith.divf %548, %549 : vector<16x1xf32>
    %cst_186 = arith.constant 9.99999974E-6 : f32
    %551 = vector.broadcast %cst_186 : f32 to vector<16x1xf32>
    %552 = arith.addf %550, %551 : vector<16x1xf32>
    %553 = math.rsqrt %552 : vector<16x1xf32>
    %554 = vector.broadcast %553 : vector<16x1xf32> to vector<16x32xf32>
    %555 = arith.mulf %545, %554 : vector<16x32xf32>
    %556 = vector.broadcast %538 : vector<1x32xf32> to vector<16x32xf32>
    %557 = arith.mulf %555, %556 : vector<16x32xf32>
    %558 = vector.broadcast %539 : vector<1x32xf32> to vector<16x32xf32>
    %559 = arith.addf %557, %558 : vector<16x32xf32>
    %c0_187 = arith.constant 0 : index
    %c0_188 = arith.constant 0 : index
    %560 = vector.load %arg7[%c0_187, %c0_188] : memref<16x32xf32, #tpu.memory_space<vmem>>, vector<16x32xf32>
    tpu.vector_store %arg7[%c0_187, %c0_188], %559 {strides = array<i32>} : memref<16x32xf32, #tpu.memory_space<vmem>>, vector<16x32xf32>,
    %c0_189 = arith.constant 0 : index
    %561 = memref.load %arg1[%c0_189] : memref<2xi32, #tpu.memory_space<smem>>
    %562 = arith.index_cast %561 : i32 to index
    %c0_190 = arith.constant 0 : index
    %563 = vector.load %arg7[%562, %c0_190] : memref<16x32xf32, #tpu.memory_space<vmem>>, vector<1x32xf32>
    %c1 = arith.constant 1 : index
    %564 = memref.load %arg1[%c1] : memref<2xi32, #tpu.memory_space<smem>>
    %565 = arith.index_cast %564 : i32 to index
    %c0_191 = arith.constant 0 : index
    %566 = vector.load %arg7[%565, %c0_191] : memref<16x32xf32, #tpu.memory_space<vmem>>, vector<1x32xf32>
    %567 = tpu.concatenate %563, %566 in 0 : vector<1x32xf32>, vector<1x32xf32> -> vector<2x32xf32>
    %c472_192 = arith.constant 472 : index
    %c0_193 = arith.constant 0 : index
    %568 = vector.load %arg5[%c472_192, %c0_193] : memref<504x128xf32, #tpu.memory_space<vmem>>, vector<32x16xf32>
    %cst_194 = arith.constant dense<0.000000e+00> : vector<2x16xf32>
    %569 = tpu.matmul %567, %568, %cst_194 {dimension_numbers = #tpu.dot_dimension_numbers<[1], [0], [0], [1], [0, 0, 1, 1], [], []>} : vector<2x32xf32>, vector<32x16xf32>, vector<2x16xf32> -> vector<2x16xf32>
    %570 = arith.mulf %289, %289 : vector<2x16xf32>
    %cst_195 = arith.constant dense<0.000000e+00> : vector<2xf32>
    %571 = vector.multi_reduction <add>, %570, %cst_195 [1] : vector<2x16xf32> to vector<2xf32>
    %572 = vector.shape_cast %571 : vector<2xf32> to vector<2x1xf32>
    %573 = math.rsqrt %572 : vector<2x1xf32>
    %574 = vector.broadcast %573 : vector<2x1xf32> to vector<2x16xf32>
    %575 = arith.mulf %289, %574 : vector<2x16xf32>
    %576 = arith.mulf %569, %569 : vector<2x16xf32>
    %cst_196 = arith.constant dense<0.000000e+00> : vector<2xf32>
    %577 = vector.multi_reduction <add>, %576, %cst_196 [1] : vector<2x16xf32> to vector<2xf32>
    %578 = vector.shape_cast %577 : vector<2xf32> to vector<2x1xf32>
    %579 = math.rsqrt %578 : vector<2x1xf32>
    %580 = vector.broadcast %579 : vector<2x1xf32> to vector<2x16xf32>
    %581 = arith.mulf %569, %580 : vector<2x16xf32>
    %cst_197 = arith.constant dense<0.000000e+00> : vector<2x2xf32>
    %582 = tpu.matmul %575, %581, %cst_197 {dimension_numbers = #tpu.dot_dimension_numbers<[1], [1], [0], [0], [0, 0, 1, 0], [], []>} : vector<2x16xf32>, vector<2x16xf32>, vector<2x2xf32> -> vector<2x2xf32>
    %cst_198 = arith.constant 0.142857149 : f32
    %583 = vector.broadcast %cst_198 : f32 to vector<2x2xf32>
    %584 = arith.mulf %583, %582 : vector<2x2xf32>
    %cst_199 = arith.constant 1.000000e+00 : f32
    %585 = vector.broadcast %cst_199 : f32 to vector<2x2xf32>
    %586 = arith.subf %585, %584 : vector<2x2xf32>
    %c0_200 = arith.constant 0 : index
    %c0_201 = arith.constant 0 : index
    %587 = vector.load %arg6[%c0_200, %c0_201] : memref<2x2xf32, #tpu.memory_space<vmem>>, vector<2x2xf32>
    tpu.vector_store %arg6[%c0_200, %c0_201], %586 {strides = array<i32>} : memref<2x2xf32, #tpu.memory_space<vmem>>, vector<2x2xf32>,
    return
  }
  func.func @transform_0(%arg0: i32, %arg1: memref<2xi32, #tpu.memory_space<smem>>) -> (i32, i32) {
    %c0_i32 = arith.constant 0 : i32
    %c0_i32_0 = arith.constant 0 : i32
    %c0_i32_1 = arith.constant 0 : i32
    return %c0_i32, %c0_i32_0 : i32, i32
  }
  func.func @transform_1(%arg0: i32, %arg1: memref<2xi32, #tpu.memory_space<smem>>) -> (i32, i32) {
    %c0_i32 = arith.constant 0 : i32
    %c0_i32_0 = arith.constant 0 : i32
    %c0_i32_1 = arith.constant 0 : i32
    return %c0_i32, %c0_i32_0 : i32, i32
  }
  func.func @transform_2(%arg0: i32, %arg1: memref<2xi32, #tpu.memory_space<smem>>) -> (i32, i32) {
    %c0_i32 = arith.constant 0 : i32
    %c0_i32_0 = arith.constant 0 : i32
    %c0_i32_1 = arith.constant 0 : i32
    return %c0_i32, %c0_i32_0 : i32, i32
  }
  func.func @transform_3(%arg0: i32, %arg1: memref<2xi32, #tpu.memory_space<smem>>) -> (i32, i32) {
    %c0_i32 = arith.constant 0 : i32
    %c0_i32_0 = arith.constant 0 : i32
    %c0_i32_1 = arith.constant 0 : i32
    return %c0_i32, %c0_i32_0 : i32, i32
  }
  func.func @transform_4(%arg0: i32, %arg1: memref<2xi32, #tpu.memory_space<smem>>) -> (i32, i32) {
    %c0_i32 = arith.constant 0 : i32
    %c0_i32_0 = arith.constant 0 : i32
    %c0_i32_1 = arith.constant 0 : i32
    return %c0_i32, %c0_i32_0 : i32, i32
  }
}

</mosaic_0001>

<bundles_post_ra>
// kernel: clip_loss.1
= control target key start
LH: loop header
LB: loop body
LE: loop exit
PB: predicated region body
PF: predicated region fallthrough
CT: control target
= control target key end

     0   :  { %s2599_s21 = smov [#allocation4]   ;;  %s3540_s0 = inlined_call_operand.vmem [shape: s32[2], index: 0, kind: input, shape index: {}]   ;;  %s3541_s1 = inlined_call_operand.vmem [shape: f32[10,32], index: 1, kind: input, shape index: {}]   ;;  %s3542_s2 = inlined_call_operand.vmem [shape: f32[16,32], index: 2, kind: input, shape index: {}]   ;;  %s3543_s3 = inlined_call_operand.vmem [shape: f32[504,128], index: 3, kind: input, shape index: {}]   ;;  %s3544_s4 = inlined_call_operand.vmem [shape: f32[504,128], index: 4, kind: input, shape index: {}]   ;;  %s3545_s5 = inlined_call_operand.hbm [shape: f32[2,2], index: 5, kind: output, shape index: {}]  }
   0x1   :  { %s11_s20 = sshll.u32 %s3540_s0, 4  ;;  %s12_s20 = int_to_ptr.vmem [resolvable:$true] %s11_s20 }
   0x2   :  { %14 = dma.vmem_to_smem %s12_s20, 16, %s2599_s21, [#allocation3] }
   0x3   :  { %2595 = dma.done.wait [#allocation3], 16 }
   0x4   :  { %2596 = vsyncadd [#allocation3], 4294967280 }
   0x5   :  { %17 = sfence }
   0x6   :  { %v27_v0 = vld [vmem:[%s3541_s1] sm:$0xff]  ;;  %vm30_vm0 = vcmask 261120   ;;  %vm34_vm1 = vcmask 254976   ;;  %v28_v2 = vld [vmem:[%s3541_s1 + $0x8] sm:$0x3] }
   0x7   :  { %v31_v1 = vsel %vm30_vm0, %v27_v0, 0.0 }
   0x8   :  { %32 = vadd.xlane.f32.xlu0 %v31_v1 }
   0x9   :  { %18 = vsyncpa [#allocation6], 0  ;;  %v35_v3 = vsel %vm34_vm1, %v28_v2, 0.0  ;;  %v2600_v4 = vmov 32.0   ;;  %v29_v32 = vld [vmem:[%s3543_s3 + $0x1d0] sm:$0x3] }
   0xa   :  { %2423 = vrcp.f32 %v2600_v4  ;;  %v83_v36 = vperm.slane %v29_v32, 0  ;;  %v86_v40 = vperm.slane %v29_v32, 1  ;;  %v142_v62 = vld [vmem:[%s3543_s3 + $0x20] sm:$0xff]  ;;  %v141_v63 = vld [vmem:[%s3543_s3 + $0x18] sm:$0xff]  ;;  %v139_v1 = vld [vmem:[%s3543_s3 + $0x8] sm:$0xff]  ;;  %s2601_s13 = smov 112  }
   0xb   :  { %236 = vmatpush.msra.mxu0 %v142_v62  ;;  %v2407_v32 = vld [vmem:[%s3543_s3 + $0x2] ss:$0 sm:$0xff]  ;;  %vm249_vm15 = vcmask 1041408   ;;  %s2602_s14 = smov 96   ;;  %s2605_s15 = smov 64  }
   0xc   :  { %s2606_s22 = smov 16   ;;  %s2155_s24 = sld [smem:[#allocation4]] }
   0xd   :  { %237 = vmatpush.msra.mxu0 %v141_v63  ;;  %v2604_v63 = vmov -1e+09   ;;  %s2260_s26 = sshll.u32 %s3545_s5, 4  ;;  %s2261_s26 = int_to_ptr.hbm [resolvable:$true] %s2260_s26 }
  0x10   :  { %36 = vadd.xlane.f32.xlu0 %v35_v3  ;;  %v2424_v5 = vpop.eup %2423 }
  0x11   :  { %v39_v6 = vmul.f32 32.0, %v2424_v5  ;;  %vm43_vm2 = vweird.f32 %v2424_v5 }
  0x13   :  { %v40_v7 = vsub.f32 1.0, %v39_v6 }
  0x15   :  { %v41_v8 = vmul.f32 %v2424_v5, %v40_v7 }
  0x17   :  { %v42_v9 = vadd.f32 %v2424_v5, %v41_v8 }
  0x19   :  { %v2649_v10 = vsel %vm43_vm2, %v2424_v5, %v42_v9  ;;  %vm266_vm2 = vcmask 130048  }
  0x7b   :  { %v33_v11 = vpop.xlane.xlu0 %32 }
  0x7c   :  { %v45_v12 = vmul.f32 %v2649_v10, %v33_v11 }
  0x7e   :  { %v47_v13 = vsub.f32 %v27_v0, %v45_v12  ;;  %v140_v0 = vld [vmem:[%s3543_s3 + $0x10] sm:$0xff] }
  0x7f   :  { %238 = vmatpush.msra.mxu0 %v140_v0 }
  0x80   :  { %v49_v14 = vmul.f32 %v47_v13, %v47_v13 }
  0x81   :  { %239 = vmatpush.msra.mxu0 %v139_v1 }
  0x82   :  { %v51_v15 = vsel %vm30_vm0, %v49_v14, 0.0  ;;  %v133_v14 = vld [vmem:[%s3543_s3] sm:$0x3] }
  0x83   :  { %52 = vadd.xlane.f32.xlu1 %v51_v15  ;;  %v37_v16 = vpop.xlane.xlu0 %36 }
  0x84   :  { %v46_v17 = vmul.f32 %v2649_v10, %v37_v16 }
  0x86   :  { %v48_v18 = vsub.f32 %v28_v2, %v46_v17 }
  0x88   :  { %v50_v19 = vmul.f32 %v48_v18, %v48_v18 }
  0x8a   :  { %v54_v20 = vsel %vm34_vm1, %v50_v19, 0.0 }
  0x8b   :  { %55 = vadd.xlane.f32.xlu1 %v54_v20 }
  0xf6   :  { %v53_v21 = vpop.xlane.xlu1 %52 }
  0xf7   :  { %v57_v22 = vmul.f32 %v53_v21, %v2649_v10 }
  0xf9   :  { %v59_v23 = vadd.f32 1e-05, %v57_v22  ;;  %v214_v22 = vperm.slane %v133_v14, 1 }
  0xfb   :  { %2425 = vrsqrt.f32 %v59_v23  ;;  %vm67_vm4 = vweird.f32 %v59_v23 }
  0xfe   :  { %v56_v24 = vpop.xlane.xlu1 %55 }
  0xff   :  { %v58_v25 = vmul.f32 %v56_v24, %v2649_v10 }
 0x101   :  { %v2426_v26 = vpop.eup %2425  ;;  %v60_v27 = vadd.f32 1e-05, %v58_v25 }
 0x102   :  { %v62_v28 = vmul.f32 %v2426_v26, %v59_v23  ;;  %vm68_vm3 = vweird.f32 %v2426_v26 }
 0x103   :  { %2427 = vrsqrt.f32 %v60_v27  ;;  %vm69_vm5 = vmor %vm67_vm4, %vm68_vm3  ;;  %vm77_vm7 = vweird.f32 %v60_v27 }
 0x104   :  { %v63_v29 = vmul.f32 %v2426_v26, %v62_v28 }
 0x106   :  { %v64_v30 = vmul.f32 0.5, %v63_v29 }
 0x108   :  { %v65_v31 = vsub.f32 1.5, %v64_v30 }
 0x109   :  { %v2428_v33 = vpop.eup %2427 }
 0x10a   :  { %v66_v34 = vmul.f32 %v2426_v26, %v65_v31  ;;  %v72_v35 = vmul.f32 %v2428_v33, %v60_v27  ;;  %vm78_vm6 = vweird.f32 %v2428_v33 }
 0x10b   :  { %vm79_vm8 = vmor %vm77_vm7, %vm78_vm6 }
 0x10c   :  { %v70_v37 = vsel %vm69_vm5, %v2426_v26, %v66_v34  ;;  %v73_v38 = vmul.f32 %v2428_v33, %v72_v35 }
 0x10d   :  { %v81_v39 = vmul.f32 %v70_v37, %v47_v13 }
 0x10e   :  { %v74_v41 = vmul.f32 0.5, %v73_v38 }
 0x10f   :  { %v84_v42 = vmul.f32 %v83_v36, %v81_v39 }
 0x110   :  { %v75_v43 = vsub.f32 1.5, %v74_v41 }
 0x111   :  { %v2660_v44 = vadd.f32 %v86_v40, %v84_v42 }
 0x112   :  { %v76_v45 = vmul.f32 %v2428_v33, %v75_v43 }
 0x113   :  { %v167_v46 = vsel %vm30_vm0, %v2660_v44, 0.0 }
 0x114   :  { %v80_v47 = vsel %vm79_vm8, %v2428_v33, %v76_v45  ;;  %168 = vadd.xlane.f32.xlu2 %v167_v46 }
 0x115   :  { %v82_v48 = vmul.f32 %v80_v47, %v48_v18  ;;  %v211_v18 = vperm.slane %v133_v14, 0  ;;  %v89_v47 = vlaneseq }
 0x117   :  { %v85_v49 = vmul.f32 %v83_v36, %v82_v48  ;;  %v2714_v48 = vand.u32 127, %v89_v47 }
 0x119   :  { %v2664_v50 = vadd.f32 %v86_v40, %v85_v49  ;;  %vm101_vm3 = vcmp.ge.s32.totalorder %v2714_v48, 5  ;;  %vm112_vm4 = vcmp.ge.s32.totalorder %v2714_v48, 10  ;;  %v2718_v49 = vshrl.u32 %v89_v47, 7  ;;  %v145_v47 = vld [vmem:[%s3543_s3 + $0x38] sm:$0xff] }
 0x11a   :  { %vm124_vm5 = vcmp.ge.s32.totalorder %v2714_v48, 15 }
 0x11b   :  { %v170_v51 = vsel %vm34_vm1, %v2664_v50, 0.0  ;;  %vm95_vm6 = vcmp.ge.s32.totalorder %v2718_v49, 5 }
 0x11c   :  { %171 = vadd.xlane.f32.xlu2 %v170_v51  ;;  %v2603_v51 = vmov 0  }
 0x187   :  { %v169_v52 = vpop.xlane.xlu2 %168 }
 0x188   :  { %v173_v53 = vmul.f32 %v169_v52, %v2649_v10  ;;  %v102_v52 = vsel %vm101_vm3, 1, %v2603_v51  ;;  %vm394_vm3 = vcmask 1045504  }
 0x18a   :  { %v175_v54 = vsub.f32 %v2660_v44, %v173_v53  ;;  %v113_v53 = vsel %vm112_vm4, 1, %v2603_v51 }
 0x18c   :  { %v177_v55 = vmul.f32 %v175_v54, %v175_v54 }
 0x18e   :  { %v179_v56 = vsel %vm30_vm0, %v177_v55, 0.0  ;;  %v114_v55 = vadd.s32 %v113_v53, %v102_v52  ;;  %v144_v52 = vld [vmem:[%s3543_s3 + $0x30] sm:$0xff] }
 0x18f   :  { %180 = vadd.xlane.f32.xlu0 %v179_v56  ;;  %v172_v57 = vpop.xlane.xlu2 %171  ;;  %v125_v56 = vsel %vm124_vm5, 1, %v2603_v51 }
 0x190   :  { %v174_v58 = vmul.f32 %v172_v57, %v2649_v10  ;;  %v126_v57 = vadd.s32 %v125_v56, %v114_v55 }
 0x192   :  { %v176_v59 = vsub.f32 %v2664_v50, %v174_v58  ;;  %v98_v58 = vsel %vm95_vm6, 1, %v2603_v51 }
 0x194   :  { %v178_v60 = vmul.f32 %v176_v59, %v176_v59 }
 0x196   :  { %v182_v61 = vsel %vm34_vm1, %v178_v60, 0.0 }
 0x197   :  { %183 = vadd.xlane.f32.xlu1 %v182_v61 }
 0x202   :  { %v181_v2 = vpop.xlane.xlu0 %180 }
 0x203   :  { %v185_v3 = vmul.f32 %v181_v2, %v2649_v10 }
 0x205   :  { %v187_v4 = vadd.f32 1e-05, %v185_v3 }
 0x207   :  { %2429 = vrsqrt.f32 %v187_v4  ;;  %vm195_vm10 = vweird.f32 %v187_v4 }
 0x20a   :  { %v184_v5 = vpop.xlane.xlu1 %183 }
 0x20b   :  { %v186_v6 = vmul.f32 %v184_v5, %v2649_v10 }
 0x20d   :  { %v2430_v7 = vpop.eup %2429  ;;  %v188_v8 = vadd.f32 1e-05, %v186_v6 }
 0x20e   :  { %v190_v9 = vmul.f32 %v2430_v7, %v187_v4  ;;  %vm196_vm9 = vweird.f32 %v2430_v7 }
 0x20f   :  { %2431 = vrsqrt.f32 %v188_v8  ;;  %vm197_vm11 = vmor %vm195_vm10, %vm196_vm9  ;;  %vm205_vm13 = vweird.f32 %v188_v8  ;;  %vm127_vm9 = vcmp.eq.s32.totalorder %v98_v58, %v126_v57  ;;  %vm311_vm10 = vcmask 162816  }
 0x210   :  { %v191_v11 = vmul.f32 %v2430_v7, %v190_v9  ;;  %v2734_v0 = vsel %vm127_vm9, 0.0, %v2604_v63 }
 0x212   :  { %v192_v12 = vmul.f32 0.5, %v191_v11 }
 0x214   :  { %v193_v13 = vsub.f32 1.5, %v192_v12 }
 0x215   :  { %v2432_v15 = vpop.eup %2431 }
 0x216   :  { %v194_v16 = vmul.f32 %v2430_v7, %v193_v13  ;;  %v200_v17 = vmul.f32 %v2432_v15, %v188_v8  ;;  %vm206_vm12 = vweird.f32 %v2432_v15 }
 0x217   :  { %vm207_vm14 = vmor %vm205_vm13, %vm206_vm12  ;;  %vm2271_vm12 = vcmp.eq.s32.totalorder %v126_v57, 3  ;;  %vm318_vm13 = vcmask 158720  }
 0x218   :  { %v198_v19 = vsel %vm197_vm11, %v2430_v7, %v194_v16  ;;  %v201_v20 = vmul.f32 %v2432_v15, %v200_v17  ;;  %v2744_v12 = vsel %vm2271_vm12, 0.0, %v2604_v63 }
 0x219   :  { %v209_v21 = vmul.f32 %v198_v19, %v175_v54  ;;  %v2724_v54 = vadd.s32 8, %v2718_v49 }
 0x21a   :  { %v202_v23 = vmul.f32 0.5, %v201_v20 }
 0x21b   :  { %v212_v24 = vmul.f32 %v211_v18, %v209_v21  ;;  %vm104_vm7 = vcmp.ge.s32.totalorder %v2724_v54, 10  ;;  %vm116_vm8 = vcmp.ge.s32.totalorder %v2724_v54, 15 }
 0x21c   :  { %v203_v25 = vsub.f32 1.5, %v202_v23  ;;  %v119_v61 = vsel %vm116_vm8, 1, %v2603_v51 }
 0x21d   :  { %v215_v26 = vadd.f32 %v214_v22, %v212_v24 }
 0x21e   :  { %v204_v27 = vmul.f32 %v2432_v15, %v203_v25 }
 0x21f   :  { %2272 = vmatmul.msk.f32.vlgmr.msra.gmra.mxu0 %vm30_vm0, %v215_v26 }
 0x220   :  { %v208_v28 = vsel %vm207_vm14, %v2432_v15, %v204_v27  ;;  %vm363_vm14 = vcmask 1043456  }
 0x221   :  { %v210_v29 = vmul.f32 %v208_v28, %v176_v59  ;;  %v107_v59 = vsel %vm104_vm7, 1, %v2603_v51 }
 0x222   :  { %v110_v60 = vadd.s32 1, %v107_v59 }
 0x223   :  { %v213_v30 = vmul.f32 %v211_v18, %v210_v29 }
 0x224   :  { %v122_v2 = vadd.s32 %v119_v61, %v110_v60  ;;  %v143_v60 = vld [vmem:[%s3543_s3 + $0x28] sm:$0xff] }
 0x225   :  { %v216_v31 = vadd.f32 %v214_v22, %v213_v30 }
 0x226   :  { %vm128_vm11 = vcmp.eq.s32.totalorder %v122_v2, %v126_v57 }
 0x227   :  { %2273 = vmatmul.msk.f32.gmra.mxu0 %vm30_vm0, %v216_v31  ;;  %v2739_v6 = vsel %vm128_vm11, 0.0, %v2604_v63 }
 0x29c   :  { %v241_v33 = vpop.f32.mrf.mxu0 }
 0x29d   :  { %v2696_v34 = vadd.f32 %v2407_v32, %v241_v33 }
 0x29f   :  { %v250_v35 = vrot.slane %v2696_v34, 6 }
 0x2a1   :  { %253 = vrot.lane.b32.xlu0 %v250_v35, %s2601_s13 }
 0x2a4   :  { %v244_v36 = vpop.f32.mrf.mxu0 }
 0x2a5   :  { %v245_v37 = vadd.f32 %v2407_v32, %v244_v36 }
 0x2a7   :  { %v251_v38 = vrot.slane %v245_v37, 6 }
 0x2a9   :  { %260 = vrot.lane.b32.xlu0 %v2696_v34, %s2602_s14  ;;  %v252_v39 = vsel %vm249_vm15, %v250_v35, %v251_v38 }
 0x2aa   :  { %255 = vrot.lane.b32.xlu2 %v252_v39, %s2601_s13 }
 0x304   :  { %v256_v40 = vpop.permute.xlu2 %255 }
 0x305   :  { %264 = vrot.lane.b32.xlu1 %v256_v40, %s2602_s14 }
 0x313   :  { %v254_v41 = vpop.permute.xlu0 %253 }
 0x314   :  { %v258_v42 = vsel %vm249_vm15, %v245_v37, %v254_v41 }
 0x315   :  { %262 = vrot.lane.b32.xlu2 %v258_v42, %s2602_s14  ;;  %v2377_v16 = vpack.i.bf16 %v2696_v34, %v258_v42 }
 0x31b   :  { %v261_v46 = vpop.permute.xlu0 %260 }
 0x36f   :  { %v263_v45 = vpop.permute.xlu2 %262 }
 0x377   :  { %v265_v43 = vpop.permute.xlu1 %264 }
 0x378   :  { %2274 = vmatpush.xpose.msk.msra.mxu1 %vm266_vm2, %v265_v43 }
 0x37c   :  { %2275 = vmatpush.xpose.msk.msra.mxu1 %vm266_vm2, %v263_v45 }
 0x380   :  { %2276 = vmatpush.xpose.msk.msra.mxu1 %vm266_vm2, %v261_v46  ;;  %v146_v46 = vld [vmem:[%s3543_s3 + $0x40] sm:$0xff] }
 0x381   :  { %424 = vmatpush.msra.mxu3 %v146_v46 }
 0x383   :  { %2277 = vmatmul.msk.f32.vlgmr.msra.gmra.mxu1 %vm266_vm2, %v2696_v34  ;;  %425 = vmatpush.msra.mxu3 %v145_v47 }
 0x385   :  { %426 = vmatpush.msra.mxu3 %v144_v52 }
 0x387   :  { %427 = vmatpush.msra.mxu3 %v143_v60 }
 0x38b   :  { %2278 = vmatmul.msk.f32.gmra.mxu1 %vm266_vm2, %v258_v42 }
 0x393   :  { %2279 = vmatmul.msk.f32.gmra.mxu1 %vm266_vm2, %v256_v40 }
 0x400   :  { %v296_v62 = vpop.f32.mrf.mxu1 }
 0x401   :  { %v305_v1 = vmul.f32 0.25, %v296_v62 }
 0x403   :  { %v308_v3 = vadd.f32 %v305_v1, %v2734_v0 }
 0x405   :  { %v312_v4 = vsel %vm311_vm10, %v308_v3, -inf }
 0x406   :  { %313 = vmax.xlane.f32.xlu2 %v312_v4 }
 0x408   :  { %v299_v5 = vpop.f32.mrf.mxu1 }
 0x409   :  { %v306_v7 = vmul.f32 0.25, %v299_v5 }
 0x40b   :  { %v309_v8 = vadd.f32 %v306_v7, %v2739_v6 }
 0x40d   :  { %v315_v9 = vsel %vm311_vm10, %v309_v8, -inf }
 0x40e   :  { %316 = vmax.xlane.f32.xlu1 %v315_v9 }
 0x410   :  { %v302_v11 = vpop.f32.mrf.mxu1 }
 0x411   :  { %v307_v13 = vmul.f32 0.25, %v302_v11 }
 0x413   :  { %v310_v14 = vadd.f32 %v307_v13, %v2744_v12 }
 0x415   :  { %v319_v15 = vsel %vm318_vm13, %v310_v14, -inf }
 0x416   :  { %320 = vmax.xlane.f32.xlu0 %v319_v15 }
 0x427   :  { %350 = vrot.lane.b32.xlu1 %v256_v40, %s2605_s15 }
 0x42a   :  { %2378 = vrot.lane.b32.xlu0 %v2377_v16, %s2605_s15 }
 0x479   :  { %v314_v17 = vpop.xlane.xlu2 %313 }
 0x47a   :  { %v322_v18 = vsub.f32 %v308_v3, %v314_v17  ;;  %v2408_v3 = vld [vmem:[%s3543_s3 + $0x3] ss:$0 sm:$0xff] }
 0x47c   :  { %v325_v19 = vmul.f32 1.442695, %v322_v18 }
 0x47e   :  { %2433 = vpow2.f32 %v325_v19 }
 0x481   :  { %v317_v20 = vpop.xlane.xlu1 %316 }
 0x482   :  { %v323_v21 = vsub.f32 %v309_v8, %v317_v20 }
 0x484   :  { %v2434_v22 = vpop.eup %2433  ;;  %v327_v23 = vmul.f32 1.442695, %v323_v21 }
 0x485   :  { %v331_v24 = vsel %vm311_vm10, %v2434_v22, 0.0 }
 0x486   :  { %2435 = vpow2.f32 %v327_v23  ;;  %332 = vadd.xlane.f32.xlu2 %v331_v24  ;;  %v150_v23 = vld [vmem:[%s3543_s3 + $0x60] sm:$0xff]  ;;  %v149_v24 = vld [vmem:[%s3543_s3 + $0x58] sm:$0xff] }
 0x487   :  { %509 = vmatpush.msrb.mxu0 %v150_v23 }
 0x489   :  { %v321_v25 = vpop.xlane.xlu0 %320  ;;  %510 = vmatpush.msrb.mxu0 %v149_v24 }
 0x48a   :  { %v324_v26 = vsub.f32 %v310_v14, %v321_v25  ;;  %v148_v25 = vld [vmem:[%s3543_s3 + $0x50] sm:$0xff] }
 0x48b   :  { %511 = vmatpush.msrb.mxu0 %v148_v25 }
 0x48c   :  { %v2436_v27 = vpop.eup %2435  ;;  %v329_v28 = vmul.f32 1.442695, %v324_v26  ;;  %v147_v26 = vld [vmem:[%s3543_s3 + $0x48] sm:$0xff] }
 0x48d   :  { %v334_v29 = vsel %vm311_vm10, %v2436_v27, 0.0  ;;  %512 = vmatpush.msrb.mxu0 %v147_v26 }
 0x48e   :  { %2437 = vpow2.f32 %v329_v28  ;;  %335 = vadd.xlane.f32.xlu2 %v334_v29 }
 0x494   :  { %v2438_v30 = vpop.eup %2437 }
 0x495   :  { %v337_v31 = vsel %vm318_vm13, %v2438_v30, 0.0 }
 0x496   :  { %338 = vadd.xlane.f32.xlu2 %v337_v31 }
 0x499   :  { %v351_v32 = vpop.permute.xlu1 %350 }
 0x49a   :  { %2280 = vmatpush.msk.msra.mxu2 %vm363_vm14, %v351_v32 }
 0x49c   :  { %v2379_v33 = vpop.permute.xlu0 %2378 }
 0x49d   :  { %v2380_v34 = vunpack.i.l.bf16 %v2379_v33  ;;  %v2381_v35 = vunpack.i.h.bf16 %v2379_v33 }
 0x49f   :  { %380 = vmatpush.msra.mxu2 %v2380_v34 }
 0x4a1   :  { %381 = vmatpush.msra.mxu2 %v2381_v35  ;;  %v136_v35 = vld [vmem:[%s3543_s3 + $0x4] sm:$0x3] }
 0x4f9   :  { %v333_v36 = vpop.xlane.xlu2 %332 }
 0x4fa   :  { %2439 = vrcp.f32 %v333_v36 }
 0x500   :  { %v2440_v37 = vpop.eup %2439 }
 0x501   :  { %v336_v38 = vpop.xlane.xlu2 %335  ;;  %v343_v39 = vmul.f32 %v2440_v37, %v2434_v22  ;;  %v484_v37 = vperm.slane %v136_v35, 0 }
 0x502   :  { %2441 = vrcp.f32 %v336_v38 }
 0x503   :  { %2281 = vmatmul.msk.f32.vlgmr.msra.gmra.mxu2 %vm311_vm10, %v343_v39 }
 0x508   :  { %v2442_v40 = vpop.eup %2441 }
 0x509   :  { %v339_v41 = vpop.xlane.xlu2 %338  ;;  %v344_v42 = vmul.f32 %v2442_v40, %v2436_v27 }
 0x50a   :  { %2443 = vrcp.f32 %v339_v41  ;;  %v487_v41 = vperm.slane %v136_v35, 1 }
 0x50b   :  { %2282 = vmatmul.msk.f32.gmra.mxu2 %vm311_vm10, %v344_v42 }
 0x510   :  { %v2444_v43 = vpop.eup %2443 }
 0x511   :  { %v345_v45 = vmul.f32 %v2444_v43, %v2438_v30 }
 0x513   :  { %2283 = vmatmul.msk.f32.gmra.mxu2 %vm311_vm10, %v345_v45 }
 0x586   :  { %v383_v53 = vpop.f32.mrf.mxu2 }
 0x58e   :  { %v386_v55 = vpop.f32.mrf.mxu2 }
 0x58f   :  { %v395_v57 = vrot.slane %v386_v55, 2 }
 0x596   :  { %v389_v56 = vpop.f32.mrf.mxu2 }
 0x597   :  { %v396_v58 = vrot.slane %v389_v56, 2 }
 0x599   :  { %400 = vrot.lane.b32.xlu0 %v396_v58, %s2606_s22  ;;  %v397_v59 = vsel %vm394_vm3, %v395_v57, %v396_v58 }
 0x59a   :  { %398 = vrot.lane.b32.xlu2 %v397_v59, %s2606_s22 }
 0x5f4   :  { %v399_v61 = vpop.permute.xlu2 %398 }
 0x5f5   :  { %v404_v62 = vsel %vm266_vm2, %v383_v53, %v399_v61 }
 0x5f6   :  { %2284 = vmatmul.msk.f32.vlgmr.msra.gmra.mxu3 %vm30_vm0, %v404_v62  ;;  %v166_v62 = vld [vmem:[%s3543_s3 + $0xe0] sm:$0xff] }
 0x5f7   :  { %560 = vmatpush.msrb.mxu2 %v166_v62 }
 0x60b   :  { %v401_v1 = vpop.permute.xlu0 %400 }
 0x60c   :  { %v405_v2 = vsel %vm266_vm2, %v386_v55, %v401_v1  ;;  %v165_v1 = vld [vmem:[%s3543_s3 + $0xd8] sm:$0xff] }
 0x60d   :  { %2285 = vmatmul.msk.f32.gmra.mxu3 %vm30_vm0, %v405_v2  ;;  %561 = vmatpush.msrb.mxu2 %v165_v1  ;;  %v164_v2 = vld [vmem:[%s3543_s3 + $0xd0] sm:$0xff] }
 0x60f   :  { %562 = vmatpush.msrb.mxu2 %v164_v2 }
 0x679   :  { %v429_v4 = vpop.f32.mrf.mxu3 }
 0x67a   :  { %v435_v5 = vadd.f32 %v429_v4, %v2660_v44  ;;  %v162_v4 = vld [vmem:[%s3543_s3 + $0xc0] sm:$0xff] }
 0x67c   :  { %v2781_v7 = vadd.f32 %v2408_v3, %v435_v5  ;;  %v161_v5 = vld [vmem:[%s3543_s3 + $0xb8] sm:$0xff] }
 0x67e   :  { %v440_v8 = vsel %vm30_vm0, %v2781_v7, 0.0 }
 0x67f   :  { %441 = vadd.xlane.f32.xlu1 %v440_v8  ;;  %v160_v8 = vld [vmem:[%s3543_s3 + $0xb0] sm:$0xff] }
 0x690   :  { %v432_v9 = vpop.f32.mrf.mxu3 }
 0x691   :  { %v436_v11 = vadd.f32 %v432_v9, %v2664_v50  ;;  %v159_v9 = vld [vmem:[%s3543_s3 + $0xa8] sm:$0xff] }
 0x693   :  { %v2786_v13 = vadd.f32 %v2408_v3, %v436_v11  ;;  %v163_v3 = vld [vmem:[%s3543_s3 + $0xc8] sm:$0xff]  ;;  %v158_v11 = vld [vmem:[%s3543_s3 + $0xa0] sm:$0xff] }
 0x694   :  { %563 = vmatpush.msrb.mxu2 %v163_v3 }
 0x695   :  { %v443_v14 = vsel %vm34_vm1, %v2786_v13, 0.0 }
 0x696   :  { %444 = vadd.xlane.f32.xlu0 %v443_v14  ;;  %564 = vmatpush.msrb.mxu2 %v162_v4  ;;  %v157_v14 = vld [vmem:[%s3543_s3 + $0x98] sm:$0xff] }
 0x698   :  { %565 = vmatpush.msrb.mxu2 %v161_v5 }
 0x69a   :  { %566 = vmatpush.msrb.mxu2 %v160_v8 }
 0x69c   :  { %567 = vmatpush.msrb.mxu2 %v159_v9 }
 0x69e   :  { %568 = vmatpush.msrb.mxu2 %v158_v11 }
 0x6a0   :  { %569 = vmatpush.msrb.mxu2 %v157_v14 }
 0x6f2   :  { %v442_v15 = vpop.xlane.xlu1 %441 }
 0x6f3   :  { %v446_v16 = vmul.f32 %v442_v15, %v2649_v10  ;;  %v156_v15 = vld [vmem:[%s3543_s3 + $0x90] sm:$0xff] }
 0x6f4   :  { %570 = vmatpush.msrb.mxu2 %v156_v15 }
 0x6f5   :  { %v448_v44 = vsub.f32 %v2781_v7, %v446_v16  ;;  %v155_v16 = vld [vmem:[%s3543_s3 + $0x88] sm:$0xff] }
 0x6f6   :  { %571 = vmatpush.msrb.mxu2 %v155_v16 }
 0x6f7   :  { %v450_v17 = vmul.f32 %v448_v44, %v448_v44 }
 0x6f9   :  { %v452_v18 = vsel %vm30_vm0, %v450_v17, 0.0  ;;  %v2409_v17 = vld [vmem:[%s3543_s3 + $0x6] ss:$0 sm:$0xff] }
 0x6fa   :  { %453 = vadd.xlane.f32.xlu2 %v452_v18  ;;  %v153_v18 = vld [vmem:[%s3543_s3 + $0x78] sm:$0xff] }
 0x709   :  { %v445_v19 = vpop.xlane.xlu0 %444 }
 0x70a   :  { %v447_v20 = vmul.f32 %v445_v19, %v2649_v10  ;;  %v152_v19 = vld [vmem:[%s3543_s3 + $0x70] sm:$0xff] }
 0x70c   :  { %v449_v50 = vsub.f32 %v2786_v13, %v447_v20 }
 0x70e   :  { %v451_v21 = vmul.f32 %v449_v50, %v449_v50 }
 0x710   :  { %v455_v22 = vsel %vm34_vm1, %v451_v21, 0.0  ;;  %v151_v21 = vld [vmem:[%s3543_s3 + $0x68] sm:$0xff] }
 0x711   :  { %456 = vadd.xlane.f32.xlu1 %v455_v22 }
 0x76d   :  { %v454_v27 = vpop.xlane.xlu2 %453 }
 0x76e   :  { %v458_v28 = vmul.f32 %v454_v27, %v2649_v10 }
 0x770   :  { %v460_v29 = vadd.f32 1e-05, %v458_v28 }
 0x772   :  { %2445 = vrsqrt.f32 %v460_v29  ;;  %vm468_vm5 = vweird.f32 %v460_v29 }
 0x778   :  { %v2446_v30 = vpop.eup %2445 }
 0x779   :  { %v463_v31 = vmul.f32 %v2446_v30, %v460_v29  ;;  %vm469_vm4 = vweird.f32 %v2446_v30 }
 0x77a   :  { %vm470_vm6 = vmor %vm468_vm5, %vm469_vm4 }
 0x77b   :  { %v464_v32 = vmul.f32 %v2446_v30, %v463_v31 }
 0x77d   :  { %v465_v33 = vmul.f32 0.5, %v464_v32 }
 0x77f   :  { %v466_v34 = vsub.f32 1.5, %v465_v33 }
 0x781   :  { %v467_v36 = vmul.f32 %v2446_v30, %v466_v34 }
 0x783   :  { %v471_v38 = vsel %vm470_vm6, %v2446_v30, %v467_v36 }
 0x784   :  { %v482_v39 = vmul.f32 %v471_v38, %v448_v44  ;;  %v457_v40 = vpop.xlane.xlu1 %456  ;;  %v154_v44 = vld [vmem:[%s3543_s3 + $0x80] sm:$0xff] }
 0x785   :  { %v459_v42 = vmul.f32 %v457_v40, %v2649_v10  ;;  %572 = vmatpush.msrb.mxu2 %v154_v44 }
 0x786   :  { %v485_v43 = vmul.f32 %v484_v37, %v482_v39 }
 0x787   :  { %v461_v45 = vadd.f32 1e-05, %v459_v42  ;;  %573 = vmatpush.msrb.mxu2 %v153_v18 }
 0x788   :  { %v488_v46 = vadd.f32 %v487_v41, %v485_v43 }
 0x789   :  { %2447 = vrsqrt.f32 %v461_v45  ;;  %vm478_vm8 = vweird.f32 %v461_v45  ;;  %574 = vmatpush.msrb.mxu2 %v152_v19  ;;  %v597_v19 = vld [vmem:[%s3543_s3 + $0x108] sm:$0xff] }
 0x78a   :  { %2286 = vmatmul.msk.f32.vlgmr.msrb.gmra.mxu0 %vm30_vm0, %v488_v46  ;;  %691 = vmatpush.msrb.mxu3 %v597_v19 }
 0x78b   :  { %575 = vmatpush.msrb.mxu2 %v151_v21  ;;  %v594_v21 = vld [vmem:[%s3543_s3 + $0xf0] sm:$0xff] }
 0x78f   :  { %v2448_v47 = vpop.eup %2447 }
 0x790   :  { %v473_v52 = vmul.f32 %v2448_v47, %v461_v45  ;;  %vm479_vm7 = vweird.f32 %v2448_v47 }
 0x791   :  { %vm480_vm9 = vmor %vm478_vm8, %vm479_vm7 }
 0x792   :  { %v474_v53 = vmul.f32 %v2448_v47, %v473_v52 }
 0x794   :  { %v475_v55 = vmul.f32 0.5, %v474_v53 }
 0x796   :  { %v476_v56 = vsub.f32 1.5, %v475_v55 }
 0x798   :  { %v477_v57 = vmul.f32 %v2448_v47, %v476_v56 }
 0x79a   :  { %v481_v58 = vsel %vm480_vm9, %v2448_v47, %v477_v57 }
 0x79b   :  { %v483_v59 = vmul.f32 %v481_v58, %v449_v50 }
 0x79d   :  { %v486_v60 = vmul.f32 %v484_v37, %v483_v59 }
 0x79f   :  { %v489_v61 = vadd.f32 %v487_v41, %v486_v60  ;;  %v2410_v60 = vld [vmem:[%s3543_s3 + $0x7] ss:$0 sm:$0xff] }
 0x7a1   :  { %2287 = vmatmul.msk.f32.gmra.mxu0 %vm30_vm0, %v489_v61 }
 0x807   :  { %v514_v20 = vpop.f32.mrf.mxu0 }
 0x808   :  { %v515_v50 = vadd.f32 %v2409_v17, %v514_v20  ;;  %v596_v20 = vld [vmem:[%s3543_s3 + $0x100] sm:$0xff] }
 0x809   :  { %692 = vmatpush.msrb.mxu3 %v596_v20 }
 0x80a   :  { %v520_v22 = vmul.f32 -1.702, %v515_v50 }
 0x80c   :  { %v522_v23 = vmul.f32 1.442695, %v520_v22 }
 0x80e   :  { %2449 = vpow2.f32 %v522_v23 }
 0x814   :  { %v2450_v24 = vpop.eup %2449 }
 0x815   :  { %v526_v25 = vadd.f32 1.0, %v2450_v24 }
 0x817   :  { %2451 = vrcp.f32 %v526_v25  ;;  %v539_v31 = vand.u32 2147483648, %v526_v25  ;;  %v537_v34 = vand.u32 2147483647, %v526_v25  ;;  %vm533_vm12 = vweird.f32 %v526_v25 }
 0x819   :  { %v540_v37 = vor.u32 1.1754944e-38, %v539_v31  ;;  %vm538_vm5 = vcmp.eq.f32.partialorder %v537_v34, 8.507059e+37 }
 0x81d   :  { %v2452_v26 = vpop.eup %2451 }
 0x81e   :  { %v529_v27 = vmul.f32 %v2452_v26, %v526_v25  ;;  %v517_v28 = vpop.f32.mrf.mxu0  ;;  %vm534_vm11 = vweird.f32 %v2452_v26 }
 0x81f   :  { %v518_v29 = vadd.f32 %v2409_v17, %v517_v28  ;;  %vm535_vm4 = vmor %vm533_vm12, %vm534_vm11 }
 0x820   :  { %v530_v30 = vsub.f32 1.0, %v529_v27 }
 0x821   :  { %v521_v32 = vmul.f32 -1.702, %v518_v29 }
 0x822   :  { %v531_v33 = vmul.f32 %v2452_v26, %v530_v30  ;;  %v588_v30 = vld [vmem:[%s3543_s3 + $0xe8] sm:$0x3] }
 0x823   :  { %v524_v35 = vmul.f32 1.442695, %v521_v32  ;;  %v666_v32 = vperm.slane %v588_v30, 0 }
 0x824   :  { %v532_v36 = vadd.f32 %v2452_v26, %v531_v33 }
 0x825   :  { %2453 = vpow2.f32 %v524_v35 }
 0x826   :  { %v536_v38 = vsel %vm535_vm4, %v2452_v26, %v532_v36  ;;  %v669_v36 = vperm.slane %v588_v30, 1 }
 0x827   :  { %v541_v39 = vsel %vm538_vm5, %v540_v37, %v536_v38 }
 0x828   :  { %v558_v40 = vmul.f32 %v541_v39, %v515_v50  ;;  %v595_v50 = vld [vmem:[%s3543_s3 + $0xf8] sm:$0xff] }
 0x829   :  { %693 = vmatpush.msrb.mxu3 %v595_v50 }
 0x82a   :  { %576 = vmatmul.f32.vlgmr.msrb.gmra.mxu2 %v558_v40 }
 0x82b   :  { %v2454_v41 = vpop.eup %2453  ;;  %694 = vmatpush.msrb.mxu3 %v594_v21 }
 0x82c   :  { %v527_v42 = vadd.f32 1.0, %v2454_v41 }
 0x82e   :  { %2455 = vrcp.f32 %v527_v42  ;;  %v554_v47 = vand.u32 2147483648, %v527_v42  ;;  %v552_v53 = vand.u32 2147483647, %v527_v42  ;;  %vm548_vm7 = vweird.f32 %v527_v42 }
 0x830   :  { %v555_v56 = vor.u32 1.1754944e-38, %v554_v47  ;;  %vm553_vm9 = vcmp.eq.f32.partialorder %v552_v53, 8.507059e+37 }
 0x834   :  { %v2456_v43 = vpop.eup %2455 }
 0x835   :  { %v544_v45 = vmul.f32 %v2456_v43, %v527_v42  ;;  %vm549_vm6 = vweird.f32 %v2456_v43 }
 0x836   :  { %vm550_vm8 = vmor %vm548_vm7, %vm549_vm6 }
 0x837   :  { %v545_v46 = vsub.f32 1.0, %v544_v45 }
 0x839   :  { %v546_v52 = vmul.f32 %v2456_v43, %v545_v46 }
 0x83b   :  { %v547_v55 = vadd.f32 %v2456_v43, %v546_v52 }
 0x83d   :  { %v551_v57 = vsel %vm550_vm8, %v2456_v43, %v547_v55 }
 0x83e   :  { %v556_v58 = vsel %vm553_vm9, %v555_v56, %v551_v57  ;;  %v2411_v57 = vld [vmem:[%s3543_s3 + $0xea] ss:$0 sm:$0xff] }
 0x83f   :  { %v559_v59 = vmul.f32 %v556_v58, %v518_v29 }
 0x841   :  { %579 = vmatmul.f32.gmra.mxu2 %v559_v59 }
 0x8ad   :  { %v577_v61 = vpop.f32.mrf.mxu2 }
 0x8ae   :  { %v583_v62 = vadd.f32 %v577_v61, %v2781_v7 }
 0x8b0   :  { %v2870_v1 = vadd.f32 %v2410_v60, %v583_v62 }
 0x8b2   :  { %v622_v2 = vsel %vm30_vm0, %v2870_v1, 0.0 }
 0x8b3   :  { %623 = vadd.xlane.f32.xlu0 %v622_v2 }
 0x8c4   :  { %v580_v3 = vpop.f32.mrf.mxu2 }
 0x8c5   :  { %v584_v4 = vadd.f32 %v580_v3, %v2786_v13 }
 0x8c7   :  { %v2875_v5 = vadd.f32 %v2410_v60, %v584_v4 }
 0x8c9   :  { %v625_v8 = vsel %vm34_vm1, %v2875_v5, 0.0 }
 0x8ca   :  { %626 = vadd.xlane.f32.xlu1 %v625_v8 }
 0x926   :  { %v624_v9 = vpop.xlane.xlu0 %623 }
 0x927   :  { %v628_v11 = vmul.f32 %v624_v9, %v2649_v10 }
 0x929   :  { %v630_v7 = vsub.f32 %v2870_v1, %v628_v11 }
 0x92b   :  { %v632_v14 = vmul.f32 %v630_v7, %v630_v7 }
 0x92d   :  { %v634_v15 = vsel %vm30_vm0, %v632_v14, 0.0 }
 0x92e   :  { %635 = vadd.xlane.f32.xlu0 %v634_v15 }
 0x93d   :  { %v627_v16 = vpop.xlane.xlu1 %626 }
 0x93e   :  { %v629_v44 = vmul.f32 %v627_v16, %v2649_v10 }
 0x940   :  { %v631_v13 = vsub.f32 %v2875_v5, %v629_v44 }
 0x942   :  { %v633_v17 = vmul.f32 %v631_v13, %v631_v13 }
 0x944   :  { %v637_v18 = vsel %vm34_vm1, %v633_v17, 0.0 }
 0x945   :  { %638 = vadd.xlane.f32.xlu1 %v637_v18 }
 0x9a1   :  { %v636_v22 = vpop.xlane.xlu0 %635 }
 0x9a2   :  { %v640_v23 = vmul.f32 %v636_v22, %v2649_v10 }
 0x9a4   :  { %v642_v24 = vadd.f32 1e-05, %v640_v23 }
 0x9a6   :  { %2457 = vrsqrt.f32 %v642_v24  ;;  %vm650_vm12 = vweird.f32 %v642_v24 }
 0x9ac   :  { %v2458_v25 = vpop.eup %2457 }
 0x9ad   :  { %v645_v26 = vmul.f32 %v2458_v25, %v642_v24  ;;  %vm651_vm11 = vweird.f32 %v2458_v25 }
 0x9ae   :  { %vm652_vm4 = vmor %vm650_vm12, %vm651_vm11 }
 0x9af   :  { %v646_v27 = vmul.f32 %v2458_v25, %v645_v26 }
 0x9b1   :  { %v647_v28 = vmul.f32 0.5, %v646_v27 }
 0x9b3   :  { %v648_v29 = vsub.f32 1.5, %v647_v28 }
 0x9b5   :  { %v649_v31 = vmul.f32 %v2458_v25, %v648_v29 }
 0x9b7   :  { %v653_v33 = vsel %vm652_vm4, %v2458_v25, %v649_v31 }
 0x9b8   :  { %v664_v34 = vmul.f32 %v653_v33, %v630_v7  ;;  %v639_v35 = vpop.xlane.xlu1 %638 }
 0x9b9   :  { %v641_v37 = vmul.f32 %v639_v35, %v2649_v10 }
 0x9ba   :  { %v667_v38 = vmul.f32 %v666_v32, %v664_v34 }
 0x9bb   :  { %v643_v39 = vadd.f32 1e-05, %v641_v37 }
 0x9bc   :  { %v670_v40 = vadd.f32 %v669_v36, %v667_v38 }
 0x9bd   :  { %2459 = vrsqrt.f32 %v643_v39  ;;  %vm660_vm6 = vweird.f32 %v643_v39 }
 0x9be   :  { %2288 = vmatmul.msk.f32.vlgmr.msrb.gmra.mxu3 %vm30_vm0, %v670_v40 }
 0x9c3   :  { %v2460_v41 = vpop.eup %2459 }
 0x9c4   :  { %v655_v42 = vmul.f32 %v2460_v41, %v643_v39  ;;  %vm661_vm5 = vweird.f32 %v2460_v41 }
 0x9c5   :  { %vm662_vm7 = vmor %vm660_vm6, %vm661_vm5 }
 0x9c6   :  { %v656_v43 = vmul.f32 %v2460_v41, %v655_v42 }
 0x9c8   :  { %v657_v45 = vmul.f32 0.5, %v656_v43 }
 0x9ca   :  { %v658_v46 = vsub.f32 1.5, %v657_v45 }
 0x9cc   :  { %v659_v47 = vmul.f32 %v2460_v41, %v658_v46 }
 0x9ce   :  { %v663_v52 = vsel %vm662_vm7, %v2460_v41, %v659_v47 }
 0x9cf   :  { %v665_v53 = vmul.f32 %v663_v52, %v631_v13 }
 0x9d1   :  { %v668_v55 = vmul.f32 %v666_v32, %v665_v53 }
 0x9d3   :  { %v671_v56 = vadd.f32 %v669_v36, %v668_v55 }
 0x9d5   :  { %2289 = vmatmul.msk.f32.gmra.mxu3 %vm30_vm0, %v671_v56  ;;  %v2938_v56 = vld [vmem:[%s3542_s2] sm:$0xff] }
 0xa41   :  { %v696_v58 = vpop.f32.mrf.mxu3 }
 0xa42   :  { %v697_v59 = vadd.f32 %v2411_v57, %v696_v58 }
 0xa44   :  { %v704_v60 = vrot.slane %v697_v59, 6 }
 0xa46   :  { %707 = vrot.lane.b32.xlu0 %v704_v60, %s2601_s13 }
 0xa58   :  { %v699_v61 = vpop.f32.mrf.mxu3 }
 0xa59   :  { %v700_v62 = vadd.f32 %v2411_v57, %v699_v61  ;;  %v1196_v57 = vsel %vm30_vm0, %v2938_v56, 0.0 }
 0xa5b   :  { %v705_v2 = vrot.slane %v700_v62, 6 }
 0xa5d   :  { %v706_v3 = vsel %vm249_vm15, %v704_v60, %v705_v2 }
 0xa5e   :  { %709 = vrot.lane.b32.xlu2 %v706_v3, %s2601_s13  ;;  %v601_v3 = vld [vmem:[%s3543_s3 + $0x128] sm:$0xff] }
 0xa5f   :  { %873 = vmatpush.msra.mxu3 %v601_v3 }
 0xa66   :  { %714 = vrot.lane.b32.xlu2 %v697_v59, %s2602_s14 }
 0xab8   :  { %v708_v4 = vpop.permute.xlu0 %707  ;;  %v710_v8 = vpop.permute.xlu2 %709 }
 0xab9   :  { %718 = vrot.lane.b32.xlu1 %v710_v8, %s2602_s14  ;;  %v712_v9 = vsel %vm249_vm15, %v700_v62, %v708_v4  ;;  %v600_v4 = vld [vmem:[%s3543_s3 + $0x120] sm:$0xff] }
 0xaba   :  { %716 = vrot.lane.b32.xlu0 %v712_v9, %s2602_s14  ;;  %874 = vmatpush.msra.mxu3 %v600_v4 }
 0xac0   :  { %v715_v14 = vpop.permute.xlu2 %714 }
 0xb2b   :  { %v719_v11 = vpop.permute.xlu1 %718 }
 0xb2c   :  { %2290 = vmatpush.xpose.msk.msrb.mxu1 %vm266_vm2, %v719_v11  ;;  %v717_v7 = vpop.permute.xlu0 %716 }
 0xb30   :  { %2291 = vmatpush.xpose.msk.msrb.mxu1 %vm266_vm2, %v717_v7 }
 0xb34   :  { %2292 = vmatpush.xpose.msk.msrb.mxu1 %vm266_vm2, %v715_v14 }
 0xb37   :  { %2293 = vmatmul.msk.f32.vlgmr.msrb.gmra.mxu1 %vm266_vm2, %v697_v59 }
 0xb3f   :  { %2294 = vmatmul.msk.f32.gmra.mxu1 %vm266_vm2, %v712_v9 }
 0xb47   :  { %2295 = vmatmul.msk.f32.gmra.mxu1 %vm266_vm2, %v710_v8 }
 0xbb4   :  { %v749_v15 = vpop.f32.mrf.mxu1 }
 0xbb5   :  { %v758_v16 = vmul.f32 0.25, %v749_v15 }
 0xbb7   :  { %v761_v44 = vadd.f32 %v758_v16, %v2734_v0  ;;  %v2382_v0 = vpack.i.bf16 %v697_v59, %v712_v9  ;;  %v598_v16 = vld [vmem:[%s3543_s3 + $0x110] sm:$0xff] }
 0xbb9   :  { %v764_v13 = vsel %vm311_vm10, %v761_v44, -inf }
 0xbba   :  { %765 = vmax.xlane.f32.xlu1 %v764_v13 }
 0xbbc   :  { %v752_v17 = vpop.f32.mrf.mxu1 }
 0xbbd   :  { %v759_v18 = vmul.f32 0.25, %v752_v17 }
 0xbbf   :  { %v762_v19 = vadd.f32 %v759_v18, %v2739_v6 }
 0xbc1   :  { %v767_v20 = vsel %vm311_vm10, %v762_v19, -inf }
 0xbc2   :  { %768 = vmax.xlane.f32.xlu0 %v767_v20 }
 0xbc4   :  { %v755_v50 = vpop.f32.mrf.mxu1 }
 0xbc5   :  { %v760_v21 = vmul.f32 0.25, %v755_v50 }
 0xbc7   :  { %v763_v22 = vadd.f32 %v760_v21, %v2744_v12 }
 0xbc9   :  { %v770_v23 = vsel %vm318_vm13, %v763_v22, -inf }
 0xbca   :  { %771 = vmax.xlane.f32.xlu2 %v770_v23 }
 0xbd6   :  { %801 = vrot.lane.b32.xlu0 %v710_v8, %s2605_s15  ;;  %v599_v8 = vld [vmem:[%s3543_s3 + $0x118] sm:$0xff] }
 0xbd7   :  { %875 = vmatpush.msra.mxu3 %v599_v8 }
 0xbd9   :  { %876 = vmatpush.msra.mxu3 %v598_v16 }
 0xbe2   :  { %2383 = vrot.lane.b32.xlu2 %v2382_v0, %s2605_s15 }
 0xc2d   :  { %v766_v24 = vpop.xlane.xlu1 %765 }
 0xc2e   :  { %v773_v25 = vsub.f32 %v761_v44, %v766_v24  ;;  %v2963_v44 = vld [vmem:[%s3542_s2 + $0x8] sm:$0xff] }
 0xc2f   :  { %v1199_v13 = vsel %vm30_vm0, %v2963_v44, 0.0 }
 0xc30   :  { %v776_v26 = vmul.f32 1.442695, %v773_v25  ;;  %1200 = vadd.xlane.f32.xlu2 %v1199_v13 }
 0xc32   :  { %2461 = vpow2.f32 %v776_v26  ;;  %v2975_v26 = vld [vmem:[%s3544_s4] sm:$0x3] }
 0xc35   :  { %v769_v6 = vpop.xlane.xlu0 %768 }
 0xc36   :  { %v774_v27 = vsub.f32 %v762_v19, %v769_v6 }
 0xc38   :  { %v2462_v28 = vpop.eup %2461  ;;  %v778_v29 = vmul.f32 1.442695, %v774_v27 }
 0xc39   :  { %v782_v30 = vsel %vm311_vm10, %v2462_v28, 0.0 }
 0xc3a   :  { %2463 = vpow2.f32 %v778_v29  ;;  %783 = vadd.xlane.f32.xlu1 %v782_v30  ;;  %v1171_v29 = vld [vmem:[%s3544_s4 + $0x20] sm:$0xff] }
 0xc3d   :  { %v772_v12 = vpop.xlane.xlu2 %771 }
 0xc3e   :  { %v775_v31 = vsub.f32 %v763_v22, %v772_v12 }
 0xc40   :  { %v2464_v32 = vpop.eup %2463  ;;  %v780_v33 = vmul.f32 1.442695, %v775_v31  ;;  %v1170_v31 = vld [vmem:[%s3544_s4 + $0x18] sm:$0xff] }
 0xc41   :  { %v785_v34 = vsel %vm311_vm10, %v2464_v32, 0.0 }
 0xc42   :  { %2465 = vpow2.f32 %v780_v33  ;;  %786 = vadd.xlane.f32.xlu1 %v785_v34  ;;  %v1243_v34 = vperm.slane %v2975_v26, 1 }
 0xc45   :  { %v2384_v35 = vpop.permute.xlu2 %2383 }
 0xc46   :  { %v2385_v38 = vunpack.i.l.bf16 %v2384_v35  ;;  %v2386_v40 = vunpack.i.h.bf16 %v2384_v35  ;;  %v1168_v35 = vld [vmem:[%s3544_s4 + $0x8] sm:$0xff] }
 0xc48   :  { %v2466_v36 = vpop.eup %2465  ;;  %v802_v37 = vpop.permute.xlu0 %801 }
 0xc49   :  { %2296 = vmatpush.msk.msra.mxu0 %vm363_vm14, %v802_v37  ;;  %v788_v39 = vsel %vm318_vm13, %v2466_v36, 0.0 }
 0xc4a   :  { %789 = vadd.xlane.f32.xlu1 %v788_v39 }
 0xc4b   :  { %830 = vmatpush.msra.mxu0 %v2385_v38  ;;  %v2412_v38 = vld [vmem:[%s3543_s3 + $0xeb] ss:$0 sm:$0xff] }
 0xc4d   :  { %831 = vmatpush.msra.mxu0 %v2386_v40 }
 0xc4f   :  { %1265 = vmatpush.msrb.mxu0 %v1171_v29 }
 0xc51   :  { %1266 = vmatpush.msrb.mxu0 %v1170_v31 }
 0xc52   :  { %1197 = vadd.xlane.f32.xlu1 %v1196_v57 }
 0xca3   :  { %v1201_v37 = vpop.xlane.xlu2 %1200 }
 0xca4   :  { %v1203_v39 = vmul.f32 %v1201_v37, %v2649_v10 }
 0xcad   :  { %v784_v41 = vpop.xlane.xlu1 %783 }
 0xcae   :  { %2467 = vrcp.f32 %v784_v41 }
 0xcb4   :  { %v2468_v42 = vpop.eup %2467 }
 0xcb5   :  { %v794_v43 = vmul.f32 %v2468_v42, %v2462_v28  ;;  %v787_v45 = vpop.xlane.xlu1 %786  ;;  %v1240_v28 = vperm.slane %v2975_v26, 0 }
 0xcb6   :  { %2469 = vrcp.f32 %v787_v45 }
 0xcb7   :  { %2297 = vmatmul.msk.f32.vlgmr.msra.gmra.mxu0 %vm311_vm10, %v794_v43  ;;  %v1205_v43 = vsub.f32 %v2963_v44, %v1203_v39 }
 0xcbc   :  { %v2470_v46 = vpop.eup %2469 }
 0xcbd   :  { %v790_v47 = vpop.xlane.xlu1 %789  ;;  %v795_v52 = vmul.f32 %v2470_v46, %v2464_v32  ;;  %v1169_v32 = vld [vmem:[%s3544_s4 + $0x10] sm:$0xff]  ;;  %v1207_v46 = vmul.f32 %v1205_v43, %v1205_v43 }
 0xcbe   :  { %2471 = vrcp.f32 %v790_v47  ;;  %1267 = vmatpush.msrb.mxu0 %v1169_v32  ;;  %v3042_v32 = vld [vmem:[%s3543_s3 + $0xec] sm:$0x3] }
 0xcbf   :  { %2298 = vmatmul.msk.f32.gmra.mxu0 %vm311_vm10, %v795_v52  ;;  %v1211_v47 = vsel %vm30_vm0, %v1207_v46, 0.0  ;;  %v3006_v52 = vld [vmem:[%s3544_s4 + $0x2] ss:$0 sm:$0xff] }
 0xcc0   :  { %1268 = vmatpush.msrb.mxu0 %v1168_v35  ;;  %v933_v35 = vperm.slane %v3042_v32, 0 }
 0xcc4   :  { %v2472_v53 = vpop.eup %2471 }
 0xcc5   :  { %v796_v55 = vmul.f32 %v2472_v53, %v2466_v36  ;;  %v1198_v9 = vpop.xlane.xlu1 %1197 }
 0xcc6   :  { %v1202_v11 = vmul.f32 %v1198_v9, %v2649_v10 }
 0xcc7   :  { %2299 = vmatmul.msk.f32.gmra.mxu0 %vm311_vm10, %v796_v55 }
 0xcc8   :  { %v1204_v7 = vsub.f32 %v2938_v56, %v1202_v11 }
 0xcca   :  { %v1206_v14 = vmul.f32 %v1204_v7, %v1204_v7 }
 0xccc   :  { %v1208_v15 = vsel %vm30_vm0, %v1206_v14, 0.0 }
 0xd34   :  { %v833_v58 = vpop.f32.mrf.mxu0 }
 0xd3c   :  { %v836_v59 = vpop.f32.mrf.mxu0 }
 0xd3d   :  { %v844_v61 = vrot.slane %v836_v59, 2 }
 0xd44   :  { %v839_v60 = vpop.f32.mrf.mxu0 }
 0xd45   :  { %v845_v62 = vrot.slane %v839_v60, 2 }
 0xd47   :  { %v846_v2 = vsel %vm394_vm3, %v844_v61, %v845_v62 }
 0xd48   :  { %847 = vrot.lane.b32.xlu0 %v846_v2, %s2606_s22 }
 0xd50   :  { %849 = vrot.lane.b32.xlu0 %v845_v62, %s2606_s22 }
 0xd7a   :  { %1209 = vadd.xlane.f32.xlu0 %v1208_v15 }
 0xdba   :  { %v848_v17 = vpop.permute.xlu0 %847 }
 0xdbb   :  { %v853_v18 = vsel %vm266_vm2, %v833_v58, %v848_v17 }
 0xdbc   :  { %2300 = vmatmul.msk.f32.vlgmr.msra.gmra.mxu3 %vm30_vm0, %v853_v18 }
 0xdc2   :  { %v850_v19 = vpop.permute.xlu0 %849 }
 0xdc3   :  { %v854_v20 = vsel %vm266_vm2, %v836_v59, %v850_v19 }
 0xdc4   :  { %2301 = vmatmul.msk.f32.gmra.mxu3 %vm30_vm0, %v854_v20  ;;  %v605_v20 = vld [vmem:[%s3543_s3 + $0x148] sm:$0xff] }
 0xdc5   :  { %958 = vmatpush.msra.mxu2 %v605_v20  ;;  %v2414_v20 = vld [vmem:[%s3543_s3 + $0xee] ss:$0 sm:$0xff] }
 0xded   :  { %v1210_v50 = vpop.xlane.xlu0 %1209 }
 0xdee   :  { %v1214_v21 = vmul.f32 %v1210_v50, %v2649_v10  ;;  %v604_v50 = vld [vmem:[%s3543_s3 + $0x140] sm:$0xff] }
 0xdef   :  { %959 = vmatpush.msra.mxu2 %v604_v50  ;;  %v608_v50 = vld [vmem:[%s3543_s3 + $0x160] sm:$0xff] }
 0xdf0   :  { %v1216_v22 = vadd.f32 1e-05, %v1214_v21  ;;  %v603_v21 = vld [vmem:[%s3543_s3 + $0x138] sm:$0xff] }
 0xdf1   :  { %960 = vmatpush.msra.mxu2 %v603_v21 }
 0xdf2   :  { %2473 = vrsqrt.f32 %v1216_v22  ;;  %vm1224_vm15 = vweird.f32 %v1216_v22 }
 0xdf8   :  { %v2474_v23 = vpop.eup %2473 }
 0xdf9   :  { %v1219_v0 = vmul.f32 %v2474_v23, %v1216_v22  ;;  %vm1225_vm10 = vweird.f32 %v2474_v23  ;;  %v602_v22 = vld [vmem:[%s3543_s3 + $0x130] sm:$0xff] }
 0xdfa   :  { %vm1226_vm13 = vmor %vm1224_vm15, %vm1225_vm10  ;;  %961 = vmatpush.msra.mxu2 %v602_v22  ;;  %v607_v22 = vld [vmem:[%s3543_s3 + $0x158] sm:$0xff] }
 0xdfb   :  { %v1220_v24 = vmul.f32 %v2474_v23, %v1219_v0 }
 0xdfd   :  { %v1221_v25 = vmul.f32 0.5, %v1220_v24 }
 0xdff   :  { %v1222_v6 = vsub.f32 1.5, %v1221_v25 }
 0xe01   :  { %v1223_v27 = vmul.f32 %v2474_v23, %v1222_v6 }
 0xe03   :  { %v1227_v30 = vsel %vm1226_vm13, %v2474_v23, %v1223_v27 }
 0xe04   :  { %v1238_v12 = vmul.f32 %v1227_v30, %v1204_v7 }
 0xe06   :  { %v1241_v33 = vmul.f32 %v1240_v28, %v1238_v12 }
 0xe08   :  { %v1244_v36 = vadd.f32 %v1243_v34, %v1241_v33 }
 0xe0a   :  { %2312 = vmatmul.msk.f32.vlgmr.msrb.gmra.mxu0 %vm30_vm0, %v1244_v36 }
 0xe3f   :  { %v878_v40 = vpop.f32.mrf.mxu3 }
 0xe40   :  { %v884_v41 = vadd.f32 %v878_v40, %v2870_v1 }
 0xe42   :  { %v2997_v42 = vadd.f32 %v2412_v38, %v884_v41 }
 0xe44   :  { %v889_v45 = vsel %vm30_vm0, %v2997_v42, 0.0 }
 0xe45   :  { %890 = vadd.xlane.f32.xlu1 %v889_v45 }
 0xe47   :  { %v881_v59 = vpop.f32.mrf.mxu3 }
 0xe48   :  { %v885_v61 = vadd.f32 %v881_v59, %v2875_v5  ;;  %v617_v59 = vld [vmem:[%s3543_s3 + $0x1a8] sm:$0xff] }
 0xe4a   :  { %v888_v8 = vadd.f32 %v2412_v38, %v885_v61  ;;  %v936_v38 = vperm.slane %v3042_v32, 1 }
 0xe4c   :  { %v892_v9 = vsel %vm34_vm1, %v888_v8, 0.0 }
 0xe4d   :  { %1212 = vadd.xlane.f32.xlu1 %v1211_v47  ;;  %v621_v47 = vld [vmem:[%s3543_s3 + $0x1c8] sm:$0xff] }
 0xe4e   :  { %1009 = vmatpush.msra.mxu1 %v621_v47 }
 0xe87   :  { %v1270_v53 = vpop.f32.mrf.mxu0 }
 0xe88   :  { %v3009_v1 = vadd.f32 %v3006_v52, %v1270_v53  ;;  %v620_v53 = vld [vmem:[%s3543_s3 + $0x1c0] sm:$0xff] }
 0xe89   :  { %1010 = vmatpush.msra.mxu1 %v620_v53 }
 0xe8a   :  { %1278 = vrot.lane.b32.xlu2 %v3009_v1, %s2601_s13 }
 0xeb8   :  { %v891_v55 = vpop.xlane.xlu1 %890 }
 0xeb9   :  { %v895_v57 = vmul.f32 %v891_v55, %v2649_v10 }
 0xebb   :  { %v897_v58 = vsub.f32 %v2997_v42, %v895_v57  ;;  %v619_v57 = vld [vmem:[%s3543_s3 + $0x1b8] sm:$0xff] }
 0xebc   :  { %1011 = vmatpush.msra.mxu1 %v619_v57 }
 0xebd   :  { %v899_v60 = vmul.f32 %v897_v58, %v897_v58 }
 0xebf   :  { %v901_v62 = vsel %vm30_vm0, %v899_v60, 0.0  ;;  %v616_v60 = vld [vmem:[%s3543_s3 + $0x1a0] sm:$0xff] }
 0xec0   :  { %902 = vadd.xlane.f32.xlu1 %v901_v62  ;;  %v1213_v2 = vpop.xlane.xlu1 %1212 }
 0xec1   :  { %v1215_v3 = vmul.f32 %v1213_v2, %v2649_v10  ;;  %v615_v2 = vld [vmem:[%s3543_s3 + $0x198] sm:$0xff] }
 0xec3   :  { %v1217_v4 = vadd.f32 1e-05, %v1215_v3 }
 0xec5   :  { %2475 = vrsqrt.f32 %v1217_v4  ;;  %vm1234_vm3 = vweird.f32 %v1217_v4 }
 0xec8   :  { %893 = vadd.xlane.f32.xlu1 %v892_v9  ;;  %v613_v9 = vld [vmem:[%s3543_s3 + $0x188] sm:$0xff] }
 0xecb   :  { %v2476_v11 = vpop.eup %2475 }
 0xecc   :  { %v1229_v7 = vmul.f32 %v2476_v11, %v1217_v4  ;;  %vm1235_vm14 = vweird.f32 %v2476_v11  ;;  %v614_v4 = vld [vmem:[%s3543_s3 + $0x190] sm:$0xff] }
 0xecd   :  { %vm1236_vm8 = vmor %vm1234_vm3, %vm1235_vm14 }
 0xece   :  { %v1230_v14 = vmul.f32 %v2476_v11, %v1229_v7  ;;  %v612_v7 = vld [vmem:[%s3543_s3 + $0x180] sm:$0xff] }
 0xed0   :  { %v1231_v15 = vmul.f32 0.5, %v1230_v14 }
 0xed2   :  { %v1232_v16 = vsub.f32 1.5, %v1231_v15  ;;  %v611_v15 = vld [vmem:[%s3543_s3 + $0x178] sm:$0xff] }
 0xed4   :  { %v1233_v13 = vmul.f32 %v2476_v11, %v1232_v16 }
 0xed6   :  { %v1237_v5 = vsel %vm1236_vm8, %v2476_v11, %v1233_v13  ;;  %v610_v13 = vld [vmem:[%s3543_s3 + $0x170] sm:$0xff] }
 0xed7   :  { %v1239_v17 = vmul.f32 %v1237_v5, %v1205_v43 }
 0xed9   :  { %v1242_v18 = vmul.f32 %v1240_v28, %v1239_v17  ;;  %v609_v17 = vld [vmem:[%s3543_s3 + $0x168] sm:$0xff] }
 0xedb   :  { %v1245_v19 = vadd.f32 %v1243_v34, %v1242_v18 }
 0xedd   :  { %2313 = vmatmul.msk.f32.gmra.mxu0 %vm30_vm0, %v1245_v19 }
 0xee4   :  { %v3054_v45 = vpop.permute.xlu2 %1278 }
 0xf33   :  { %v903_v23 = vpop.xlane.xlu1 %902 }
 0xf34   :  { %v907_v0 = vmul.f32 %v903_v23, %v2649_v10 }
 0xf36   :  { %v909_v24 = vadd.f32 1e-05, %v907_v0 }
 0xf38   :  { %2477 = vrsqrt.f32 %v909_v24  ;;  %vm917_vm11 = vweird.f32 %v909_v24 }
 0xf3b   :  { %v894_v25 = vpop.xlane.xlu1 %893 }
 0xf3c   :  { %v896_v26 = vmul.f32 %v894_v25, %v2649_v10 }
 0xf3e   :  { %v2478_v6 = vpop.eup %2477  ;;  %v3034_v27 = vsub.f32 %v888_v8, %v896_v26 }
 0xf3f   :  { %v912_v28 = vmul.f32 %v2478_v6, %v909_v24  ;;  %vm918_vm9 = vweird.f32 %v2478_v6  ;;  %v606_v24 = vld [vmem:[%s3543_s3 + $0x150] sm:$0xff] }
 0xf40   :  { %v900_v29 = vmul.f32 %v3034_v27, %v3034_v27  ;;  %vm919_vm12 = vmor %vm917_vm11, %vm918_vm9  ;;  %vm1037_vm11 = vcmask 1040384  }
 0xf41   :  { %v913_v30 = vmul.f32 %v2478_v6, %v912_v28 }
 0xf42   :  { %v904_v12 = vsel %vm34_vm1, %v900_v29, 0.0 }
 0xf43   :  { %v914_v31 = vmul.f32 0.5, %v913_v30  ;;  %905 = vadd.xlane.f32.xlu0 %v904_v12 }
 0xf45   :  { %v915_v33 = vsub.f32 1.5, %v914_v31 }
 0xf47   :  { %v916_v34 = vmul.f32 %v2478_v6, %v915_v33 }
 0xf49   :  { %v920_v36 = vsel %vm919_vm12, %v2478_v6, %v916_v34  ;;  %vm1104_vm12 = vcmp.ge.s32.totalorder %v2714_v48, 8 }
 0xf4a   :  { %v931_v37 = vmul.f32 %v920_v36, %v897_v58  ;;  %v618_v58 = vld [vmem:[%s3543_s3 + $0x1b0] sm:$0xff] }
 0xf4b   :  { %1012 = vmatpush.msra.mxu1 %v618_v58 }
 0xf4c   :  { %v934_v39 = vmul.f32 %v933_v35, %v931_v37 }
 0xf4d   :  { %1013 = vmatpush.msra.mxu1 %v617_v59 }
 0xf4e   :  { %v937_v40 = vadd.f32 %v936_v38, %v934_v39 }
 0xf4f   :  { %1014 = vmatpush.msra.mxu1 %v616_v60 }
 0xf50   :  { %2302 = vmatmul.msk.f32.vlgmr.msra.gmra.mxu2 %vm30_vm0, %v937_v40 }
 0xf51   :  { %1015 = vmatpush.msra.mxu1 %v615_v2 }
 0xf53   :  { %1016 = vmatpush.msra.mxu1 %v614_v4 }
 0xf55   :  { %1017 = vmatpush.msra.mxu1 %v613_v9 }
 0xf57   :  { %1018 = vmatpush.msra.mxu1 %v612_v7 }
 0xf59   :  { %1019 = vmatpush.msra.mxu1 %v611_v15 }
 0xf5a   :  { %v1273_v41 = vpop.f32.mrf.mxu0 }
 0xf5b   :  { %v3048_v43 = vadd.f32 %v3006_v52, %v1273_v41  ;;  %1020 = vmatpush.msra.mxu1 %v610_v13 }
 0xf5d   :  { %1280 = vrot.lane.b32.xlu1 %v3048_v43, %s2601_s13  ;;  %1284 = vrot.lane.b32.xlu2 %v3048_v43, %s2602_s14 }
 0xf5e   :  { %1021 = vmatpush.msra.mxu1 %v609_v17 }
 0xf60   :  { %1022 = vmatpush.msra.mxu1 %v608_v50 }
 0xf62   :  { %1023 = vmatpush.msra.mxu1 %v607_v22 }
 0xf64   :  { %1024 = vmatpush.msra.mxu1 %v606_v24 }
 0xf65   :  { %1286 = vrot.lane.b32.xlu1 %v3054_v45, %s2602_s14 }
 0xf6d   :  { %1282 = vrot.lane.b32.xlu1 %v3009_v1, %s2602_s14 }
 0xfb6   :  { %v906_v46 = vpop.xlane.xlu0 %905 }
 0xfb7   :  { %v908_v52 = vmul.f32 %v906_v46, %v2649_v10  ;;  %v1285_v40 = vpop.permute.xlu2 %1284 }
 0xfb9   :  { %v910_v55 = vadd.f32 1e-05, %v908_v52 }
 0xfbb   :  { %2479 = vrsqrt.f32 %v910_v55  ;;  %vm927_vm5 = vweird.f32 %v910_v55 }
 0xfc1   :  { %v2480_v61 = vpop.eup %2479 }
 0xfc2   :  { %v922_v62 = vmul.f32 %v2480_v61, %v910_v55  ;;  %vm928_vm4 = vweird.f32 %v2480_v61 }
 0xfc3   :  { %vm929_vm6 = vmor %vm927_vm5, %vm928_vm4  ;;  %vm1118_vm4 = vcmp.ge.s32.totalorder %v2714_v48, 16  ;;  %vm1133_vm5 = vcmp.ge.s32.totalorder %v2714_v48, 24 }
 0xfc4   :  { %v923_v3 = vmul.f32 %v2480_v61, %v922_v62  ;;  %v1134_v50 = vsel %vm1133_vm5, 1, %v2603_v51 }
 0xfc6   :  { %v924_v8 = vmul.f32 0.5, %v923_v3  ;;  %v2415_v3 = vld [vmem:[%s3543_s3 + $0xef] ss:$0 sm:$0xff] }
 0xfc8   :  { %v925_v11 = vsub.f32 1.5, %v924_v8 }
 0xfca   :  { %v926_v14 = vmul.f32 %v2480_v61, %v925_v11 }
 0xfcc   :  { %v930_v16 = vsel %vm929_vm6, %v2480_v61, %v926_v14 }
 0xfcd   :  { %v932_v5 = vmul.f32 %v930_v16, %v3034_v27 }
 0xfcf   :  { %v3101_v18 = vpop.permute.xlu1 %1280  ;;  %v935_v19 = vmul.f32 %v933_v35, %v932_v5 }
 0xfd0   :  { %1288 = vrot.lane.b32.xlu0 %v3101_v18, %s2602_s14 }
 0xfd1   :  { %v938_v21 = vadd.f32 %v936_v38, %v935_v19  ;;  %v1119_v19 = vsel %vm1118_vm4, 1, %v2603_v51 }
 0xfd3   :  { %v963_v23 = vpop.f32.mrf.mxu2  ;;  %2303 = vmatmul.msk.f32.gmra.mxu2 %vm30_vm0, %v938_v21 }
 0xfd4   :  { %v964_v0 = vadd.f32 %v2414_v20, %v963_v23 }
 0xfd6   :  { %v969_v25 = vmul.f32 -1.702, %v964_v0 }
 0xfd7   :  { %v1287_v39 = vpop.permute.xlu1 %1286 }
 0xfd8   :  { %v971_v26 = vmul.f32 1.442695, %v969_v25 }
 0xfda   :  { %2481 = vpow2.f32 %v971_v26 }
 0xfdf   :  { %v1283_v41 = vpop.permute.xlu1 %1282 }
 0xfe0   :  { %v2482_v6 = vpop.eup %2481 }
 0xfe1   :  { %v975_v27 = vadd.f32 1.0, %v2482_v6  ;;  %v92_v6 = vadd.s32 16, %v2718_v49 }
 0xfe3   :  { %2483 = vrcp.f32 %v975_v27  ;;  %v988_v12 = vand.u32 2147483648, %v975_v27  ;;  %v986_v32 = vand.u32 2147483647, %v975_v27  ;;  %vm982_vm15 = vweird.f32 %v975_v27 }
 0xfe5   :  { %v989_v34 = vor.u32 1.1754944e-38, %v988_v12  ;;  %vm987_vm13 = vcmp.eq.f32.partialorder %v986_v32, 8.507059e+37 }
 0xfe9   :  { %v2484_v28 = vpop.eup %2483 }
 0xfea   :  { %v978_v29 = vmul.f32 %v2484_v28, %v975_v27  ;;  %vm983_vm7 = vweird.f32 %v2484_v28 }
 0xfeb   :  { %vm984_vm10 = vmor %vm982_vm15, %vm983_vm7 }
 0xfec   :  { %v979_v30 = vsub.f32 1.0, %v978_v29 }
 0xfee   :  { %v980_v31 = vmul.f32 %v2484_v28, %v979_v30  ;;  %v1095_v30 = vadd.s32 24, %v2718_v49 }
 0xff0   :  { %v981_v33 = vadd.f32 %v2484_v28, %v980_v31  ;;  %v2311_v32 = vadd.s32 4294967272, %v1095_v30 }
 0xff2   :  { %v985_v35 = vsel %vm984_vm10, %v2484_v28, %v981_v33 }
 0xff3   :  { %v990_v36 = vsel %vm987_vm13, %v989_v34, %v985_v35 }
 0xff4   :  { %v1007_v37 = vmul.f32 %v990_v36, %v964_v0  ;;  %v2309_v0 = vadd.s32 4294967288, %v2724_v54 }
 0xff6   :  { %1025 = vmatmul.f32.vlgmr.msra.gmra.mxu1 %v1007_v37 }
0x1042   :  { %v1289_v38 = vpop.permute.xlu0 %1288 }
0x1043   :  { %2314 = vmatpush.xpose.msk.msrb.mxu2 %vm266_vm2, %v1289_v38 }
0x1047   :  { %2315 = vmatpush.xpose.msk.msrb.mxu2 %vm266_vm2, %v1287_v39 }
0x104b   :  { %2316 = vmatpush.xpose.msk.msrb.mxu2 %vm266_vm2, %v1285_v40 }
0x104f   :  { %2317 = vmatpush.xpose.msk.msrb.mxu2 %vm266_vm2, %v1283_v41 }
0x1052   :  { %2318 = vmatmul.msk.f32.vlgmr.msrb.gmra.mxu2 %vm266_vm2, %v3009_v1 }
0x1056   :  { %v966_v46 = vpop.f32.mrf.mxu2 }
0x1057   :  { %v967_v47 = vadd.f32 %v2414_v20, %v966_v46 }
0x1059   :  { %v970_v52 = vmul.f32 -1.702, %v967_v47 }
0x105a   :  { %2319 = vmatmul.msk.f32.gmra.mxu2 %vm266_vm2, %v3048_v43 }
0x105b   :  { %v973_v53 = vmul.f32 1.442695, %v970_v52 }
0x105d   :  { %2485 = vpow2.f32 %v973_v53 }
0x1062   :  { %2320 = vmatmul.msk.f32.gmra.mxu2 %vm266_vm2, %v3054_v45 }
0x1063   :  { %v2486_v55 = vpop.eup %2485 }
0x1064   :  { %v976_v57 = vadd.f32 1.0, %v2486_v55 }
0x1066   :  { %2487 = vrcp.f32 %v976_v57  ;;  %v1003_v61 = vand.u32 2147483648, %v976_v57  ;;  %v1001_v2 = vand.u32 2147483647, %v976_v57  ;;  %vm997_vm3 = vweird.f32 %v976_v57 }
0x1068   :  { %v1004_v11 = vor.u32 1.1754944e-38, %v1003_v61  ;;  %vm1002_vm9 = vcmp.eq.f32.partialorder %v1001_v2, 8.507059e+37 }
0x106a   :  { %2321 = vmatmul.msk.f32.gmra.mxu2 %vm266_vm2, %v3101_v18 }
0x106c   :  { %v2488_v58 = vpop.eup %2487 }
0x106d   :  { %v993_v59 = vmul.f32 %v2488_v58, %v976_v57  ;;  %vm998_vm14 = vweird.f32 %v2488_v58 }
0x106e   :  { %vm999_vm8 = vmor %vm997_vm3, %vm998_vm14 }
0x106f   :  { %v994_v60 = vsub.f32 1.0, %v993_v59 }
0x1071   :  { %v995_v62 = vmul.f32 %v2488_v58, %v994_v60 }
0x1073   :  { %v1026_v4 = vpop.f32.mrf.mxu1  ;;  %v996_v8 = vadd.f32 %v2488_v58, %v995_v62 }
0x1074   :  { %v1031_v9 = vadd.f32 %v1026_v4, %v2997_v42  ;;  %v1105_v42 = vsel %vm1104_vm12, 1, %v2603_v51 }
0x1075   :  { %v1000_v7 = vsel %vm999_vm8, %v2488_v58, %v996_v8  ;;  %v1120_v20 = vadd.s32 %v1119_v19, %v1105_v42  ;;  %v2392_v58 = vpack.i.bf16 %v3009_v1, %v3048_v43  ;;  %v1068_v1 = vld [vmem:[%s3543_s3 + $0x1e8] sm:$0xff]  ;;  %v1067_v43 = vld [vmem:[%s3543_s3 + $0x1e0] sm:$0xff] }
0x1076   :  { %v1033_v14 = vadd.f32 %v2415_v3, %v1031_v9  ;;  %v1005_v15 = vsel %vm1002_vm9, %v1004_v11, %v1000_v7  ;;  %v1066_v11 = vld [vmem:[%s3543_s3 + $0x1d8] sm:$0xff] }
0x1077   :  { %v1008_v16 = vmul.f32 %v1005_v15, %v967_v47  ;;  %v1135_v21 = vadd.s32 %v1134_v50, %v1120_v20 }
0x1078   :  { %v1035_v13 = vrot.slane %v1033_v14, 4 }
0x1079   :  { %1028 = vmatmul.f32.gmra.mxu1 %v1008_v16  ;;  %v1148_v22 = vmul.u32 8, %v1135_v21  ;;  %vm2305_vm6 = vcmp.eq.s32.totalorder %v1135_v21, 0  ;;  %vm2306_vm10 = vcmp.eq.s32.totalorder %v1135_v21, 1  ;;  %vm2307_vm3 = vcmp.eq.s32.totalorder %v1135_v21, 2 }
0x107a   :  { %v1038_v5 = vsel %vm1037_vm11, %v1033_v14, %v1035_v13  ;;  %vm2308_vm12 = vcmp.eq.s32.totalorder %v1135_v21, 3 }
0x107b   :  { %v1040_v17 = vsel %vm34_vm1, %v1038_v5, 0.0  ;;  %v1149_v23 = vsub.s32 %v2714_v48, %v1148_v22  ;;  %v2310_v48 = vadd.s32 4294967280, %v92_v6  ;;  %v1039_v6 = vld [vmem:[%s3543_s3 + $0x1d2] sm:$0x3] }
0x107c   :  { %1041 = vadd.xlane.f32.xlu2 %v1040_v17 }
0x107d   :  { %vm1150_vm7 = vcmp.ge.s32.totalorder %v2718_v49, %v1149_v23  ;;  %vm1151_vm13 = vcmp.ge.s32.totalorder %v2309_v0, %v1149_v23  ;;  %vm1152_vm8 = vcmp.ge.s32.totalorder %v2310_v48, %v1149_v23  ;;  %vm1153_vm4 = vcmp.ge.s32.totalorder %v2311_v32, %v1149_v23 }
0x107e   :  { %vm1154_vm15 = vmand %vm2305_vm6, %vm1150_vm7 }
0x107f   :  { %v3146_v25 = vsel %vm1154_vm15, 0.0, %v2604_v63  ;;  %vm1155_vm14 = vmand %vm2306_vm10, %vm1151_vm13 }
0x1080   :  { %v3152_v29 = vsel %vm1155_vm14, 0.0, %v2604_v63  ;;  %vm1156_vm9 = vmand %vm2307_vm3, %vm1152_vm8 }
0x1081   :  { %v3158_v34 = vsel %vm1156_vm9, 0.0, %v2604_v63  ;;  %vm1157_vm5 = vmand %vm2308_vm12, %vm1153_vm4 }
0x1082   :  { %v3163_v38 = vsel %vm1157_vm5, 0.0, %v2604_v63  ;;  %v2387_v63 = vpack.i.bf16 %v3054_v45, %v3101_v18  ;;  %v1069_v45 = vld [vmem:[%s3543_s3 + $0x1f0] sm:$0xff]  ;;  %s2607_s3 = smov [#allocation5]  }
0x1083   :  { %1085 = vmatpush.msrb.mxu3 %v1069_v45  ;;  %v1174_v45 = vld [vmem:[%s3544_s4 + $0x38] sm:$0xff]  ;;  %s2258_s0 = sshll.u32 %s2607_s3, 4  ;;  %s2259_s0 = int_to_ptr.vmem [resolvable:$true] %s2258_s0 }
0x1085   :  { %1086 = vmatpush.msrb.mxu3 %v1068_v1  ;;  %v1172_v1 = vld [vmem:[%s3544_s4 + $0x28] sm:$0xff] }
0x1087   :  { %1087 = vmatpush.msrb.mxu3 %v1067_v43 }
0x1089   :  { %1088 = vmatpush.msrb.mxu3 %v1066_v11 }
0x10d5   :  { %v1323_v24 = vpop.f32.mrf.mxu2 }
0x10d6   :  { %v1335_v26 = vmul.f32 0.25, %v1323_v24 }
0x10d8   :  { %v1339_v51 = vadd.f32 %v1335_v26, %v3146_v25 }
0x10da   :  { %v1343_v27 = vsel %vm30_vm0, %v1339_v51, -inf }
0x10db   :  { %1344 = vmax.xlane.f32.xlu1 %v1343_v27 }
0x10dd   :  { %v1326_v28 = vpop.f32.mrf.mxu2 }
0x10de   :  { %v1336_v54 = vmul.f32 0.25, %v1326_v28  ;;  %v1062_v28 = vperm.slane %v1039_v6, 0 }
0x10e0   :  { %v1340_v12 = vadd.f32 %v1336_v54, %v3152_v29 }
0x10e2   :  { %v1346_v31 = vsel %vm30_vm0, %v1340_v12, -inf }
0x10e3   :  { %1347 = vmax.xlane.f32.xlu0 %v1346_v31 }
0x10e5   :  { %v1329_v33 = vpop.f32.mrf.mxu2 }
0x10e6   :  { %v1337_v35 = vmul.f32 0.25, %v1329_v33  ;;  %v1064_v33 = vperm.slane %v1039_v6, 1  ;;  %v1179_v6 = vld [vmem:[%s3544_s4 + $0x60] sm:$0xff] }
0x10e7   :  { %1553 = vmatpush.msrb.mxu1 %v1179_v6 }
0x10e8   :  { %v1341_v36 = vadd.f32 %v1337_v35, %v3158_v34 }
0x10ea   :  { %v1349_v37 = vsel %vm30_vm0, %v1341_v36, -inf }
0x10eb   :  { %1350 = vmax.xlane.f32.xlu2 %v1349_v37 }
0x10ed   :  { %v1332_v49 = vpop.f32.mrf.mxu2 }
0x10ee   :  { %v1338_v39 = vmul.f32 0.25, %v1332_v49 }
0x10ef   :  { %v1042_v40 = vpop.xlane.xlu2 %1041 }
0x10f0   :  { %v1043_v41 = vmul.f32 %v1042_v40, %v2649_v10  ;;  %v1342_v46 = vadd.f32 %v1338_v39, %v3163_v38 }
0x10f2   :  { %v3167_v47 = vsub.f32 %v1038_v5, %v1043_v41  ;;  %v1352_v52 = vsel %vm30_vm0, %v1342_v46, -inf }
0x10f3   :  { %1353 = vmax.xlane.f32.xlu1 %v1352_v52 }
0x10f4   :  { %v1045_v53 = vmul.f32 %v3167_v47, %v3167_v47 }
0x10f6   :  { %v1029_v55 = vpop.f32.mrf.mxu1  ;;  %v1046_v57 = vsel %vm34_vm1, %v1045_v53, 0.0 }
0x10f7   :  { %1047 = vadd.xlane.f32.xlu2 %v1046_v57 }
0x110c   :  { %2388 = vrot.lane.b32.xlu1 %v2387_v63, %s2605_s15 }
0x110f   :  { %2393 = vrot.lane.b32.xlu2 %v2392_v58, %s2605_s15 }
0x114e   :  { %v1345_v59 = vpop.xlane.xlu1 %1344 }
0x114f   :  { %v1355_v60 = vsub.f32 %v1339_v51, %v1345_v59 }
0x1151   :  { %v1359_v61 = vmul.f32 1.442695, %v1355_v60 }
0x1153   :  { %2489 = vpow2.f32 %v1359_v61 }
0x1156   :  { %v1348_v62 = vpop.xlane.xlu0 %1347 }
0x1157   :  { %v1356_v2 = vsub.f32 %v1340_v12, %v1348_v62 }
0x1159   :  { %v3179_v3 = vpop.eup %2489  ;;  %v1361_v4 = vmul.f32 1.442695, %v1356_v2 }
0x115a   :  { %v1367_v18 = vsel %vm30_vm0, %v3179_v3, 0.0 }
0x115b   :  { %2491 = vpow2.f32 %v1361_v4  ;;  %1368 = vadd.xlane.f32.xlu0 %v1367_v18  ;;  %v1175_v4 = vld [vmem:[%s3544_s4 + $0x40] sm:$0xff]  ;;  %v1173_v18 = vld [vmem:[%s3544_s4 + $0x30] sm:$0xff] }
0x115c   :  { %1468 = vmatpush.msra.mxu0 %v1175_v4 }
0x115e   :  { %v1351_v8 = vpop.xlane.xlu2 %1350  ;;  %1469 = vmatpush.msra.mxu0 %v1174_v45 }
0x115f   :  { %v1357_v9 = vsub.f32 %v1341_v36, %v1351_v8 }
0x1160   :  { %1470 = vmatpush.msra.mxu0 %v1173_v18  ;;  %v1195_v18 = vld [vmem:[%s3544_s4 + $0xe0] sm:$0xff] }
0x1161   :  { %v2492_v7 = vpop.eup %2491  ;;  %v1363_v14 = vmul.f32 1.442695, %v1357_v9 }
0x1162   :  { %v1370_v15 = vsel %vm30_vm0, %v2492_v7, 0.0  ;;  %1471 = vmatpush.msra.mxu0 %v1172_v1  ;;  %v1194_v1 = vld [vmem:[%s3544_s4 + $0xd8] sm:$0xff] }
0x1163   :  { %2493 = vpow2.f32 %v1363_v14  ;;  %1371 = vadd.xlane.f32.xlu0 %v1370_v15 }
0x1166   :  { %v1354_v16 = vpop.xlane.xlu1 %1353 }
0x1167   :  { %v1358_v13 = vsub.f32 %v1342_v46, %v1354_v16 }
0x1169   :  { %v2494_v5 = vpop.eup %2493  ;;  %v1365_v17 = vmul.f32 1.442695, %v1358_v13 }
0x116a   :  { %v1048_v42 = vpop.xlane.xlu2 %1047  ;;  %v1373_v19 = vsel %vm30_vm0, %v2494_v5, 0.0 }
0x116b   :  { %2495 = vpow2.f32 %v1365_v17  ;;  %v1049_v20 = vmul.f32 %v1048_v42, %v2649_v10  ;;  %1374 = vadd.xlane.f32.xlu0 %v1373_v19 }
0x116d   :  { %v1050_v50 = vadd.f32 1e-05, %v1049_v20 }
0x116f   :  { %2497 = vrsqrt.f32 %v1050_v50  ;;  %vm1057_vm6 = vweird.f32 %v1050_v50 }
0x1171   :  { %v2496_v21 = vpop.eup %2495 }
0x1172   :  { %v1376_v22 = vsel %vm30_vm0, %v2496_v21, 0.0  ;;  %v2394_v12 = vpop.permute.xlu2 %2393 }
0x1173   :  { %1377 = vadd.xlane.f32.xlu0 %v1376_v22  ;;  %v2395_v36 = vunpack.i.l.bf16 %v2394_v12  ;;  %v2396_v49 = vunpack.i.h.bf16 %v2394_v12 }
0x1175   :  { %v2498_v23 = vpop.eup %2497 }
0x1176   :  { %v1052_v0 = vmul.f32 %v2498_v23, %v1050_v50  ;;  %vm1058_vm1 = vweird.f32 %v2498_v23 }
0x1177   :  { %vm1059_vm7 = vmor %vm1057_vm6, %vm1058_vm1 }
0x1178   :  { %v1053_v24 = vmul.f32 %v2498_v23, %v1052_v0 }
0x117a   :  { %v1054_v26 = vmul.f32 0.5, %v1053_v24 }
0x117c   :  { %v1055_v51 = vsub.f32 1.5, %v1054_v26 }
0x117e   :  { %v1056_v27 = vmul.f32 %v2498_v23, %v1055_v51  ;;  %v2389_v48 = vpop.permute.xlu1 %2388  ;;  %v1178_v51 = vld [vmem:[%s3544_s4 + $0x58] sm:$0xff] }
0x117f   :  { %v2390_v54 = vunpack.i.l.bf16 %v2389_v48  ;;  %v2391_v32 = vunpack.i.h.bf16 %v2389_v48  ;;  %1554 = vmatpush.msrb.mxu1 %v1178_v51  ;;  %v1176_v48 = vld [vmem:[%s3544_s4 + $0x48] sm:$0xff] }
0x1180   :  { %v1060_v30 = vsel %vm1059_vm7, %v2498_v23, %v1056_v27  ;;  %v1177_v27 = vld [vmem:[%s3544_s4 + $0x50] sm:$0xff] }
0x1181   :  { %v1061_v31 = vmul.f32 %v1060_v30, %v3167_v47  ;;  %1423 = vmatpush.msra.mxu3 %v2390_v54  ;;  %1555 = vmatpush.msrb.mxu1 %v1177_v27 }
0x1183   :  { %v1063_v35 = vmul.f32 %v1062_v28, %v1061_v31  ;;  %1424 = vmatpush.msra.mxu3 %v2391_v32  ;;  %1556 = vmatpush.msrb.mxu1 %v1176_v48 }
0x1185   :  { %1425 = vmatpush.msra.mxu3 %v2395_v36  ;;  %v1065_v37 = vadd.f32 %v1064_v33, %v1063_v35 }
0x1187   :  { %2304 = vmatmul.msk.f32.vlgmr.msrb.gmra.mxu3 %vm30_vm0, %v1065_v37 }
0x1188   :  { %1426 = vmatpush.msra.mxu3 %v2396_v49  ;;  %v1165_v49 = vld [vmem:[%s3544_s4 + $0x4] sm:$0x3] }
0x118a   :  { %1604 = vmatpush.msrb.mxu3 %v1195_v18 }
0x118c   :  { %1605 = vmatpush.msrb.mxu3 %v1194_v1 }
0x11ce   :  { %v1369_v39 = vpop.xlane.xlu0 %1368 }
0x11cf   :  { %2499 = vrcp.f32 %v1369_v39 }
0x11d5   :  { %v2500_v40 = vpop.eup %2499 }
0x11d6   :  { %v1383_v41 = vmul.f32 %v2500_v40, %v3179_v3  ;;  %v1372_v46 = vpop.xlane.xlu0 %1371 }
0x11d7   :  { %2501 = vrcp.f32 %v1372_v46 }
0x11d8   :  { %2322 = vmatmul.msk.f32.vlgmr.msra.gmra.mxu3 %vm30_vm0, %v1383_v41 }
0x11dd   :  { %v2502_v47 = vpop.eup %2501 }
0x11de   :  { %v1375_v52 = vpop.xlane.xlu0 %1374  ;;  %v1384_v53 = vmul.f32 %v2502_v47, %v2492_v7  ;;  %v2416_v7 = vld [vmem:[%s3544_s4 + $0x3] ss:$0 sm:$0xff]  ;;  %v1528_v47 = vperm.slane %v1165_v49, 0 }
0x11df   :  { %2503 = vrcp.f32 %v1375_v52 }
0x11e0   :  { %2323 = vmatmul.msk.f32.gmra.mxu3 %vm30_vm0, %v1384_v53 }
0x11e5   :  { %v2504_v55 = vpop.eup %2503 }
0x11e6   :  { %v1378_v57 = vpop.xlane.xlu0 %1377  ;;  %v1385_v63 = vmul.f32 %v2504_v55, %v2494_v5 }
0x11e7   :  { %2505 = vrcp.f32 %v1378_v57  ;;  %v1531_v57 = vperm.slane %v1165_v49, 1 }
0x11e8   :  { %2324 = vmatmul.msk.f32.gmra.mxu3 %vm30_vm0, %v1385_v63 }
0x11ed   :  { %v2506_v58 = vpop.eup %2505 }
0x11ee   :  { %v1386_v59 = vmul.f32 %v2506_v58, %v2496_v21 }
0x11f0   :  { %2325 = vmatmul.msk.f32.gmra.mxu3 %vm30_vm0, %v1386_v59 }
0x120a   :  { %v3209_v60 = vpop.f32.mrf.mxu3 }
0x125b   :  { %v1428_v61 = vpop.f32.mrf.mxu3 }
0x1263   :  { %v1431_v62 = vpop.f32.mrf.mxu3 }
0x126b   :  { %v1434_v2 = vpop.f32.mrf.mxu3 }
0x126c   :  { %1442 = vrot.lane.b32.xlu1 %v1434_v2, %s2606_s22 }
0x1273   :  { %v1437_v3 = vpop.f32.mrf.mxu3 }
0x1274   :  { %1444 = vrot.lane.b32.xlu2 %v1437_v3, %s2606_s22 }
0x12ce   :  { %v1445_v9 = vpop.permute.xlu2 %1444 }
0x12cf   :  { %v1449_v11 = vsel %vm266_vm2, %v1431_v62, %v1445_v9  ;;  %v1191_v9 = vld [vmem:[%s3544_s4 + $0xc0] sm:$0xff] }
0x12de   :  { %v1443_v43 = vpop.permute.xlu1 %1442 }
0x12df   :  { %v1448_v8 = vsel %vm266_vm2, %v1428_v61, %v1443_v43  ;;  %v1193_v43 = vld [vmem:[%s3544_s4 + $0xd0] sm:$0xff] }
0x12e0   :  { %2326 = vmatmul.msk.f32.vlgmr.msra.gmra.mxu0 %vm30_vm0, %v1448_v8  ;;  %1606 = vmatpush.msrb.mxu3 %v1193_v43  ;;  %v1192_v8 = vld [vmem:[%s3544_s4 + $0xc8] sm:$0xff] }
0x12e2   :  { %1607 = vmatpush.msrb.mxu3 %v1192_v8 }
0x12e4   :  { %1608 = vmatpush.msrb.mxu3 %v1191_v9 }
0x12e8   :  { %2327 = vmatmul.msk.f32.gmra.mxu0 %vm30_vm0, %v1449_v11  ;;  %v1190_v11 = vld [vmem:[%s3544_s4 + $0xb8] sm:$0xff] }
0x12e9   :  { %1609 = vmatpush.msrb.mxu3 %v1190_v11 }
0x135d   :  { %v1473_v14 = vpop.f32.mrf.mxu0 }
0x135e   :  { %v1479_v15 = vadd.f32 %v1473_v14, %v2938_v56  ;;  %v1188_v14 = vld [vmem:[%s3544_s4 + $0xa8] sm:$0xff] }
0x1360   :  { %v3233_v16 = vadd.f32 %v2416_v7, %v1479_v15  ;;  %v1187_v15 = vld [vmem:[%s3544_s4 + $0xa0] sm:$0xff] }
0x1362   :  { %v1484_v13 = vsel %vm30_vm0, %v3233_v16, 0.0 }
0x1363   :  { %1485 = vadd.xlane.f32.xlu0 %v1484_v13  ;;  %v1186_v13 = vld [vmem:[%s3544_s4 + $0x98] sm:$0xff] }
0x1365   :  { %v1476_v5 = vpop.f32.mrf.mxu0 }
0x1366   :  { %v1480_v17 = vadd.f32 %v1476_v5, %v2963_v44  ;;  %v1185_v5 = vld [vmem:[%s3544_s4 + $0x90] sm:$0xff] }
0x1368   :  { %v3238_v42 = vadd.f32 %v2416_v7, %v1480_v17  ;;  %v1189_v7 = vld [vmem:[%s3544_s4 + $0xb0] sm:$0xff]  ;;  %v1184_v17 = vld [vmem:[%s3544_s4 + $0x88] sm:$0xff] }
0x1369   :  { %1610 = vmatpush.msrb.mxu3 %v1189_v7 }
0x136a   :  { %v1487_v19 = vsel %vm30_vm0, %v3238_v42, 0.0 }
0x136b   :  { %1488 = vadd.xlane.f32.xlu1 %v1487_v19  ;;  %1611 = vmatpush.msrb.mxu3 %v1188_v14  ;;  %v1183_v19 = vld [vmem:[%s3544_s4 + $0x80] sm:$0xff] }
0x136d   :  { %1612 = vmatpush.msrb.mxu3 %v1187_v15 }
0x136f   :  { %1613 = vmatpush.msrb.mxu3 %v1186_v13 }
0x1371   :  { %1614 = vmatpush.msrb.mxu3 %v1185_v5 }
0x1373   :  { %1615 = vmatpush.msrb.mxu3 %v1184_v17 }
0x1375   :  { %1616 = vmatpush.msrb.mxu3 %v1183_v19  ;;  %v1641_v19 = vld [vmem:[%s3544_s4 + $0x108] sm:$0xff] }
0x1376   :  { %1735 = vmatpush.msrb.mxu0 %v1641_v19 }
0x13d6   :  { %v1486_v20 = vpop.xlane.xlu0 %1485 }
0x13d7   :  { %v1490_v50 = vmul.f32 %v1486_v20, %v2649_v10  ;;  %v2417_v20 = vld [vmem:[%s3544_s4 + $0x6] ss:$0 sm:$0xff] }
0x13d9   :  { %v1492_v56 = vsub.f32 %v3233_v16, %v1490_v50  ;;  %v1182_v50 = vld [vmem:[%s3544_s4 + $0x78] sm:$0xff] }
0x13da   :  { %1617 = vmatpush.msrb.mxu3 %v1182_v50  ;;  %v1639_v50 = vld [vmem:[%s3544_s4 + $0xf8] sm:$0xff] }
0x13db   :  { %v1494_v21 = vmul.f32 %v1492_v56, %v1492_v56 }
0x13dd   :  { %v1496_v22 = vsel %vm30_vm0, %v1494_v21, 0.0  ;;  %v1181_v21 = vld [vmem:[%s3544_s4 + $0x70] sm:$0xff] }
0x13de   :  { %1497 = vadd.xlane.f32.xlu2 %v1496_v22  ;;  %v1489_v23 = vpop.xlane.xlu1 %1488  ;;  %1618 = vmatpush.msrb.mxu3 %v1181_v21 }
0x13df   :  { %v1491_v0 = vmul.f32 %v1489_v23, %v2649_v10  ;;  %v1180_v23 = vld [vmem:[%s3544_s4 + $0x68] sm:$0xff] }
0x13e0   :  { %1619 = vmatpush.msrb.mxu3 %v1180_v23 }
0x13e1   :  { %v1493_v44 = vsub.f32 %v3238_v42, %v1491_v0 }
0x13e3   :  { %v1495_v24 = vmul.f32 %v1493_v44, %v1493_v44 }
0x13e5   :  { %v1499_v26 = vsel %vm30_vm0, %v1495_v24, 0.0 }
0x13e6   :  { %1500 = vadd.xlane.f32.xlu0 %v1499_v26 }
0x1451   :  { %v1498_v28 = vpop.xlane.xlu2 %1497 }
0x1452   :  { %v1502_v54 = vmul.f32 %v1498_v28, %v2649_v10 }
0x1454   :  { %v1504_v30 = vadd.f32 1e-05, %v1502_v54 }
0x1456   :  { %2507 = vrsqrt.f32 %v1504_v30  ;;  %vm1512_vm10 = vweird.f32 %v1504_v30 }
0x1459   :  { %v1501_v12 = vpop.xlane.xlu0 %1500 }
0x145a   :  { %v1503_v31 = vmul.f32 %v1501_v12, %v2649_v10 }
0x145c   :  { %v2508_v32 = vpop.eup %2507  ;;  %v1505_v33 = vadd.f32 1e-05, %v1503_v31 }
0x145d   :  { %v1507_v35 = vmul.f32 %v2508_v32, %v1504_v30  ;;  %vm1513_vm15 = vweird.f32 %v2508_v32 }
0x145e   :  { %2509 = vrsqrt.f32 %v1505_v33  ;;  %vm1514_vm13 = vmor %vm1512_vm10, %vm1513_vm15  ;;  %vm1522_vm3 = vweird.f32 %v1505_v33 }
0x145f   :  { %v1508_v36 = vmul.f32 %v2508_v32, %v1507_v35 }
0x1461   :  { %v1509_v37 = vmul.f32 0.5, %v1508_v36 }
0x1463   :  { %v1510_v39 = vsub.f32 1.5, %v1509_v37 }
0x1464   :  { %v2510_v40 = vpop.eup %2509 }
0x1465   :  { %v1511_v41 = vmul.f32 %v2508_v32, %v1510_v39  ;;  %v1517_v46 = vmul.f32 %v2510_v40, %v1505_v33  ;;  %vm1523_vm14 = vweird.f32 %v2510_v40 }
0x1466   :  { %vm1524_vm8 = vmor %vm1522_vm3, %vm1523_vm14 }
0x1467   :  { %v1515_v52 = vsel %vm1514_vm13, %v2508_v32, %v1511_v41  ;;  %v1518_v53 = vmul.f32 %v2510_v40, %v1517_v46 }
0x1468   :  { %v1526_v55 = vmul.f32 %v1515_v52, %v1492_v56 }
0x1469   :  { %v1519_v63 = vmul.f32 0.5, %v1518_v53 }
0x146a   :  { %v1529_v58 = vmul.f32 %v1528_v47, %v1526_v55 }
0x146b   :  { %v1520_v59 = vsub.f32 1.5, %v1519_v63 }
0x146c   :  { %v1532_v61 = vadd.f32 %v1531_v57, %v1529_v58 }
0x146d   :  { %v1521_v62 = vmul.f32 %v2510_v40, %v1520_v59 }
0x146e   :  { %2328 = vmatmul.msk.f32.vlgmr.msrb.gmra.mxu1 %vm30_vm0, %v1532_v61 }
0x146f   :  { %v1525_v2 = vsel %vm1524_vm8, %v2510_v40, %v1521_v62  ;;  %v2418_v62 = vld [vmem:[%s3544_s4 + $0x7] ss:$0 sm:$0xff] }
0x1470   :  { %v1527_v3 = vmul.f32 %v1525_v2, %v1493_v44 }
0x1472   :  { %v1530_v4 = vmul.f32 %v1528_v47, %v1527_v3 }
0x1474   :  { %v1533_v45 = vadd.f32 %v1531_v57, %v1530_v4 }
0x1476   :  { %2329 = vmatmul.msk.f32.gmra.mxu1 %vm30_vm0, %v1533_v45 }
0x14eb   :  { %v1558_v56 = vpop.f32.mrf.mxu1 }
0x14ec   :  { %v1559_v22 = vadd.f32 %v2417_v20, %v1558_v56  ;;  %v1638_v56 = vld [vmem:[%s3544_s4 + $0xf0] sm:$0xff] }
0x14ee   :  { %v1564_v0 = vmul.f32 -1.702, %v1559_v22 }
0x14f0   :  { %v1566_v44 = vmul.f32 1.442695, %v1564_v0 }
0x14f2   :  { %2511 = vpow2.f32 %v1566_v44 }
0x14f3   :  { %v1561_v24 = vpop.f32.mrf.mxu1 }
0x14f4   :  { %v1562_v26 = vadd.f32 %v2417_v20, %v1561_v24  ;;  %v1640_v20 = vld [vmem:[%s3544_s4 + $0x100] sm:$0xff] }
0x14f5   :  { %1736 = vmatpush.msrb.mxu0 %v1640_v20 }
0x14f6   :  { %v1565_v6 = vmul.f32 -1.702, %v1562_v26 }
0x14f7   :  { %1737 = vmatpush.msrb.mxu0 %v1639_v50 }
0x14f8   :  { %v2512_v51 = vpop.eup %2511  ;;  %v1568_v27 = vmul.f32 1.442695, %v1565_v6 }
0x14f9   :  { %v1570_v48 = vadd.f32 1.0, %v2512_v51  ;;  %1738 = vmatpush.msrb.mxu0 %v1638_v56 }
0x14fa   :  { %2513 = vpow2.f32 %v1568_v27 }
0x14fb   :  { %2515 = vrcp.f32 %v1570_v48  ;;  %v1583_v32 = vand.u32 2147483648, %v1570_v48  ;;  %v1581_v35 = vand.u32 2147483647, %v1570_v48  ;;  %vm1577_vm12 = vweird.f32 %v1570_v48 }
0x14fd   :  { %v1584_v49 = vor.u32 1.1754944e-38, %v1583_v32  ;;  %vm1582_vm5 = vcmp.eq.f32.partialorder %v1581_v35, 8.507059e+37 }
0x1500   :  { %v2514_v28 = vpop.eup %2513 }
0x1501   :  { %v2516_v54 = vpop.eup %2515  ;;  %v1571_v30 = vadd.f32 1.0, %v2514_v28 }
0x1502   :  { %v1573_v12 = vmul.f32 %v2516_v54, %v1570_v48  ;;  %vm1578_vm9 = vweird.f32 %v2516_v54  ;;  %v1632_v48 = vld [vmem:[%s3544_s4 + $0xe8] sm:$0x3] }
0x1503   :  { %2517 = vrcp.f32 %v1571_v30  ;;  %vm1579_vm4 = vmor %vm1577_vm12, %vm1578_vm9  ;;  %v1598_v52 = vand.u32 2147483648, %v1571_v30  ;;  %v1596_v55 = vand.u32 2147483647, %v1571_v30  ;;  %vm1592_vm6 = vweird.f32 %v1571_v30 }
0x1504   :  { %v1574_v31 = vsub.f32 1.0, %v1573_v12  ;;  %vm2193_vm12 = vcmask 123904  }
0x1505   :  { %v1599_v63 = vor.u32 1.1754944e-38, %v1598_v52  ;;  %vm1597_vm15 = vcmp.eq.f32.partialorder %v1596_v55, 8.507059e+37  ;;  %v2419_v55 = vld [vmem:[%s3544_s4 + $0xea] ss:$0 sm:$0xff] }
0x1506   :  { %v1575_v33 = vmul.f32 %v2516_v54, %v1574_v31  ;;  %v1710_v31 = vperm.slane %v1632_v48, 0 }
0x1508   :  { %v1576_v36 = vadd.f32 %v2516_v54, %v1575_v33 }
0x1509   :  { %v2518_v37 = vpop.eup %2517 }
0x150a   :  { %v1580_v39 = vsel %vm1579_vm4, %v2516_v54, %v1576_v36  ;;  %v1588_v40 = vmul.f32 %v2518_v37, %v1571_v30  ;;  %vm1593_vm1 = vweird.f32 %v2518_v37  ;;  %v1713_v36 = vperm.slane %v1632_v48, 1 }
0x150b   :  { %v1585_v41 = vsel %vm1582_vm5, %v1584_v49, %v1580_v39  ;;  %vm1594_vm7 = vmor %vm1592_vm6, %vm1593_vm1 }
0x150c   :  { %v1602_v46 = vmul.f32 %v1585_v41, %v1559_v22  ;;  %v1589_v47 = vsub.f32 1.0, %v1588_v40 }
0x150e   :  { %1620 = vmatmul.f32.vlgmr.msrb.gmra.mxu3 %v1602_v46  ;;  %v1590_v53 = vmul.f32 %v2518_v37, %v1589_v47 }
0x1510   :  { %v1591_v57 = vadd.f32 %v2518_v37, %v1590_v53 }
0x1512   :  { %v1595_v58 = vsel %vm1594_vm7, %v2518_v37, %v1591_v57 }
0x1513   :  { %v1600_v59 = vsel %vm1597_vm15, %v1599_v63, %v1595_v58 }
0x1514   :  { %v1603_v61 = vmul.f32 %v1600_v59, %v1562_v26 }
0x1516   :  { %1623 = vmatmul.f32.gmra.mxu3 %v1603_v61 }
0x1591   :  { %v1621_v2 = vpop.f32.mrf.mxu3 }
0x1592   :  { %v1627_v3 = vadd.f32 %v1621_v2, %v3233_v16 }
0x1594   :  { %v3322_v4 = vadd.f32 %v2418_v62, %v1627_v3 }
0x1596   :  { %v1666_v45 = vsel %vm30_vm0, %v3322_v4, 0.0 }
0x1597   :  { %1667 = vadd.xlane.f32.xlu0 %v1666_v45 }
0x1599   :  { %v1624_v18 = vpop.f32.mrf.mxu3 }
0x159a   :  { %v1628_v1 = vadd.f32 %v1624_v18, %v3238_v42 }
0x159c   :  { %v3327_v43 = vadd.f32 %v2418_v62, %v1628_v1 }
0x159e   :  { %v1669_v8 = vsel %vm30_vm0, %v3327_v43, 0.0 }
0x159f   :  { %1670 = vadd.xlane.f32.xlu0 %v1669_v8 }
0x160a   :  { %v1668_v9 = vpop.xlane.xlu0 %1667 }
0x160b   :  { %v1672_v11 = vmul.f32 %v1668_v9, %v2649_v10 }
0x160d   :  { %v1674_v16 = vsub.f32 %v3322_v4, %v1672_v11 }
0x160f   :  { %v1676_v7 = vmul.f32 %v1674_v16, %v1674_v16 }
0x1611   :  { %v1678_v14 = vsel %vm30_vm0, %v1676_v7, 0.0 }
0x1612   :  { %1679 = vadd.xlane.f32.xlu0 %v1678_v14  ;;  %v1671_v15 = vpop.xlane.xlu0 %1670 }
0x1613   :  { %v1673_v13 = vmul.f32 %v1671_v15, %v2649_v10 }
0x1615   :  { %v1675_v42 = vsub.f32 %v3327_v43, %v1673_v13 }
0x1617   :  { %v1677_v5 = vmul.f32 %v1675_v42, %v1675_v42 }
0x1619   :  { %v1681_v17 = vsel %vm30_vm0, %v1677_v5, 0.0 }
0x161a   :  { %1682 = vadd.xlane.f32.xlu0 %v1681_v17 }
0x1685   :  { %v1680_v21 = vpop.xlane.xlu0 %1679 }
0x1686   :  { %v1684_v22 = vmul.f32 %v1680_v21, %v2649_v10 }
0x1688   :  { %v1686_v23 = vadd.f32 1e-05, %v1684_v22 }
0x168a   :  { %2519 = vrsqrt.f32 %v1686_v23  ;;  %vm1694_vm13 = vweird.f32 %v1686_v23 }
0x168d   :  { %v1683_v0 = vpop.xlane.xlu0 %1682 }
0x168e   :  { %v1685_v44 = vmul.f32 %v1683_v0, %v2649_v10 }
0x1690   :  { %v2520_v24 = vpop.eup %2519  ;;  %v1687_v26 = vadd.f32 1e-05, %v1685_v44 }
0x1691   :  { %v1689_v6 = vmul.f32 %v2520_v24, %v1686_v23  ;;  %vm1695_vm10 = vweird.f32 %v2520_v24 }
0x1692   :  { %2521 = vrsqrt.f32 %v1687_v26  ;;  %vm1696_vm14 = vmor %vm1694_vm13, %vm1695_vm10  ;;  %vm1704_vm8 = vweird.f32 %v1687_v26 }
0x1693   :  { %v1690_v51 = vmul.f32 %v2520_v24, %v1689_v6 }
0x1695   :  { %v1691_v27 = vmul.f32 0.5, %v1690_v51 }
0x1697   :  { %v1692_v28 = vsub.f32 1.5, %v1691_v27 }
0x1698   :  { %v2522_v54 = vpop.eup %2521 }
0x1699   :  { %v1693_v30 = vmul.f32 %v2520_v24, %v1692_v28  ;;  %v1699_v12 = vmul.f32 %v2522_v54, %v1687_v26  ;;  %vm1705_vm3 = vweird.f32 %v2522_v54 }
0x169a   :  { %vm1706_vm9 = vmor %vm1704_vm8, %vm1705_vm3 }
0x169b   :  { %v1697_v32 = vsel %vm1696_vm14, %v2520_v24, %v1693_v30  ;;  %v1700_v33 = vmul.f32 %v2522_v54, %v1699_v12 }
0x169c   :  { %v1708_v35 = vmul.f32 %v1697_v32, %v1674_v16 }
0x169d   :  { %v1701_v37 = vmul.f32 0.5, %v1700_v33 }
0x169e   :  { %v1711_v49 = vmul.f32 %v1710_v31, %v1708_v35 }
0x169f   :  { %v1702_v39 = vsub.f32 1.5, %v1701_v37 }
0x16a0   :  { %v1714_v40 = vadd.f32 %v1713_v36, %v1711_v49 }
0x16a1   :  { %v1703_v41 = vmul.f32 %v2522_v54, %v1702_v39 }
0x16a2   :  { %2330 = vmatmul.msk.f32.vlgmr.msrb.gmra.mxu0 %vm30_vm0, %v1714_v40 }
0x16a3   :  { %v1707_v46 = vsel %vm1706_vm9, %v2522_v54, %v1703_v41 }
0x16a4   :  { %v1709_v47 = vmul.f32 %v1707_v46, %v1675_v42 }
0x16a6   :  { %v1712_v52 = vmul.f32 %v1710_v31, %v1709_v47 }
0x16a8   :  { %v1715_v53 = vadd.f32 %v1713_v36, %v1712_v52 }
0x16aa   :  { %2331 = vmatmul.msk.f32.gmra.mxu0 %vm30_vm0, %v1715_v53 }
0x171f   :  { %v1740_v57 = vpop.f32.mrf.mxu0 }
0x1720   :  { %v1741_v63 = vadd.f32 %v2419_v55, %v1740_v57 }
0x1722   :  { %1748 = vrot.lane.b32.xlu2 %v1741_v63, %s2601_s13 }
0x1727   :  { %v1743_v58 = vpop.f32.mrf.mxu0 }
0x1728   :  { %v1744_v59 = vadd.f32 %v2419_v55, %v1743_v58 }
0x172a   :  { %1754 = vrot.lane.b32.xlu2 %v1744_v59, %s2602_s14  ;;  %1750 = vrot.lane.b32.xlu0 %v1744_v59, %s2601_s13 }
0x177c   :  { %v1749_v61 = vpop.permute.xlu2 %1748 }
0x177d   :  { %1756 = vrot.lane.b32.xlu0 %v1749_v61, %s2602_s14 }
0x1784   :  { %v1755_v45 = vpop.permute.xlu2 %1754 }
0x179c   :  { %v1751_v62 = vpop.permute.xlu0 %1750 }
0x179d   :  { %1758 = vrot.lane.b32.xlu1 %v1751_v62, %s2602_s14  ;;  %v2397_v56 = vpack.i.bf16 %v1749_v61, %v1751_v62 }
0x17a5   :  { %1752 = vrot.lane.b32.xlu1 %v1741_v63, %s2602_s14 }
0x17ef   :  { %v1757_v3 = vpop.permute.xlu0 %1756 }
0x180f   :  { %v1759_v2 = vpop.permute.xlu1 %1758 }
0x1810   :  { %2332 = vmatpush.xpose.msk.msra.mxu1 %vm266_vm2, %v1759_v2  ;;  %v1645_v2 = vld [vmem:[%s3544_s4 + $0x128] sm:$0xff] }
0x1811   :  { %1938 = vmatpush.msra.mxu0 %v1645_v2 }
0x1814   :  { %2333 = vmatpush.xpose.msk.msra.mxu1 %vm266_vm2, %v1757_v3  ;;  %v1644_v3 = vld [vmem:[%s3544_s4 + $0x120] sm:$0xff] }
0x1815   :  { %1939 = vmatpush.msra.mxu0 %v1644_v3 }
0x1817   :  { %v1753_v18 = vpop.permute.xlu1 %1752 }
0x1818   :  { %2334 = vmatpush.xpose.msk.msra.mxu1 %vm266_vm2, %v1755_v45  ;;  %v1643_v45 = vld [vmem:[%s3544_s4 + $0x118] sm:$0xff] }
0x1819   :  { %1940 = vmatpush.msra.mxu0 %v1643_v45 }
0x181c   :  { %2335 = vmatpush.xpose.msk.msra.mxu1 %vm266_vm2, %v1753_v18 }
0x181f   :  { %2336 = vmatmul.msk.f32.vlgmr.msra.gmra.mxu1 %vm266_vm2, %v1741_v63 }
0x1827   :  { %2337 = vmatmul.msk.f32.gmra.mxu1 %vm266_vm2, %v1744_v59 }
0x182f   :  { %2338 = vmatmul.msk.f32.gmra.mxu1 %vm266_vm2, %v1749_v61 }
0x1837   :  { %2339 = vmatmul.msk.f32.gmra.mxu1 %vm266_vm2, %v1751_v62 }
0x189c   :  { %v1793_v1 = vpop.f32.mrf.mxu1 }
0x189d   :  { %v1805_v8 = vmul.f32 0.25, %v1793_v1 }
0x189f   :  { %v1809_v9 = vadd.f32 %v1805_v8, %v3146_v25 }
0x18a1   :  { %v1813_v11 = vsel %vm30_vm0, %v1809_v9, -inf }
0x18a2   :  { %1814 = vmax.xlane.f32.xlu0 %v1813_v11  ;;  %v1642_v11 = vld [vmem:[%s3544_s4 + $0x110] sm:$0xff] }
0x18a3   :  { %1941 = vmatpush.msra.mxu0 %v1642_v11  ;;  %v1662_v11 = vld [vmem:[%s3544_s4 + $0x1b0] sm:$0xff] }
0x18a4   :  { %v1796_v16 = vpop.f32.mrf.mxu1 }
0x18a5   :  { %v1806_v7 = vmul.f32 0.25, %v1796_v16 }
0x18a7   :  { %v1810_v14 = vadd.f32 %v1806_v7, %v3152_v29  ;;  %v2402_v29 = vpack.i.bf16 %v1741_v63, %v1744_v59 }
0x18a9   :  { %v1816_v15 = vsel %vm30_vm0, %v1810_v14, -inf }
0x18aa   :  { %1817 = vmax.xlane.f32.xlu2 %v1816_v15 }
0x18ac   :  { %v1799_v13 = vpop.f32.mrf.mxu1 }
0x18ad   :  { %v1807_v42 = vmul.f32 0.25, %v1799_v13  ;;  %v2420_v13 = vld [vmem:[%s3544_s4 + $0xeb] ss:$0 sm:$0xff] }
0x18af   :  { %v1811_v5 = vadd.f32 %v1807_v42, %v3158_v34 }
0x18b1   :  { %v1819_v17 = vsel %vm30_vm0, %v1811_v5, -inf }
0x18b2   :  { %1820 = vmax.xlane.f32.xlu1 %v1819_v17 }
0x18b4   :  { %v1802_v19 = vpop.f32.mrf.mxu1 }
0x18b5   :  { %v1808_v20 = vmul.f32 0.25, %v1802_v19 }
0x18b7   :  { %v1812_v25 = vadd.f32 %v1808_v20, %v3163_v38 }
0x18b9   :  { %v1822_v50 = vsel %vm30_vm0, %v1812_v25, -inf }
0x18ba   :  { %1823 = vmax.xlane.f32.xlu0 %v1822_v50 }
0x18cb   :  { %2398 = vrot.lane.b32.xlu1 %v2397_v56, %s2605_s15 }
0x18ce   :  { %2403 = vrot.lane.b32.xlu0 %v2402_v29, %s2605_s15 }
0x1915   :  { %v1815_v21 = vpop.xlane.xlu0 %1814 }
0x1916   :  { %v1825_v22 = vsub.f32 %v1809_v9, %v1815_v21 }
0x1918   :  { %v1829_v23 = vmul.f32 1.442695, %v1825_v22 }
0x191a   :  { %2523 = vpow2.f32 %v1829_v23 }
0x191d   :  { %v1818_v34 = vpop.xlane.xlu2 %1817 }
0x191e   :  { %v1826_v0 = vsub.f32 %v1810_v14, %v1818_v34 }
0x1920   :  { %v2524_v44 = vpop.eup %2523  ;;  %v1831_v24 = vmul.f32 1.442695, %v1826_v0 }
0x1921   :  { %v1837_v26 = vsel %vm30_vm0, %v2524_v44, 0.0 }
0x1922   :  { %2525 = vpow2.f32 %v1831_v24  ;;  %1838 = vadd.xlane.f32.xlu2 %v1837_v26 }
0x1925   :  { %v1821_v38 = vpop.xlane.xlu1 %1820 }
0x1926   :  { %v1827_v6 = vsub.f32 %v1811_v5, %v1821_v38 }
0x1928   :  { %v2526_v51 = vpop.eup %2525  ;;  %v1833_v27 = vmul.f32 1.442695, %v1827_v6  ;;  %v1649_v6 = vld [vmem:[%s3544_s4 + $0x148] sm:$0xff] }
0x1929   :  { %v1840_v48 = vsel %vm30_vm0, %v2526_v51, 0.0  ;;  %2023 = vmatpush.msra.mxu3 %v1649_v6 }
0x192a   :  { %2527 = vpow2.f32 %v1833_v27  ;;  %1841 = vadd.xlane.f32.xlu2 %v1840_v48  ;;  %v1647_v27 = vld [vmem:[%s3544_s4 + $0x138] sm:$0xff]  ;;  %v1646_v48 = vld [vmem:[%s3544_s4 + $0x130] sm:$0xff] }
0x192d   :  { %v1824_v28 = vpop.xlane.xlu0 %1823 }
0x192e   :  { %v1828_v54 = vsub.f32 %v1812_v25, %v1824_v28 }
0x1930   :  { %v2528_v30 = vpop.eup %2527  ;;  %v1835_v12 = vmul.f32 1.442695, %v1828_v54 }
0x1931   :  { %v1843_v31 = vsel %vm30_vm0, %v2528_v30, 0.0 }
0x1932   :  { %2529 = vpow2.f32 %v1835_v12  ;;  %1844 = vadd.xlane.f32.xlu2 %v1843_v31 }
0x1938   :  { %v2530_v32 = vpop.eup %2529 }
0x1939   :  { %v1846_v33 = vsel %vm30_vm0, %v2530_v32, 0.0 }
0x193a   :  { %1847 = vadd.xlane.f32.xlu2 %v1846_v33 }
0x193d   :  { %v2399_v35 = vpop.permute.xlu1 %2398 }
0x193e   :  { %v2400_v36 = vunpack.i.l.bf16 %v2399_v35  ;;  %v2401_v37 = vunpack.i.h.bf16 %v2399_v35 }
0x1940   :  { %1893 = vmatpush.msra.mxu2 %v2400_v36  ;;  %v2404_v49 = vpop.permute.xlu0 %2403 }
0x1941   :  { %v2405_v39 = vunpack.i.l.bf16 %v2404_v49  ;;  %v2406_v40 = vunpack.i.h.bf16 %v2404_v49  ;;  %v1635_v49 = vld [vmem:[%s3544_s4 + $0xec] sm:$0x3] }
0x1942   :  { %1894 = vmatpush.msra.mxu2 %v2401_v37 }
0x1944   :  { %1895 = vmatpush.msra.mxu2 %v2405_v39 }
0x1946   :  { %1896 = vmatpush.msra.mxu2 %v2406_v40 }
0x1995   :  { %v1839_v41 = vpop.xlane.xlu2 %1838 }
0x1996   :  { %2531 = vrcp.f32 %v1839_v41 }
0x199c   :  { %v2532_v46 = vpop.eup %2531 }
0x199d   :  { %v1853_v47 = vmul.f32 %v2532_v46, %v2524_v44  ;;  %v1842_v52 = vpop.xlane.xlu2 %1841 }
0x199e   :  { %2533 = vrcp.f32 %v1842_v52 }
0x199f   :  { %2340 = vmatmul.msk.f32.vlgmr.msra.gmra.mxu2 %vm30_vm0, %v1853_v47  ;;  %v1998_v47 = vperm.slane %v1635_v49, 0 }
0x19a4   :  { %v2534_v53 = vpop.eup %2533 }
0x19a5   :  { %v1845_v55 = vpop.xlane.xlu2 %1844  ;;  %v1854_v57 = vmul.f32 %v2534_v53, %v2526_v51  ;;  %v1648_v51 = vld [vmem:[%s3544_s4 + $0x140] sm:$0xff] }
0x19a6   :  { %2535 = vrcp.f32 %v1845_v55  ;;  %2024 = vmatpush.msra.mxu3 %v1648_v51 }
0x19a7   :  { %2341 = vmatmul.msk.f32.gmra.mxu2 %vm30_vm0, %v1854_v57  ;;  %v2001_v57 = vperm.slane %v1635_v49, 1 }
0x19a8   :  { %2025 = vmatpush.msra.mxu3 %v1647_v27 }
0x19aa   :  { %2026 = vmatpush.msra.mxu3 %v1646_v48 }
0x19ac   :  { %v2536_v63 = vpop.eup %2535 }
0x19ad   :  { %v1848_v58 = vpop.xlane.xlu2 %1847  ;;  %v1855_v59 = vmul.f32 %v2536_v63, %v2528_v30 }
0x19ae   :  { %2537 = vrcp.f32 %v1848_v58 }
0x19af   :  { %2342 = vmatmul.msk.f32.gmra.mxu2 %vm30_vm0, %v1855_v59 }
0x19b4   :  { %v2538_v61 = vpop.eup %2537 }
0x19b5   :  { %v1856_v62 = vmul.f32 %v2538_v61, %v2530_v32 }
0x19b7   :  { %2343 = vmatmul.msk.f32.gmra.mxu2 %vm30_vm0, %v1856_v62 }
0x1a22   :  { %v1898_v18 = vpop.f32.mrf.mxu2 }
0x1a2a   :  { %v1901_v1 = vpop.f32.mrf.mxu2 }
0x1a32   :  { %v1904_v8 = vpop.f32.mrf.mxu2 }
0x1a33   :  { %1912 = vrot.lane.b32.xlu0 %v1904_v8, %s2606_s22  ;;  %v1664_v8 = vld [vmem:[%s3544_s4 + $0x1c0] sm:$0xff] }
0x1a3a   :  { %v1907_v9 = vpop.f32.mrf.mxu2 }
0x1a3b   :  { %1914 = vrot.lane.b32.xlu1 %v1907_v9, %s2606_s22  ;;  %v1663_v9 = vld [vmem:[%s3544_s4 + $0x1b8] sm:$0xff]  ;;  %s2156_s22 = scalar_lea.vmem [#allocation2], %s2155_s24 }
0x1aa5   :  { %v1913_v16 = vpop.permute.xlu0 %1912 }
0x1aa6   :  { %v1918_v7 = vsel %vm266_vm2, %v1898_v18, %v1913_v16  ;;  %v1661_v16 = vld [vmem:[%s3544_s4 + $0x1a8] sm:$0xff] }
0x1aa7   :  { %2344 = vmatmul.msk.f32.vlgmr.msra.gmra.mxu0 %vm30_vm0, %v1918_v7  ;;  %v1660_v7 = vld [vmem:[%s3544_s4 + $0x1a0] sm:$0xff] }
0x1aad   :  { %v1915_v14 = vpop.permute.xlu1 %1914 }
0x1aae   :  { %v1919_v15 = vsel %vm266_vm2, %v1901_v1, %v1915_v14  ;;  %v1665_v1 = vld [vmem:[%s3544_s4 + $0x1c8] sm:$0xff]  ;;  %v1659_v14 = vld [vmem:[%s3544_s4 + $0x198] sm:$0xff] }
0x1aaf   :  { %2345 = vmatmul.msk.f32.gmra.mxu0 %vm30_vm0, %v1919_v15  ;;  %2074 = vmatpush.msrb.mxu1 %v1665_v1  ;;  %v1658_v15 = vld [vmem:[%s3544_s4 + $0x190] sm:$0xff] }
0x1ab0   :  { %2352 = vmatpush.msrb.mxu2 %v1665_v1 }
0x1ab1   :  { %2075 = vmatpush.msrb.mxu1 %v1664_v8 }
0x1ab2   :  { %2353 = vmatpush.msrb.mxu2 %v1664_v8 }
0x1ab3   :  { %2076 = vmatpush.msrb.mxu1 %v1663_v9 }
0x1ab4   :  { %2354 = vmatpush.msrb.mxu2 %v1663_v9 }
0x1ab5   :  { %2077 = vmatpush.msrb.mxu1 %v1662_v11 }
0x1ab6   :  { %2355 = vmatpush.msrb.mxu2 %v1662_v11 }
0x1ab7   :  { %2078 = vmatpush.msrb.mxu1 %v1661_v16 }
0x1ab8   :  { %2356 = vmatpush.msrb.mxu2 %v1661_v16 }
0x1ab9   :  { %2079 = vmatpush.msrb.mxu1 %v1660_v7 }
0x1aba   :  { %2357 = vmatpush.msrb.mxu2 %v1660_v7 }
0x1abb   :  { %2080 = vmatpush.msrb.mxu1 %v1659_v14 }
0x1abc   :  { %2358 = vmatpush.msrb.mxu2 %v1659_v14 }
0x1abd   :  { %2081 = vmatpush.msrb.mxu1 %v1658_v15 }
0x1abe   :  { %2359 = vmatpush.msrb.mxu2 %v1658_v15 }
0x1b24   :  { %v1943_v42 = vpop.f32.mrf.mxu0 }
0x1b25   :  { %v1949_v5 = vadd.f32 %v1943_v42, %v3322_v4  ;;  %v1656_v42 = vld [vmem:[%s3544_s4 + $0x180] sm:$0xff] }
0x1b27   :  { %v3413_v17 = vadd.f32 %v2420_v13, %v1949_v5  ;;  %v1655_v5 = vld [vmem:[%s3544_s4 + $0x178] sm:$0xff] }
0x1b29   :  { %v1954_v19 = vsel %vm30_vm0, %v3413_v17, 0.0 }
0x1b2a   :  { %1955 = vadd.xlane.f32.xlu2 %v1954_v19  ;;  %v1654_v19 = vld [vmem:[%s3544_s4 + $0x170] sm:$0xff] }
0x1b2c   :  { %v1946_v20 = vpop.f32.mrf.mxu0 }
0x1b2d   :  { %v1950_v25 = vadd.f32 %v1946_v20, %v3327_v43  ;;  %v2192_v43 = vmul.f32 %v3209_v60, %v3209_v60  ;;  %v1653_v20 = vld [vmem:[%s3544_s4 + $0x168] sm:$0xff] }
0x1b2f   :  { %v3418_v50 = vadd.f32 %v2420_v13, %v1950_v25  ;;  %v2194_v26 = vsel %vm2193_vm12, %v2192_v43, 0.0  ;;  %v1657_v13 = vld [vmem:[%s3544_s4 + $0x188] sm:$0xff] }
0x1b30   :  { %2082 = vmatpush.msrb.mxu1 %v1657_v13  ;;  %2360 = vmatpush.msrb.mxu2 %v1657_v13  ;;  %v2421_v25 = vld [vmem:[%s3544_s4 + $0xee] ss:$0 sm:$0xff] }
0x1b31   :  { %v1957_v56 = vsel %vm30_vm0, %v3418_v50, 0.0 }
0x1b32   :  { %1958 = vadd.xlane.f32.xlu0 %v1957_v56  ;;  %2083 = vmatpush.msrb.mxu1 %v1656_v42  ;;  %v1652_v56 = vld [vmem:[%s3544_s4 + $0x160] sm:$0xff] }
0x1b33   :  { %2361 = vmatpush.msrb.mxu2 %v1656_v42 }
0x1b34   :  { %2084 = vmatpush.msrb.mxu1 %v1655_v5 }
0x1b35   :  { %2362 = vmatpush.msrb.mxu2 %v1655_v5 }
0x1b36   :  { %2085 = vmatpush.msrb.mxu1 %v1654_v19 }
0x1b37   :  { %2363 = vmatpush.msrb.mxu2 %v1654_v19 }
0x1b38   :  { %2086 = vmatpush.msrb.mxu1 %v1653_v20 }
0x1b39   :  { %2364 = vmatpush.msrb.mxu2 %v1653_v20  ;;  %v2168_v20 = vld [vmem:[%s3544_s4 + $0x1f0] sm:$0xff] }
0x1b3a   :  { %2087 = vmatpush.msrb.mxu1 %v1652_v56  ;;  %2184 = vmatpush.msrb.mxu0 %v2168_v20 }
0x1b3b   :  { %2365 = vmatpush.msrb.mxu2 %v1652_v56 }
0x1b9d   :  { %v1956_v29 = vpop.xlane.xlu2 %1955 }
0x1b9e   :  { %v1960_v21 = vmul.f32 %v1956_v29, %v2649_v10 }
0x1ba0   :  { %v1962_v4 = vsub.f32 %v3413_v17, %v1960_v21  ;;  %v1651_v21 = vld [vmem:[%s3544_s4 + $0x158] sm:$0xff] }
0x1ba1   :  { %2088 = vmatpush.msrb.mxu1 %v1651_v21  ;;  %2366 = vmatpush.msrb.mxu2 %v1651_v21 }
0x1ba2   :  { %v1964_v22 = vmul.f32 %v1962_v4, %v1962_v4 }
0x1ba4   :  { %v1966_v23 = vsel %vm30_vm0, %v1964_v22, 0.0  ;;  %v1650_v22 = vld [vmem:[%s3544_s4 + $0x150] sm:$0xff] }
0x1ba5   :  { %1967 = vadd.xlane.f32.xlu1 %v1966_v23  ;;  %v1959_v34 = vpop.xlane.xlu0 %1958  ;;  %2089 = vmatpush.msrb.mxu1 %v1650_v22 }
0x1ba6   :  { %v1961_v0 = vmul.f32 %v1959_v34, %v2649_v10  ;;  %2367 = vmatpush.msrb.mxu2 %v1650_v22 }
0x1ba8   :  { %v1963_v44 = vsub.f32 %v3418_v50, %v1961_v0 }
0x1baa   :  { %v1965_v24 = vmul.f32 %v1963_v44, %v1963_v44 }
0x1bac   :  { %v1969_v38 = vsel %vm30_vm0, %v1965_v24, 0.0 }
0x1bad   :  { %2195 = vadd.xlane.f32.xlu1 %v2194_v26  ;;  %1970 = vadd.xlane.f32.xlu2 %v1969_v38 }
0x1c18   :  { %v1968_v28 = vpop.xlane.xlu1 %1967 }
0x1c19   :  { %v1972_v54 = vmul.f32 %v1968_v28, %v2649_v10 }
0x1c1b   :  { %v1974_v30 = vadd.f32 1e-05, %v1972_v54 }
0x1c1d   :  { %2539 = vrsqrt.f32 %v1974_v30  ;;  %vm1982_vm5 = vweird.f32 %v1974_v30 }
0x1c20   :  { %v1971_v12 = vpop.xlane.xlu2 %1970 }
0x1c21   :  { %v1973_v31 = vmul.f32 %v1971_v12, %v2649_v10 }
0x1c23   :  { %v2540_v32 = vpop.eup %2539  ;;  %v1975_v33 = vadd.f32 1e-05, %v1973_v31 }
0x1c24   :  { %v1977_v35 = vmul.f32 %v2540_v32, %v1974_v30  ;;  %vm1983_vm4 = vweird.f32 %v2540_v32 }
0x1c25   :  { %2541 = vrsqrt.f32 %v1975_v33  ;;  %vm1984_vm1 = vmor %vm1982_vm5, %vm1983_vm4  ;;  %vm1992_vm7 = vweird.f32 %v1975_v33 }
0x1c26   :  { %v1978_v36 = vmul.f32 %v2540_v32, %v1977_v35 }
0x1c28   :  { %v1979_v37 = vmul.f32 0.5, %v1978_v36 }
0x1c2a   :  { %v1980_v39 = vsub.f32 1.5, %v1979_v37 }
0x1c2b   :  { %v2542_v40 = vpop.eup %2541 }
0x1c2c   :  { %v1981_v41 = vmul.f32 %v2540_v32, %v1980_v39  ;;  %v1987_v46 = vmul.f32 %v2542_v40, %v1975_v33  ;;  %vm1993_vm6 = vweird.f32 %v2542_v40 }
0x1c2d   :  { %vm1994_vm15 = vmor %vm1992_vm7, %vm1993_vm6 }
0x1c2e   :  { %v1985_v52 = vsel %vm1984_vm1, %v2540_v32, %v1981_v41  ;;  %v1988_v53 = vmul.f32 %v2542_v40, %v1987_v46 }
0x1c2f   :  { %v1996_v55 = vmul.f32 %v1985_v52, %v1962_v4 }
0x1c30   :  { %v1989_v63 = vmul.f32 0.5, %v1988_v53 }
0x1c31   :  { %v1999_v58 = vmul.f32 %v1998_v47, %v1996_v55 }
0x1c32   :  { %v1990_v59 = vsub.f32 1.5, %v1989_v63  ;;  %v2422_v63 = vld [vmem:[%s3544_s4 + $0xef] ss:$0 sm:$0xff] }
0x1c33   :  { %v2002_v61 = vadd.f32 %v2001_v57, %v1999_v58 }
0x1c34   :  { %v1991_v62 = vmul.f32 %v2542_v40, %v1990_v59 }
0x1c35   :  { %2346 = vmatmul.msk.f32.vlgmr.msra.gmra.mxu3 %vm30_vm0, %v2002_v61 }
0x1c36   :  { %v1995_v2 = vsel %vm1994_vm15, %v2542_v40, %v1991_v62 }
0x1c37   :  { %v1997_v3 = vmul.f32 %v1995_v2, %v1963_v44 }
0x1c39   :  { %v2000_v45 = vmul.f32 %v1998_v47, %v1997_v3 }
0x1c3b   :  { %v2003_v18 = vadd.f32 %v2001_v57, %v2000_v45 }
0x1c3d   :  { %2347 = vmatmul.msk.f32.gmra.mxu3 %vm30_vm0, %v2003_v18 }
0x1cb8   :  { %v2028_v29 = vpop.f32.mrf.mxu3 }
0x1cb9   :  { %v2029_v4 = vadd.f32 %v2421_v25, %v2028_v29  ;;  %v2166_v29 = vld [vmem:[%s3544_s4 + $0x1e0] sm:$0xff] }
0x1cbb   :  { %v2034_v23 = vmul.f32 -1.702, %v2029_v4 }
0x1cbd   :  { %v2036_v34 = vmul.f32 1.442695, %v2034_v23  ;;  %v2165_v23 = vld [vmem:[%s3544_s4 + $0x1d8] sm:$0xff] }
0x1cbf   :  { %2543 = vpow2.f32 %v2036_v34 }
0x1cc0   :  { %v2031_v0 = vpop.f32.mrf.mxu3 }
0x1cc1   :  { %v2032_v43 = vadd.f32 %v2421_v25, %v2031_v0  ;;  %v2167_v25 = vld [vmem:[%s3544_s4 + $0x1e8] sm:$0xff] }
0x1cc2   :  { %2185 = vmatpush.msrb.mxu0 %v2167_v25 }
0x1cc3   :  { %v2035_v44 = vmul.f32 -1.702, %v2032_v43 }
0x1cc4   :  { %2186 = vmatpush.msrb.mxu0 %v2166_v29 }
0x1cc5   :  { %v2544_v24 = vpop.eup %2543  ;;  %v2038_v26 = vmul.f32 1.442695, %v2035_v44 }
0x1cc6   :  { %v2040_v38 = vadd.f32 1.0, %v2544_v24  ;;  %2187 = vmatpush.msrb.mxu0 %v2165_v23 }
0x1cc7   :  { %2545 = vpow2.f32 %v2038_v26 }
0x1cc8   :  { %2547 = vrcp.f32 %v2040_v38  ;;  %v2053_v54 = vand.u32 2147483648, %v2040_v38  ;;  %v2051_v12 = vand.u32 2147483647, %v2040_v38  ;;  %vm2047_vm13 = vweird.f32 %v2040_v38 }
0x1cca   :  { %v2054_v33 = vor.u32 1.1754944e-38, %v2053_v54  ;;  %vm2052_vm3 = vcmp.eq.f32.partialorder %v2051_v12, 8.507059e+37 }
0x1ccd   :  { %v2546_v6 = vpop.eup %2545 }
0x1cce   :  { %v2548_v51 = vpop.eup %2547  ;;  %v2041_v27 = vadd.f32 1.0, %v2546_v6 }
0x1ccf   :  { %v2043_v48 = vmul.f32 %v2548_v51, %v2040_v38  ;;  %vm2048_vm10 = vweird.f32 %v2548_v51 }
0x1cd0   :  { %2549 = vrcp.f32 %v2041_v27  ;;  %vm2049_vm14 = vmor %vm2047_vm13, %vm2048_vm10  ;;  %v2068_v40 = vand.u32 2147483648, %v2041_v27  ;;  %v2066_v46 = vand.u32 2147483647, %v2041_v27  ;;  %vm2062_vm9 = vweird.f32 %v2041_v27 }
0x1cd1   :  { %v2044_v28 = vsub.f32 1.0, %v2043_v48 }
0x1cd2   :  { %v2069_v52 = vor.u32 1.1754944e-38, %v2068_v40  ;;  %vm2067_vm5 = vcmp.eq.f32.partialorder %v2066_v46, 8.507059e+37 }
0x1cd3   :  { %v2045_v30 = vmul.f32 %v2548_v51, %v2044_v28 }
0x1cd5   :  { %v2046_v31 = vadd.f32 %v2548_v51, %v2045_v30 }
0x1cd6   :  { %v2550_v32 = vpop.eup %2549 }
0x1cd7   :  { %v2050_v35 = vsel %vm2049_vm14, %v2548_v51, %v2046_v31  ;;  %v2058_v36 = vmul.f32 %v2550_v32, %v2041_v27  ;;  %vm2063_vm8 = vweird.f32 %v2550_v32 }
0x1cd8   :  { %v2055_v37 = vsel %vm2052_vm3, %v2054_v33, %v2050_v35  ;;  %vm2064_vm4 = vmor %vm2062_vm9, %vm2063_vm8  ;;  %vm2251_vm9 = vcmask 9216  }
0x1cd9   :  { %v2072_v49 = vmul.f32 %v2055_v37, %v2029_v4  ;;  %v2059_v39 = vsub.f32 1.0, %v2058_v36 }
0x1cdb   :  { %v2060_v41 = vmul.f32 %v2550_v32, %v2059_v39  ;;  %2090 = vmatmul.f32.vlgmr.msrb.gmra.mxu1 %v2072_v49 }
0x1cdd   :  { %v2061_v47 = vadd.f32 %v2550_v32, %v2060_v41 }
0x1cdf   :  { %v2065_v53 = vsel %vm2064_vm4, %v2550_v32, %v2061_v47 }
0x1ce0   :  { %v2070_v55 = vsel %vm2067_vm5, %v2069_v52, %v2065_v53  ;;  %v2196_v52 = vpop.xlane.xlu1 %2195 }
0x1ce1   :  { %v2073_v57 = vmul.f32 %v2070_v55, %v2032_v43  ;;  %v2102_v43 = vld [vmem:[%s3544_s4 + $0x1d2] sm:$0x3]  ;;  %s2348_s4 = sld [smem:[#allocation4 + $0x1]]  ;;  %vm2203_vm14 = vweird.f32 %v2196_v52 }
0x1ce2   :  { %v2147_v26 = vperm.slane %v2102_v43, 0  ;;  %v2150_v38 = vperm.slane %v2102_v43, 1 }
0x1ce3   :  { %2093 = vmatmul.f32.vlgmr.msrb.gmra.mxu2 %v2073_v57 }
0x1ce7   :  { %s2159_s25 = scalar_lea.vmem [#allocation2], %s2348_s4 }
0x1d58   :  { %v2091_v58 = vpop.f32.mrf.mxu1 }
0x1d59   :  { %v2097_v59 = vadd.f32 %v2091_v58, %v3413_v17 }
0x1d5b   :  { %v2100_v61 = vadd.f32 %v2422_v63, %v2097_v59 }
0x1d5d   :  { %v2103_v62 = vsel %vm30_vm0, %v2100_v61, 0.0 }
0x1d5e   :  { %2104 = vadd.xlane.f32.xlu2 %v2103_v62 }
0x1d66   :  { %v2094_v2 = vpop.f32.mrf.mxu2 }
0x1d67   :  { %v2098_v3 = vadd.f32 %v2094_v2, %v3418_v50 }
0x1d69   :  { %v2101_v45 = vadd.f32 %v2422_v63, %v2098_v3 }
0x1d6b   :  { %v2106_v18 = vsel %vm30_vm0, %v2101_v45, 0.0 }
0x1d6c   :  { %2107 = vadd.xlane.f32.xlu2 %v2106_v18 }
0x1dd1   :  { %v2105_v1 = vpop.xlane.xlu2 %2104 }
0x1dd2   :  { %v2109_v8 = vmul.f32 %v2105_v1, %v2649_v10 }
0x1dd4   :  { %v2111_v9 = vsub.f32 %v2100_v61, %v2109_v8 }
0x1dd6   :  { %v2113_v11 = vmul.f32 %v2111_v9, %v2111_v9 }
0x1dd8   :  { %v2115_v16 = vsel %vm30_vm0, %v2113_v11, 0.0 }
0x1dd9   :  { %2116 = vadd.xlane.f32.xlu2 %v2115_v16 }
0x1ddf   :  { %v2108_v17 = vpop.xlane.xlu2 %2107 }
0x1de0   :  { %v2110_v7 = vmul.f32 %v2108_v17, %v2649_v10 }
0x1de2   :  { %v2112_v14 = vsub.f32 %v2101_v45, %v2110_v7 }
0x1de4   :  { %v2114_v15 = vmul.f32 %v2112_v14, %v2112_v14 }
0x1de6   :  { %v2118_v13 = vsel %vm30_vm0, %v2114_v15, 0.0 }
0x1de7   :  { %2119 = vadd.xlane.f32.xlu2 %v2118_v13 }
0x1e4c   :  { %v2117_v50 = vpop.xlane.xlu2 %2116 }
0x1e4d   :  { %v2121_v42 = vmul.f32 %v2117_v50, %v2649_v10 }
0x1e4f   :  { %v2123_v5 = vadd.f32 1e-05, %v2121_v42 }
0x1e51   :  { %2551 = vrsqrt.f32 %v2123_v5  ;;  %vm2131_vm6 = vweird.f32 %v2123_v5 }
0x1e57   :  { %v2552_v19 = vpop.eup %2551 }
0x1e58   :  { %v2126_v56 = vmul.f32 %v2552_v19, %v2123_v5  ;;  %vm2132_vm1 = vweird.f32 %v2552_v19 }
0x1e59   :  { %vm2133_vm7 = vmor %vm2131_vm6, %vm2132_vm1 }
0x1e5a   :  { %v2127_v21 = vmul.f32 %v2552_v19, %v2126_v56  ;;  %v2120_v4 = vpop.xlane.xlu2 %2119 }
0x1e5b   :  { %v2122_v22 = vmul.f32 %v2120_v4, %v2649_v10 }
0x1e5c   :  { %v2128_v34 = vmul.f32 0.5, %v2127_v21 }
0x1e5d   :  { %v2124_v0 = vadd.f32 1e-05, %v2122_v22 }
0x1e5e   :  { %v2129_v44 = vsub.f32 1.5, %v2128_v34 }
0x1e5f   :  { %2553 = vrsqrt.f32 %v2124_v0  ;;  %vm2141_vm10 = vweird.f32 %v2124_v0 }
0x1e60   :  { %v2130_v24 = vmul.f32 %v2552_v19, %v2129_v44  ;;  %2555 = vrsqrt.f32 %v2196_v52 }
0x1e62   :  { %v2134_v10 = vsel %vm2133_vm7, %v2552_v19, %v2130_v24 }
0x1e63   :  { %v2145_v6 = vmul.f32 %v2134_v10, %v2111_v9 }
0x1e65   :  { %v2554_v51 = vpop.eup %2553  ;;  %v2148_v27 = vmul.f32 %v2147_v26, %v2145_v6 }
0x1e66   :  { %v2136_v48 = vmul.f32 %v2554_v51, %v2124_v0  ;;  %vm2142_vm15 = vweird.f32 %v2554_v51  ;;  %v2556_v53 = vpop.eup %2555 }
0x1e67   :  { %v2151_v28 = vadd.f32 %v2150_v38, %v2148_v27  ;;  %vm2143_vm13 = vmor %vm2141_vm10, %vm2142_vm15  ;;  %v2198_v55 = vmul.f32 %v2556_v53, %v2196_v52 }
0x1e68   :  { %v2137_v54 = vmul.f32 %v2554_v51, %v2136_v48 }
0x1e69   :  { %2153 = vst.msk [vmem:[#allocation2] sm:$0xff] %vm30_vm0, %v2151_v28  ;;  %v2199_v63 = vmul.f32 %v2556_v53, %v2198_v55 }
0x1e6a   :  { %v2138_v30 = vmul.f32 0.5, %v2137_v54 }
0x1e6b   :  { %v2200_v59 = vmul.f32 0.5, %v2199_v63 }
0x1e6c   :  { %v2139_v12 = vsub.f32 1.5, %v2138_v30 }
0x1e6d   :  { %v2201_v2 = vsub.f32 1.5, %v2200_v59 }
0x1e6e   :  { %v2140_v31 = vmul.f32 %v2554_v51, %v2139_v12 }
0x1e6f   :  { %v2202_v18 = vmul.f32 %v2556_v53, %v2201_v2 }
0x1e70   :  { %v2144_v32 = vsel %vm2143_vm13, %v2554_v51, %v2140_v31 }
0x1e71   :  { %v2146_v33 = vmul.f32 %v2144_v32, %v2112_v14 }
0x1e73   :  { %v2149_v35 = vmul.f32 %v2147_v26, %v2146_v33 }
0x1e75   :  { %v2152_v36 = vadd.f32 %v2150_v38, %v2149_v35 }
0x1e77   :  { %2154 = vst.msk [vmem:[#allocation2 + $0x8] sm:$0xff] %vm30_vm0, %v2152_v36 }
0x1e7e   :  { %v2160_v37 = vld [vmem:[%s2159_s25] sm:$0x1] }
0x1e7f   :  { %v2162_v49 = vrot.slane %v2160_v37, 7  ;;  %v2157_v39 = vld [vmem:[%s2156_s22] sm:$0x1] }
0x1e81   :  { %v2164_v40 = vsel %vm1037_vm11, %v2157_v39, %v2162_v49  ;;  %vm2204_vm11 = vweird.f32 %v2556_v53 }
0x1e82   :  { %2349 = vmatmul.msk.f32.vlgmr.msrb.gmra.mxu0 %vm30_vm0, %v2164_v40  ;;  %vm2205_vm8 = vmor %vm2203_vm14, %vm2204_vm11 }
0x1e83   :  { %v2206_v9 = vsel %vm2205_vm8, %v2556_v53, %v2202_v18 }
0x1e84   :  { %v2207_v16 = vmul.f32 %v2206_v9, %v3209_v60 }
0x1eff   :  { %v2189_v41 = vpop.f32.mrf.mxu0 }
0x1f00   :  { %v2208_v46 = vmul.f32 %v2189_v41, %v2189_v41 }
0x1f02   :  { %v2209_v47 = vsel %vm2193_vm12, %v2208_v46, 0.0 }
0x1f03   :  { %2210 = vadd.xlane.f32.xlu0 %v2209_v47 }
0x1f76   :  { %v2211_v57 = vpop.xlane.xlu0 %2210 }
0x1f77   :  { %2557 = vrsqrt.f32 %v2211_v57  ;;  %vm2218_vm12 = vweird.f32 %v2211_v57 }
0x1f7d   :  { %v2558_v58 = vpop.eup %2557 }
0x1f7e   :  { %v2213_v61 = vmul.f32 %v2558_v58, %v2211_v57  ;;  %vm2219_vm0 = vweird.f32 %v2558_v58 }
0x1f7f   :  { %vm2220_vm3 = vmor %vm2218_vm12, %vm2219_vm0 }
0x1f80   :  { %v2214_v62 = vmul.f32 %v2558_v58, %v2213_v61 }
0x1f82   :  { %v2215_v3 = vmul.f32 0.5, %v2214_v62 }
0x1f84   :  { %v2216_v45 = vsub.f32 1.5, %v2215_v3 }
0x1f86   :  { %v2217_v1 = vmul.f32 %v2558_v58, %v2216_v45 }
0x1f88   :  { %v2221_v8 = vsel %vm2220_vm3, %v2558_v58, %v2217_v1 }
0x1f89   :  { %v2222_v11 = vmul.f32 %v2221_v8, %v2189_v41 }
0x1f8b   :  { %2350 = vmatpush.xpose.msk.msrb.mxu3 %vm266_vm2, %v2222_v11 }
0x1f8e   :  { %2351 = vmatmul.msk.f32.vlgmr.msrb.gmra.mxu3 %vm266_vm2, %v2207_v16 }
0x2011   :  { %v2246_v17 = vpop.f32.mrf.mxu3 }
0x2012   :  { %v2249_v7 = vmul.f32 0.14285715, %v2246_v17 }
0x2014   :  { %v2250_v14 = vsub.f32 1.0, %v2249_v7 }
0x2016   :  { %2252 = vst.msk [vmem:[#allocation5] sm:$0x3] %vm2251_vm9, %v2250_v14 }
0x2017   :  { %2263 = dma.vmem_to_hbm [thread:$0]  %s2259_s0, 32, %s2261_s26, [#allocation6]  }
0x2018   :  { %2597 = dma.done.wait [#allocation6], 32  }
0x2019   :  { %2598 = vsyncadd [#allocation6], 4294967264 }
0x201a   :  { %2268 = vsyncpa [#allocation6], 1 }

</bundles_post_ra>
